<compile_context>
chip_gen: v6e
topology: v6e:2x2x1
jax: 0.10.0
libtpu: 0.0.40
codegen_flags: <defaults>
</compile_context>

<pallas_src>
import functools

import jax
import jax.numpy as jnp
from jax.experimental import pallas as pl
from jax.experimental.pallas import tpu as pltpu

_EPS = 1e-5
_NEG = -9.0e15
_TBT_CAP = 128          # max (batch*time) slabs per grid step


# ----------------------------------------------------------------------------- kernel
def _encoder_stack_kernel(
    x_ref, pos_ref, mask_ref,
    g1_ref, be1_ref, wqk_ref, bqk_ref, wv_ref, bv_ref,
    wo_ref, bo_ref, g2_ref, be2_ref,
    w1_ref, bf1_ref, w2_ref, bf2_ref,
    o_ref,
    *, num_heads, num_layers):
    TBT, S, E = x_ref.shape
    M = TBT * S
    H = num_heads
    Dh = E // H
    scale = 1.0 / (Dh ** 0.5)

    x = x_ref[...].astype(jnp.float32).reshape(M, E)        # residual stream [M, E]
    pos = pos_ref[...].astype(jnp.float32).reshape(M, E)
    # Additive key mask (True == PAD); broadcasts over heads and query rows: [TBT,1,S]
    mask_bias = jnp.where(mask_ref[...] > 0.5, _NEG, 0.0)[:, None, :]

    def layernorm(z, g, b):
        mu = jnp.mean(z, axis=-1, keepdims=True)
        var = jnp.mean((z - mu) ** 2, axis=-1, keepdims=True)
        return (z - mu) * jax.lax.rsqrt(var + _EPS) * g + b

    for l in range(num_layers):                 # static loop; weights resident in VMEM
        # --- norm1 + self-attention (pre-LN; q = k = src2 + pos, v = src2) -----------
        src2 = layernorm(x, g1_ref[l], be1_ref[l])
        qk = jnp.dot(src2 + pos, wqk_ref[l],
                     preferred_element_type=jnp.float32) + bqk_ref[l]      # [M, 2E]
        v = jnp.dot(src2, wv_ref[l],
                    preferred_element_type=jnp.float32) + bv_ref[l]        # [M, E]
        q3 = qk[:, :E].reshape(TBT, S, E)
        k3 = qk[:, E:].reshape(TBT, S, E)
        v3 = v.reshape(TBT, S, E)

        heads = []
        for h in range(H):                      # static, small; slab-batched einsums
            sl = slice(h * Dh, (h + 1) * Dh)
            logits = jnp.einsum('bqd,bkd->bqk', q3[:, :, sl], k3[:, :, sl],
                                preferred_element_type=jnp.float32) * scale
            logits = logits + mask_bias
            logits = logits - jnp.max(logits, axis=-1, keepdims=True)
            p = jnp.exp(logits)
            # exact reciprocal kept: softmax over S=8 keys is negligible compute and it
            # preserves bit-tight agreement with the f32 reference (approx=True is a
            # valid EUP-slot optimization for large S).
            inv = pl.reciprocal(jnp.sum(p, axis=-1, keepdims=True), approx=False)
            heads.append(jnp.einsum('bqk,bkd->bqd', p * inv, v3[:, :, sl],
                                    preferred_element_type=jnp.float32))
        vals = jnp.concatenate(heads, axis=-1).reshape(M, E)
        attn_out = jnp.dot(vals, wo_ref[l],
                           preferred_element_type=jnp.float32) + bo_ref[l]
        x = x + attn_out                        # dropout1 == identity (eval)

        # --- norm2 + feed-forward -----------------------------------------------------
        src2 = layernorm(x, g2_ref[l], be2_ref[l])
        hdn = jnp.maximum(
            jnp.dot(src2, w1_ref[l], preferred_element_type=jnp.float32) + bf1_ref[l],
            0.0)
        ffn = jnp.dot(hdn, w2_ref[l], preferred_element_type=jnp.float32) + bf2_ref[l]
        x = x + ffn                             # dropout2 == identity (eval)

    o_ref[...] = x.reshape(TBT, S, E).astype(o_ref.dtype)


# ----------------------------------------------------------------------------- wrapper
def transformer_3d_encoder(encoder, pos, mask, coord, params, num_heads):
    """encoder/pos: [B, T, N, E]; mask: [B, T, N] bool (True = PAD); coord unused."""
    del coord  # the 'Normal' encoder never uses coord
    B, T, N, E = encoder.shape
    BT = B * T
    L = len(params)

    x = encoder.reshape(BT, N, E)
    p = pos.reshape(BT, N, E)
    m = mask.reshape(BT, N).astype(jnp.float32)

    # Tile choice: up to _TBT_CAP slabs per grid step (multiple of 8, or full extent).
    if BT <= _TBT_CAP:
        tbt, bt_pad = BT, BT
    else:
        tbt = _TBT_CAP
        bt_pad = ((BT + tbt - 1) // tbt) * tbt
    if bt_pad != BT:
        padn = bt_pad - BT
        x = jnp.pad(x, ((0, padn), (0, 0), (0, 0)))
        p = jnp.pad(p, ((0, padn), (0, 0), (0, 0)))
        m = jnp.pad(m, ((0, padn), (0, 0)))          # padded slabs: no PAD flags; sliced off

    # Stack layer weights along a leading L axis; fuse Wq|Wk (shared q/k input).
    def stk(key):
        return jnp.stack([lp[key] for lp in params], axis=0)
    wqk = jnp.stack([jnp.concatenate([lp['wq'], lp['wk']], axis=-1) for lp in params], 0)
    bqk = jnp.stack([jnp.concatenate([lp['bq'], lp['bk']], axis=-1) for lp in params], 0)
    weights = [stk('g1'), stk('be1'), wqk, bqk, stk('wv'), stk('bv'),
               stk('wo'), stk('bo'), stk('g2'), stk('be2'),
               stk('w1'), stk('bf1'), stk('w2'), stk('bf2')]

    data_specs = [
        pl.BlockSpec((tbt, N, E), lambda i: (i, 0, 0)),
        pl.BlockSpec((tbt, N, E), lambda i: (i, 0, 0)),
        pl.BlockSpec((tbt, N), lambda i: (i, 0)),
    ]
    # Full-array weight blocks; same block index every step => fetched once, kept in VMEM.
    weight_specs = [
        pl.BlockSpec(w.shape, lambda i, nd=w.ndim: (0,) * nd) for w in weights
    ]

    out = pl.pallas_call(
        functools.partial(_encoder_stack_kernel, num_heads=num_heads, num_layers=L),
        out_shape=jax.ShapeDtypeStruct((bt_pad, N, E), x.dtype),
        grid=(bt_pad // tbt,),
        in_specs=data_specs + weight_specs,
        out_specs=pl.BlockSpec((tbt, N, E), lambda i: (i, 0, 0)),
        compiler_params=pltpu.CompilerParams(
            dimension_semantics=("parallel",),       # independent slabs -> v7x megacore
            vmem_limit_bytes=32 * 1024 * 1024,       # blocks+stacked weights << 32 MiB
        ),
    )(x, p, m, *weights)
    return out[:BT].reshape(B, T, N, E)


# ----------------------------------------------------------------------------- params
def _xavier(key, shape):
    fan_in, fan_out = shape
    a = (6.0 / (fan_in + fan_out)) ** 0.5
    return jax.random.uniform(key, shape, jnp.float32, -a, a)


def init_params(key, num_layers, d_model, dim_ff):
    """1x1-conv weights stored pre-transposed as [in_ch, out_ch]."""
    params = []
    for _ in range(num_layers):
        key, k0, k1, k2, k3, k4, k5 = jax.random.split(key, 7)
        params.append(dict(
            g1=jnp.ones((1, d_model), jnp.float32),
            be1=jnp.zeros((1, d_model), jnp.float32),
            wq=_xavier(k0, (d_model, d_model)), bq=jnp.zeros((1, d_model), jnp.float32),
            wk=_xavier(k1, (d_model, d_model)), bk=jnp.zeros((1, d_model), jnp.float32),
            wv=_xavier(k2, (d_model, d_model)), bv=jnp.zeros((1, d_model), jnp.float32),
            wo=_xavier(k3, (d_model, d_model)), bo=jnp.zeros((1, d_model), jnp.float32),
            g2=jnp.ones((1, d_model), jnp.float32),
            be2=jnp.zeros((1, d_model), jnp.float32),
            w1=_xavier(k4, (d_model, dim_ff)), bf1=jnp.zeros((1, dim_ff), jnp.float32),
            w2=_xavier(k5, (dim_ff, d_model)), bf2=jnp.zeros((1, d_model), jnp.float32),
        ))
    return params


# ----------------------------------------------------------------------------- reference
def _reference(encoder, pos, mask, params, H):
    B, T, N, E = encoder.shape
    x = encoder.reshape(B * T, N, E)
    p = pos.reshape(B * T, N, E)
    m = mask.reshape(B * T, N)
    Dh = E // H

    def ln(z, g, b):
        mu = z.mean(-1, keepdims=True)
        var = ((z - mu) ** 2).mean(-1, keepdims=True)
        return (z - mu) / jnp.sqrt(var + _EPS) * g + b

    for lp in params:
        src2 = ln(x, lp['g1'], lp['be1'])
        qk = src2 + p
        q = qk @ lp['wq'] + lp['bq']
        k = qk @ lp['wk'] + lp['bk']
        v = src2 @ lp['wv'] + lp['bv']
        BT, S, _ = x.shape
        qh = q.reshape(BT, S, H, Dh).transpose(0, 2, 1, 3)
        kh = k.reshape(BT, S, H, Dh).transpose(0, 2, 1, 3)
        vh = v.reshape(BT, S, H, Dh).transpose(0, 2, 1, 3)
        logits = jnp.einsum('bhqd,bhkd->bhqk', qh, kh) / (Dh ** 0.5)
        logits = jnp.where(m[:, None, None, :], _NEG, logits)
        attn = jax.nn.softmax(logits, axis=-1)
        vals = jnp.einsum('bhqk,bhkd->bhqd', attn, vh)
        vals = vals.transpose(0, 2, 1, 3).reshape(BT, S, E)
        x = x + vals @ lp['wo'] + lp['bo']
        src2 = ln(x, lp['g2'], lp['be2'])
        hdn = jax.nn.relu(src2 @ lp['w1'] + lp['bf1'])
        x = x + hdn @ lp['w2'] + lp['bf2']
    return x.reshape(B, T, N, E)


# ----------------------------------------------------------------------------- main
if __name__ == "__main__":
    B, T, N = 2, 4, 8
    d_model, nhead, dim_ff, num_layers = 32, 4, 64, 2

    key = jax.random.PRNGKey(0)
    k_enc, k_pos, k_mask, k_coord, k_par = jax.random.split(key, 5)

    encoder = jax.random.normal(k_enc, (B, T, N, d_model), jnp.float32)
    pos = jax.random.normal(k_pos, (B, T, N, d_model), jnp.float32)
    mask = jax.random.uniform(k_mask, (B, T, N)) < 0.2        # True == PAD
    coord = jax.random.normal(k_coord, (B, T, N, 2), jnp.float32)  # unused ('Normal')

    params = init_params(k_par, num_layers, d_model, dim_ff)

    out = transformer_3d_encoder(encoder, pos, mask, coord, params, nhead)
    out = jax.block_until_ready(out)

    ref = _reference(encoder, pos, mask, params, nhead)
    assert out.shape == (B, T, N, d_model)
    assert float(jnp.max(jnp.abs(out - ref))) < 1e-3, "mismatch vs pure-JAX reference"

    # TODO(synk): Dropout / Dropout2d are stochastic at train time; implemented as identity (eval mode).
    print("KERNEL_OK")
</pallas_src>

<mosaic_0001>
module attributes {stable_mosaic.version = 11 : i64} {
  func.func @_encoder_stack_kernel(%arg0: i32, %arg1: memref<8x8x32xf32, #tpu.memory_space<vmem>>, %arg2: memref<8x8x32xf32, #tpu.memory_space<vmem>>, %arg3: memref<8x8xf32, #tpu.memory_space<vmem>>, %arg4: memref<2x1x32xf32, #tpu.memory_space<vmem>>, %arg5: memref<2x1x32xf32, #tpu.memory_space<vmem>>, %arg6: memref<2x32x64xf32, #tpu.memory_space<vmem>>, %arg7: memref<2x1x64xf32, #tpu.memory_space<vmem>>, %arg8: memref<2x32x32xf32, #tpu.memory_space<vmem>>, %arg9: memref<2x1x32xf32, #tpu.memory_space<vmem>>, %arg10: memref<2x32x32xf32, #tpu.memory_space<vmem>>, %arg11: memref<2x1x32xf32, #tpu.memory_space<vmem>>, %arg12: memref<2x1x32xf32, #tpu.memory_space<vmem>>, %arg13: memref<2x1x32xf32, #tpu.memory_space<vmem>>, %arg14: memref<2x32x64xf32, #tpu.memory_space<vmem>>, %arg15: memref<2x1x64xf32, #tpu.memory_space<vmem>>, %arg16: memref<2x64x32xf32, #tpu.memory_space<vmem>>, %arg17: memref<2x1x32xf32, #tpu.memory_space<vmem>>, %arg18: memref<8x8x32xf32, #tpu.memory_space<vmem>>) attributes {dimension_semantics = [#tpu.dimension_semantics<parallel>], iteration_bounds = array<i64: 1>, scalar_prefetch = 0 : i64, scratch_operands = 0 : i64, tpu.core_type = #tpu.core_type<tc>, window_params = [{transform_indices = @transform_0, window_bounds = array<i64: 8, 8, 32>}, {transform_indices = @transform_1, window_bounds = array<i64: 8, 8, 32>}, {transform_indices = @transform_2, window_bounds = array<i64: 8, 8>}, {pipeline_mode = #tpu.pipeline_mode<synchronous>, transform_indices = @transform_3, window_bounds = array<i64: 2, 1, 32>}, {pipeline_mode = #tpu.pipeline_mode<synchronous>, transform_indices = @transform_4, window_bounds = array<i64: 2, 1, 32>}, {pipeline_mode = #tpu.pipeline_mode<synchronous>, transform_indices = @transform_5, window_bounds = array<i64: 2, 32, 64>}, {pipeline_mode = #tpu.pipeline_mode<synchronous>, transform_indices = @transform_6, window_bounds = array<i64: 2, 1, 64>}, {pipeline_mode = #tpu.pipeline_mode<synchronous>, transform_indices = @transform_7, window_bounds = array<i64: 2, 32, 32>}, {pipeline_mode = #tpu.pipeline_mode<synchronous>, transform_indices = @transform_8, window_bounds = array<i64: 2, 1, 32>}, {pipeline_mode = #tpu.pipeline_mode<synchronous>, transform_indices = @transform_9, window_bounds = array<i64: 2, 32, 32>}, {pipeline_mode = #tpu.pipeline_mode<synchronous>, transform_indices = @transform_10, window_bounds = array<i64: 2, 1, 32>}, {pipeline_mode = #tpu.pipeline_mode<synchronous>, transform_indices = @transform_11, window_bounds = array<i64: 2, 1, 32>}, {pipeline_mode = #tpu.pipeline_mode<synchronous>, transform_indices = @transform_12, window_bounds = array<i64: 2, 1, 32>}, {pipeline_mode = #tpu.pipeline_mode<synchronous>, transform_indices = @transform_13, window_bounds = array<i64: 2, 32, 64>}, {pipeline_mode = #tpu.pipeline_mode<synchronous>, transform_indices = @transform_14, window_bounds = array<i64: 2, 1, 64>}, {pipeline_mode = #tpu.pipeline_mode<synchronous>, transform_indices = @transform_15, window_bounds = array<i64: 2, 64, 32>}, {pipeline_mode = #tpu.pipeline_mode<synchronous>, transform_indices = @transform_16, window_bounds = array<i64: 2, 1, 32>}, {transform_indices = @transform_17, window_bounds = array<i64: 8, 8, 32>}]} {
    %c0 = arith.constant 0 : index
    %c0_0 = arith.constant 0 : index
    %c0_1 = arith.constant 0 : index
    %0 = vector.load %arg1[%c0, %c0_0, %c0_1] : memref<8x8x32xf32, #tpu.memory_space<vmem>>, vector<8x8x32xf32>
    %1 = vector.shape_cast %0 : vector<8x8x32xf32> to vector<64x32xf32>
    %c0_2 = arith.constant 0 : index
    %c0_3 = arith.constant 0 : index
    %c0_4 = arith.constant 0 : index
    %2 = vector.load %arg2[%c0_2, %c0_3, %c0_4] : memref<8x8x32xf32, #tpu.memory_space<vmem>>, vector<8x8x32xf32>
    %3 = vector.shape_cast %2 : vector<8x8x32xf32> to vector<64x32xf32>
    %c0_5 = arith.constant 0 : index
    %c0_6 = arith.constant 0 : index
    %4 = vector.load %arg3[%c0_5, %c0_6] : memref<8x8xf32, #tpu.memory_space<vmem>>, vector<8x8xf32>
    %cst = arith.constant 5.000000e-01 : f32
    %5 = vector.broadcast %cst : f32 to vector<8x8xf32>
    %6 = arith.cmpf ogt, %4, %5 : vector<8x8xf32>
    %cst_7 = arith.constant -9.000000e+15 : f32
    %cst_8 = arith.constant 0.000000e+00 : f32
    %7 = vector.broadcast %cst_7 : f32 to vector<8x8xf32>
    %8 = vector.broadcast %cst_8 : f32 to vector<8x8xf32>
    %9 = arith.select %6, %7, %8 : vector<8x8xi1>, vector<8x8xf32>
    %10 = vector.shape_cast %9 : vector<8x8xf32> to vector<8x1x8xf32>
    %c0_9 = arith.constant 0 : index
    %c0_10 = arith.constant 0 : index
    %c0_11 = arith.constant 0 : index
    %11 = vector.load %arg4[%c0_9, %c0_10, %c0_11] : memref<2x1x32xf32, #tpu.memory_space<vmem>>, vector<1x1x32xf32>
    %12 = vector.shape_cast %11 : vector<1x1x32xf32> to vector<1x32xf32>
    %c0_12 = arith.constant 0 : index
    %c0_13 = arith.constant 0 : index
    %c0_14 = arith.constant 0 : index
    %13 = vector.load %arg5[%c0_12, %c0_13, %c0_14] : memref<2x1x32xf32, #tpu.memory_space<vmem>>, vector<1x1x32xf32>
    %14 = vector.shape_cast %13 : vector<1x1x32xf32> to vector<1x32xf32>
    %cst_15 = arith.constant dense<0.000000e+00> : vector<64xf32>
    %15 = vector.multi_reduction <add>, %1, %cst_15 [1] : vector<64x32xf32> to vector<64xf32>
    %16 = vector.shape_cast %15 : vector<64xf32> to vector<64x1xf32>
    %cst_16 = arith.constant 3.200000e+01 : f32
    %17 = vector.broadcast %cst_16 : f32 to vector<64x1xf32>
    %18 = arith.divf %16, %17 : vector<64x1xf32>
    %19 = vector.broadcast %18 : vector<64x1xf32> to vector<64x32xf32>
    %20 = arith.subf %1, %19 : vector<64x32xf32>
    %21 = arith.mulf %20, %20 : vector<64x32xf32>
    %cst_17 = arith.constant dense<0.000000e+00> : vector<64xf32>
    %22 = vector.multi_reduction <add>, %21, %cst_17 [1] : vector<64x32xf32> to vector<64xf32>
    %23 = vector.shape_cast %22 : vector<64xf32> to vector<64x1xf32>
    %cst_18 = arith.constant 3.200000e+01 : f32
    %24 = vector.broadcast %cst_18 : f32 to vector<64x1xf32>
    %25 = arith.divf %23, %24 : vector<64x1xf32>
    %26 = vector.broadcast %18 : vector<64x1xf32> to vector<64x32xf32>
    %27 = arith.subf %1, %26 : vector<64x32xf32>
    %cst_19 = arith.constant 9.99999974E-6 : f32
    %28 = vector.broadcast %cst_19 : f32 to vector<64x1xf32>
    %29 = arith.addf %25, %28 : vector<64x1xf32>
    %30 = math.rsqrt %29 : vector<64x1xf32>
    %31 = vector.broadcast %30 : vector<64x1xf32> to vector<64x32xf32>
    %32 = arith.mulf %27, %31 : vector<64x32xf32>
    %33 = vector.broadcast %12 : vector<1x32xf32> to vector<64x32xf32>
    %34 = arith.mulf %32, %33 : vector<64x32xf32>
    %35 = vector.broadcast %14 : vector<1x32xf32> to vector<64x32xf32>
    %36 = arith.addf %34, %35 : vector<64x32xf32>
    %37 = arith.addf %36, %3 : vector<64x32xf32>
    %c0_20 = arith.constant 0 : index
    %c0_21 = arith.constant 0 : index
    %c0_22 = arith.constant 0 : index
    %38 = vector.load %arg6[%c0_20, %c0_21, %c0_22] : memref<2x32x64xf32, #tpu.memory_space<vmem>>, vector<1x32x64xf32>
    %39 = vector.shape_cast %38 : vector<1x32x64xf32> to vector<32x64xf32>
    %cst_23 = arith.constant dense<0.000000e+00> : vector<64x64xf32>
    %40 = tpu.matmul %37, %39, %cst_23 {dimension_numbers = #tpu.dot_dimension_numbers<[1], [0], [0], [1], [0, 0, 1, 1], [], []>} : vector<64x32xf32>, vector<32x64xf32>, vector<64x64xf32> -> vector<64x64xf32>
    %c0_24 = arith.constant 0 : index
    %c0_25 = arith.constant 0 : index
    %c0_26 = arith.constant 0 : index
    %41 = vector.load %arg7[%c0_24, %c0_25, %c0_26] : memref<2x1x64xf32, #tpu.memory_space<vmem>>, vector<1x1x64xf32>
    %42 = vector.shape_cast %41 : vector<1x1x64xf32> to vector<1x64xf32>
    %43 = vector.broadcast %42 : vector<1x64xf32> to vector<64x64xf32>
    %44 = arith.addf %40, %43 : vector<64x64xf32>
    %c0_27 = arith.constant 0 : index
    %c0_28 = arith.constant 0 : index
    %c0_29 = arith.constant 0 : index
    %45 = vector.load %arg8[%c0_27, %c0_28, %c0_29] : memref<2x32x32xf32, #tpu.memory_space<vmem>>, vector<1x32x32xf32>
    %46 = vector.shape_cast %45 : vector<1x32x32xf32> to vector<32x32xf32>
    %cst_30 = arith.constant dense<0.000000e+00> : vector<64x32xf32>
    %47 = tpu.matmul %36, %46, %cst_30 {dimension_numbers = #tpu.dot_dimension_numbers<[1], [0], [0], [1], [0, 0, 1, 1], [], []>} : vector<64x32xf32>, vector<32x32xf32>, vector<64x32xf32> -> vector<64x32xf32>
    %c0_31 = arith.constant 0 : index
    %c0_32 = arith.constant 0 : index
    %c0_33 = arith.constant 0 : index
    %48 = vector.load %arg9[%c0_31, %c0_32, %c0_33] : memref<2x1x32xf32, #tpu.memory_space<vmem>>, vector<1x1x32xf32>
    %49 = vector.shape_cast %48 : vector<1x1x32xf32> to vector<1x32xf32>
    %50 = vector.broadcast %49 : vector<1x32xf32> to vector<64x32xf32>
    %51 = arith.addf %47, %50 : vector<64x32xf32>
    %52 = vector.extract_strided_slice %44 {offsets = [0, 0], sizes = [64, 32], strides = [1, 1]} : vector<64x64xf32> to vector<64x32xf32>
    %53 = vector.shape_cast %52 : vector<64x32xf32> to vector<8x8x32xf32>
    %54 = vector.extract_strided_slice %44 {offsets = [0, 32], sizes = [64, 32], strides = [1, 1]} : vector<64x64xf32> to vector<64x32xf32>
    %55 = vector.shape_cast %54 : vector<64x32xf32> to vector<8x8x32xf32>
    %56 = vector.shape_cast %51 : vector<64x32xf32> to vector<8x8x32xf32>
    %57 = vector.extract_strided_slice %53 {offsets = [0, 0, 0], sizes = [8, 8, 8], strides = [1, 1, 1]} : vector<8x8x32xf32> to vector<8x8x8xf32>
    %58 = vector.extract_strided_slice %55 {offsets = [0, 0, 0], sizes = [8, 8, 8], strides = [1, 1, 1]} : vector<8x8x32xf32> to vector<8x8x8xf32>
    "tpu.trace_start"() <{level = 10 : i32, message = "bqd,bkd->bqk"}> : () -> ()
    %cst_34 = arith.constant dense<0.000000e+00> : vector<8x8x8xf32>
    %59 = tpu.matmul %57, %58, %cst_34 {dimension_numbers = #tpu.dot_dimension_numbers<[2], [2], [1], [1], [0, 0, 0, 1, 1, 1], [0], [0]>} : vector<8x8x8xf32>, vector<8x8x8xf32>, vector<8x8x8xf32> -> vector<8x8x8xf32>
    "tpu.trace_stop"() : () -> ()
    %cst_35 = arith.constant 0.353553385 : f32
    %60 = vector.broadcast %cst_35 : f32 to vector<8x8x8xf32>
    %61 = arith.mulf %59, %60 : vector<8x8x8xf32>
    %62 = vector.broadcast %10 : vector<8x1x8xf32> to vector<8x8x8xf32>
    %63 = arith.addf %61, %62 : vector<8x8x8xf32>
    %cst_36 = arith.constant dense<0xFF800000> : vector<8x8xf32>
    %64 = vector.multi_reduction <maximumf>, %63, %cst_36 [2] : vector<8x8x8xf32> to vector<8x8xf32>
    %65 = vector.shape_cast %64 : vector<8x8xf32> to vector<8x8x1xf32>
    %66 = vector.broadcast %65 : vector<8x8x1xf32> to vector<8x8x8xf32>
    %67 = arith.subf %63, %66 : vector<8x8x8xf32>
    %68 = math.exp %67 : vector<8x8x8xf32>
    %cst_37 = arith.constant dense<0.000000e+00> : vector<8x8xf32>
    %69 = vector.multi_reduction <add>, %68, %cst_37 [2] : vector<8x8x8xf32> to vector<8x8xf32>
    %70 = vector.shape_cast %69 : vector<8x8xf32> to vector<8x8x1xf32>
    %71 = tpu.reciprocal %70 : vector<8x8x1xf32> -> vector<8x8x1xf32>
    %72 = vector.broadcast %71 : vector<8x8x1xf32> to vector<8x8x8xf32>
    %73 = arith.mulf %68, %72 : vector<8x8x8xf32>
    %74 = vector.extract_strided_slice %56 {offsets = [0, 0, 0], sizes = [8, 8, 8], strides = [1, 1, 1]} : vector<8x8x32xf32> to vector<8x8x8xf32>
    "tpu.trace_start"() <{level = 10 : i32, message = "bqk,bkd->bqd"}> : () -> ()
    %cst_38 = arith.constant dense<0.000000e+00> : vector<8x8x8xf32>
    %75 = tpu.matmul %73, %74, %cst_38 {dimension_numbers = #tpu.dot_dimension_numbers<[2], [1], [1], [2], [0, 0, 0, 1, 1, 2], [0], [0]>} : vector<8x8x8xf32>, vector<8x8x8xf32>, vector<8x8x8xf32> -> vector<8x8x8xf32>
    "tpu.trace_stop"() : () -> ()
    %76 = vector.extract_strided_slice %53 {offsets = [0, 0, 8], sizes = [8, 8, 8], strides = [1, 1, 1]} : vector<8x8x32xf32> to vector<8x8x8xf32>
    %77 = vector.extract_strided_slice %55 {offsets = [0, 0, 8], sizes = [8, 8, 8], strides = [1, 1, 1]} : vector<8x8x32xf32> to vector<8x8x8xf32>
    "tpu.trace_start"() <{level = 10 : i32, message = "bqd,bkd->bqk"}> : () -> ()
    %cst_39 = arith.constant dense<0.000000e+00> : vector<8x8x8xf32>
    %78 = tpu.matmul %76, %77, %cst_39 {dimension_numbers = #tpu.dot_dimension_numbers<[2], [2], [1], [1], [0, 0, 0, 1, 1, 1], [0], [0]>} : vector<8x8x8xf32>, vector<8x8x8xf32>, vector<8x8x8xf32> -> vector<8x8x8xf32>
    "tpu.trace_stop"() : () -> ()
    %cst_40 = arith.constant 0.353553385 : f32
    %79 = vector.broadcast %cst_40 : f32 to vector<8x8x8xf32>
    %80 = arith.mulf %78, %79 : vector<8x8x8xf32>
    %81 = vector.broadcast %10 : vector<8x1x8xf32> to vector<8x8x8xf32>
    %82 = arith.addf %80, %81 : vector<8x8x8xf32>
    %cst_41 = arith.constant dense<0xFF800000> : vector<8x8xf32>
    %83 = vector.multi_reduction <maximumf>, %82, %cst_41 [2] : vector<8x8x8xf32> to vector<8x8xf32>
    %84 = vector.shape_cast %83 : vector<8x8xf32> to vector<8x8x1xf32>
    %85 = vector.broadcast %84 : vector<8x8x1xf32> to vector<8x8x8xf32>
    %86 = arith.subf %82, %85 : vector<8x8x8xf32>
    %87 = math.exp %86 : vector<8x8x8xf32>
    %cst_42 = arith.constant dense<0.000000e+00> : vector<8x8xf32>
    %88 = vector.multi_reduction <add>, %87, %cst_42 [2] : vector<8x8x8xf32> to vector<8x8xf32>
    %89 = vector.shape_cast %88 : vector<8x8xf32> to vector<8x8x1xf32>
    %90 = tpu.reciprocal %89 : vector<8x8x1xf32> -> vector<8x8x1xf32>
    %91 = vector.broadcast %90 : vector<8x8x1xf32> to vector<8x8x8xf32>
    %92 = arith.mulf %87, %91 : vector<8x8x8xf32>
    %93 = vector.extract_strided_slice %56 {offsets = [0, 0, 8], sizes = [8, 8, 8], strides = [1, 1, 1]} : vector<8x8x32xf32> to vector<8x8x8xf32>
    "tpu.trace_start"() <{level = 10 : i32, message = "bqk,bkd->bqd"}> : () -> ()
    %cst_43 = arith.constant dense<0.000000e+00> : vector<8x8x8xf32>
    %94 = tpu.matmul %92, %93, %cst_43 {dimension_numbers = #tpu.dot_dimension_numbers<[2], [1], [1], [2], [0, 0, 0, 1, 1, 2], [0], [0]>} : vector<8x8x8xf32>, vector<8x8x8xf32>, vector<8x8x8xf32> -> vector<8x8x8xf32>
    "tpu.trace_stop"() : () -> ()
    %95 = vector.extract_strided_slice %53 {offsets = [0, 0, 16], sizes = [8, 8, 8], strides = [1, 1, 1]} : vector<8x8x32xf32> to vector<8x8x8xf32>
    %96 = vector.extract_strided_slice %55 {offsets = [0, 0, 16], sizes = [8, 8, 8], strides = [1, 1, 1]} : vector<8x8x32xf32> to vector<8x8x8xf32>
    "tpu.trace_start"() <{level = 10 : i32, message = "bqd,bkd->bqk"}> : () -> ()
    %cst_44 = arith.constant dense<0.000000e+00> : vector<8x8x8xf32>
    %97 = tpu.matmul %95, %96, %cst_44 {dimension_numbers = #tpu.dot_dimension_numbers<[2], [2], [1], [1], [0, 0, 0, 1, 1, 1], [0], [0]>} : vector<8x8x8xf32>, vector<8x8x8xf32>, vector<8x8x8xf32> -> vector<8x8x8xf32>
    "tpu.trace_stop"() : () -> ()
    %cst_45 = arith.constant 0.353553385 : f32
    %98 = vector.broadcast %cst_45 : f32 to vector<8x8x8xf32>
    %99 = arith.mulf %97, %98 : vector<8x8x8xf32>
    %100 = vector.broadcast %10 : vector<8x1x8xf32> to vector<8x8x8xf32>
    %101 = arith.addf %99, %100 : vector<8x8x8xf32>
    %cst_46 = arith.constant dense<0xFF800000> : vector<8x8xf32>
    %102 = vector.multi_reduction <maximumf>, %101, %cst_46 [2] : vector<8x8x8xf32> to vector<8x8xf32>
    %103 = vector.shape_cast %102 : vector<8x8xf32> to vector<8x8x1xf32>
    %104 = vector.broadcast %103 : vector<8x8x1xf32> to vector<8x8x8xf32>
    %105 = arith.subf %101, %104 : vector<8x8x8xf32>
    %106 = math.exp %105 : vector<8x8x8xf32>
    %cst_47 = arith.constant dense<0.000000e+00> : vector<8x8xf32>
    %107 = vector.multi_reduction <add>, %106, %cst_47 [2] : vector<8x8x8xf32> to vector<8x8xf32>
    %108 = vector.shape_cast %107 : vector<8x8xf32> to vector<8x8x1xf32>
    %109 = tpu.reciprocal %108 : vector<8x8x1xf32> -> vector<8x8x1xf32>
    %110 = vector.broadcast %109 : vector<8x8x1xf32> to vector<8x8x8xf32>
    %111 = arith.mulf %106, %110 : vector<8x8x8xf32>
    %112 = vector.extract_strided_slice %56 {offsets = [0, 0, 16], sizes = [8, 8, 8], strides = [1, 1, 1]} : vector<8x8x32xf32> to vector<8x8x8xf32>
    "tpu.trace_start"() <{level = 10 : i32, message = "bqk,bkd->bqd"}> : () -> ()
    %cst_48 = arith.constant dense<0.000000e+00> : vector<8x8x8xf32>
    %113 = tpu.matmul %111, %112, %cst_48 {dimension_numbers = #tpu.dot_dimension_numbers<[2], [1], [1], [2], [0, 0, 0, 1, 1, 2], [0], [0]>} : vector<8x8x8xf32>, vector<8x8x8xf32>, vector<8x8x8xf32> -> vector<8x8x8xf32>
    "tpu.trace_stop"() : () -> ()
    %114 = vector.extract_strided_slice %53 {offsets = [0, 0, 24], sizes = [8, 8, 8], strides = [1, 1, 1]} : vector<8x8x32xf32> to vector<8x8x8xf32>
    %115 = vector.extract_strided_slice %55 {offsets = [0, 0, 24], sizes = [8, 8, 8], strides = [1, 1, 1]} : vector<8x8x32xf32> to vector<8x8x8xf32>
    "tpu.trace_start"() <{level = 10 : i32, message = "bqd,bkd->bqk"}> : () -> ()
    %cst_49 = arith.constant dense<0.000000e+00> : vector<8x8x8xf32>
    %116 = tpu.matmul %114, %115, %cst_49 {dimension_numbers = #tpu.dot_dimension_numbers<[2], [2], [1], [1], [0, 0, 0, 1, 1, 1], [0], [0]>} : vector<8x8x8xf32>, vector<8x8x8xf32>, vector<8x8x8xf32> -> vector<8x8x8xf32>
    "tpu.trace_stop"() : () -> ()
    %cst_50 = arith.constant 0.353553385 : f32
    %117 = vector.broadcast %cst_50 : f32 to vector<8x8x8xf32>
    %118 = arith.mulf %116, %117 : vector<8x8x8xf32>
    %119 = vector.broadcast %10 : vector<8x1x8xf32> to vector<8x8x8xf32>
    %120 = arith.addf %118, %119 : vector<8x8x8xf32>
    %cst_51 = arith.constant dense<0xFF800000> : vector<8x8xf32>
    %121 = vector.multi_reduction <maximumf>, %120, %cst_51 [2] : vector<8x8x8xf32> to vector<8x8xf32>
    %122 = vector.shape_cast %121 : vector<8x8xf32> to vector<8x8x1xf32>
    %123 = vector.broadcast %122 : vector<8x8x1xf32> to vector<8x8x8xf32>
    %124 = arith.subf %120, %123 : vector<8x8x8xf32>
    %125 = math.exp %124 : vector<8x8x8xf32>
    %cst_52 = arith.constant dense<0.000000e+00> : vector<8x8xf32>
    %126 = vector.multi_reduction <add>, %125, %cst_52 [2] : vector<8x8x8xf32> to vector<8x8xf32>
    %127 = vector.shape_cast %126 : vector<8x8xf32> to vector<8x8x1xf32>
    %128 = tpu.reciprocal %127 : vector<8x8x1xf32> -> vector<8x8x1xf32>
    %129 = vector.broadcast %128 : vector<8x8x1xf32> to vector<8x8x8xf32>
    %130 = arith.mulf %125, %129 : vector<8x8x8xf32>
    %131 = vector.extract_strided_slice %56 {offsets = [0, 0, 24], sizes = [8, 8, 8], strides = [1, 1, 1]} : vector<8x8x32xf32> to vector<8x8x8xf32>
    "tpu.trace_start"() <{level = 10 : i32, message = "bqk,bkd->bqd"}> : () -> ()
    %cst_53 = arith.constant dense<0.000000e+00> : vector<8x8x8xf32>
    %132 = tpu.matmul %130, %131, %cst_53 {dimension_numbers = #tpu.dot_dimension_numbers<[2], [1], [1], [2], [0, 0, 0, 1, 1, 2], [0], [0]>} : vector<8x8x8xf32>, vector<8x8x8xf32>, vector<8x8x8xf32> -> vector<8x8x8xf32>
    "tpu.trace_stop"() : () -> ()
    %133 = tpu.concatenate %75, %94, %113, %132 in 2 : vector<8x8x8xf32>, vector<8x8x8xf32>, vector<8x8x8xf32>, vector<8x8x8xf32> -> vector<8x8x32xf32>
    %134 = vector.shape_cast %133 : vector<8x8x32xf32> to vector<64x32xf32>
    %c0_54 = arith.constant 0 : index
    %c0_55 = arith.constant 0 : index
    %c0_56 = arith.constant 0 : index
    %135 = vector.load %arg10[%c0_54, %c0_55, %c0_56] : memref<2x32x32xf32, #tpu.memory_space<vmem>>, vector<1x32x32xf32>
    %136 = vector.shape_cast %135 : vector<1x32x32xf32> to vector<32x32xf32>
    %cst_57 = arith.constant dense<0.000000e+00> : vector<64x32xf32>
    %137 = tpu.matmul %134, %136, %cst_57 {dimension_numbers = #tpu.dot_dimension_numbers<[1], [0], [0], [1], [0, 0, 1, 1], [], []>} : vector<64x32xf32>, vector<32x32xf32>, vector<64x32xf32> -> vector<64x32xf32>
    %c0_58 = arith.constant 0 : index
    %c0_59 = arith.constant 0 : index
    %c0_60 = arith.constant 0 : index
    %138 = vector.load %arg11[%c0_58, %c0_59, %c0_60] : memref<2x1x32xf32, #tpu.memory_space<vmem>>, vector<1x1x32xf32>
    %139 = vector.shape_cast %138 : vector<1x1x32xf32> to vector<1x32xf32>
    %140 = vector.broadcast %139 : vector<1x32xf32> to vector<64x32xf32>
    %141 = arith.addf %137, %140 : vector<64x32xf32>
    %142 = arith.addf %1, %141 : vector<64x32xf32>
    %c0_61 = arith.constant 0 : index
    %c0_62 = arith.constant 0 : index
    %c0_63 = arith.constant 0 : index
    %143 = vector.load %arg12[%c0_61, %c0_62, %c0_63] : memref<2x1x32xf32, #tpu.memory_space<vmem>>, vector<1x1x32xf32>
    %144 = vector.shape_cast %143 : vector<1x1x32xf32> to vector<1x32xf32>
    %c0_64 = arith.constant 0 : index
    %c0_65 = arith.constant 0 : index
    %c0_66 = arith.constant 0 : index
    %145 = vector.load %arg13[%c0_64, %c0_65, %c0_66] : memref<2x1x32xf32, #tpu.memory_space<vmem>>, vector<1x1x32xf32>
    %146 = vector.shape_cast %145 : vector<1x1x32xf32> to vector<1x32xf32>
    %cst_67 = arith.constant dense<0.000000e+00> : vector<64xf32>
    %147 = vector.multi_reduction <add>, %142, %cst_67 [1] : vector<64x32xf32> to vector<64xf32>
    %148 = vector.shape_cast %147 : vector<64xf32> to vector<64x1xf32>
    %cst_68 = arith.constant 3.200000e+01 : f32
    %149 = vector.broadcast %cst_68 : f32 to vector<64x1xf32>
    %150 = arith.divf %148, %149 : vector<64x1xf32>
    %151 = vector.broadcast %150 : vector<64x1xf32> to vector<64x32xf32>
    %152 = arith.subf %142, %151 : vector<64x32xf32>
    %153 = arith.mulf %152, %152 : vector<64x32xf32>
    %cst_69 = arith.constant dense<0.000000e+00> : vector<64xf32>
    %154 = vector.multi_reduction <add>, %153, %cst_69 [1] : vector<64x32xf32> to vector<64xf32>
    %155 = vector.shape_cast %154 : vector<64xf32> to vector<64x1xf32>
    %cst_70 = arith.constant 3.200000e+01 : f32
    %156 = vector.broadcast %cst_70 : f32 to vector<64x1xf32>
    %157 = arith.divf %155, %156 : vector<64x1xf32>
    %158 = vector.broadcast %150 : vector<64x1xf32> to vector<64x32xf32>
    %159 = arith.subf %142, %158 : vector<64x32xf32>
    %cst_71 = arith.constant 9.99999974E-6 : f32
    %160 = vector.broadcast %cst_71 : f32 to vector<64x1xf32>
    %161 = arith.addf %157, %160 : vector<64x1xf32>
    %162 = math.rsqrt %161 : vector<64x1xf32>
    %163 = vector.broadcast %162 : vector<64x1xf32> to vector<64x32xf32>
    %164 = arith.mulf %159, %163 : vector<64x32xf32>
    %165 = vector.broadcast %144 : vector<1x32xf32> to vector<64x32xf32>
    %166 = arith.mulf %164, %165 : vector<64x32xf32>
    %167 = vector.broadcast %146 : vector<1x32xf32> to vector<64x32xf32>
    %168 = arith.addf %166, %167 : vector<64x32xf32>
    %c0_72 = arith.constant 0 : index
    %c0_73 = arith.constant 0 : index
    %c0_74 = arith.constant 0 : index
    %169 = vector.load %arg14[%c0_72, %c0_73, %c0_74] : memref<2x32x64xf32, #tpu.memory_space<vmem>>, vector<1x32x64xf32>
    %170 = vector.shape_cast %169 : vector<1x32x64xf32> to vector<32x64xf32>
    %cst_75 = arith.constant dense<0.000000e+00> : vector<64x64xf32>
    %171 = tpu.matmul %168, %170, %cst_75 {dimension_numbers = #tpu.dot_dimension_numbers<[1], [0], [0], [1], [0, 0, 1, 1], [], []>} : vector<64x32xf32>, vector<32x64xf32>, vector<64x64xf32> -> vector<64x64xf32>
    %c0_76 = arith.constant 0 : index
    %c0_77 = arith.constant 0 : index
    %c0_78 = arith.constant 0 : index
    %172 = vector.load %arg15[%c0_76, %c0_77, %c0_78] : memref<2x1x64xf32, #tpu.memory_space<vmem>>, vector<1x1x64xf32>
    %173 = vector.shape_cast %172 : vector<1x1x64xf32> to vector<1x64xf32>
    %174 = vector.broadcast %173 : vector<1x64xf32> to vector<64x64xf32>
    %175 = arith.addf %171, %174 : vector<64x64xf32>
    %cst_79 = arith.constant 0.000000e+00 : f32
    %176 = vector.broadcast %cst_79 : f32 to vector<64x64xf32>
    %177 = arith.maximumf %175, %176 : vector<64x64xf32>
    %c0_80 = arith.constant 0 : index
    %c0_81 = arith.constant 0 : index
    %c0_82 = arith.constant 0 : index
    %178 = vector.load %arg16[%c0_80, %c0_81, %c0_82] : memref<2x64x32xf32, #tpu.memory_space<vmem>>, vector<1x64x32xf32>
    %179 = vector.shape_cast %178 : vector<1x64x32xf32> to vector<64x32xf32>
    %cst_83 = arith.constant dense<0.000000e+00> : vector<64x32xf32>
    %180 = tpu.matmul %177, %179, %cst_83 {dimension_numbers = #tpu.dot_dimension_numbers<[1], [0], [0], [1], [0, 0, 1, 1], [], []>} : vector<64x64xf32>, vector<64x32xf32>, vector<64x32xf32> -> vector<64x32xf32>
    %c0_84 = arith.constant 0 : index
    %c0_85 = arith.constant 0 : index
    %c0_86 = arith.constant 0 : index
    %181 = vector.load %arg17[%c0_84, %c0_85, %c0_86] : memref<2x1x32xf32, #tpu.memory_space<vmem>>, vector<1x1x32xf32>
    %182 = vector.shape_cast %181 : vector<1x1x32xf32> to vector<1x32xf32>
    %183 = vector.broadcast %182 : vector<1x32xf32> to vector<64x32xf32>
    %184 = arith.addf %180, %183 : vector<64x32xf32>
    %185 = arith.addf %142, %184 : vector<64x32xf32>
    %c1 = arith.constant 1 : index
    %c0_87 = arith.constant 0 : index
    %c0_88 = arith.constant 0 : index
    %186 = vector.load %arg4[%c1, %c0_87, %c0_88] : memref<2x1x32xf32, #tpu.memory_space<vmem>>, vector<1x1x32xf32>
    %187 = vector.shape_cast %186 : vector<1x1x32xf32> to vector<1x32xf32>
    %c1_89 = arith.constant 1 : index
    %c0_90 = arith.constant 0 : index
    %c0_91 = arith.constant 0 : index
    %188 = vector.load %arg5[%c1_89, %c0_90, %c0_91] : memref<2x1x32xf32, #tpu.memory_space<vmem>>, vector<1x1x32xf32>
    %189 = vector.shape_cast %188 : vector<1x1x32xf32> to vector<1x32xf32>
    %cst_92 = arith.constant dense<0.000000e+00> : vector<64xf32>
    %190 = vector.multi_reduction <add>, %185, %cst_92 [1] : vector<64x32xf32> to vector<64xf32>
    %191 = vector.shape_cast %190 : vector<64xf32> to vector<64x1xf32>
    %cst_93 = arith.constant 3.200000e+01 : f32
    %192 = vector.broadcast %cst_93 : f32 to vector<64x1xf32>
    %193 = arith.divf %191, %192 : vector<64x1xf32>
    %194 = vector.broadcast %193 : vector<64x1xf32> to vector<64x32xf32>
    %195 = arith.subf %185, %194 : vector<64x32xf32>
    %196 = arith.mulf %195, %195 : vector<64x32xf32>
    %cst_94 = arith.constant dense<0.000000e+00> : vector<64xf32>
    %197 = vector.multi_reduction <add>, %196, %cst_94 [1] : vector<64x32xf32> to vector<64xf32>
    %198 = vector.shape_cast %197 : vector<64xf32> to vector<64x1xf32>
    %cst_95 = arith.constant 3.200000e+01 : f32
    %199 = vector.broadcast %cst_95 : f32 to vector<64x1xf32>
    %200 = arith.divf %198, %199 : vector<64x1xf32>
    %201 = vector.broadcast %193 : vector<64x1xf32> to vector<64x32xf32>
    %202 = arith.subf %185, %201 : vector<64x32xf32>
    %cst_96 = arith.constant 9.99999974E-6 : f32
    %203 = vector.broadcast %cst_96 : f32 to vector<64x1xf32>
    %204 = arith.addf %200, %203 : vector<64x1xf32>
    %205 = math.rsqrt %204 : vector<64x1xf32>
    %206 = vector.broadcast %205 : vector<64x1xf32> to vector<64x32xf32>
    %207 = arith.mulf %202, %206 : vector<64x32xf32>
    %208 = vector.broadcast %187 : vector<1x32xf32> to vector<64x32xf32>
    %209 = arith.mulf %207, %208 : vector<64x32xf32>
    %210 = vector.broadcast %189 : vector<1x32xf32> to vector<64x32xf32>
    %211 = arith.addf %209, %210 : vector<64x32xf32>
    %212 = arith.addf %211, %3 : vector<64x32xf32>
    %c1_97 = arith.constant 1 : index
    %c0_98 = arith.constant 0 : index
    %c0_99 = arith.constant 0 : index
    %213 = vector.load %arg6[%c1_97, %c0_98, %c0_99] : memref<2x32x64xf32, #tpu.memory_space<vmem>>, vector<1x32x64xf32>
    %214 = vector.shape_cast %213 : vector<1x32x64xf32> to vector<32x64xf32>
    %cst_100 = arith.constant dense<0.000000e+00> : vector<64x64xf32>
    %215 = tpu.matmul %212, %214, %cst_100 {dimension_numbers = #tpu.dot_dimension_numbers<[1], [0], [0], [1], [0, 0, 1, 1], [], []>} : vector<64x32xf32>, vector<32x64xf32>, vector<64x64xf32> -> vector<64x64xf32>
    %c1_101 = arith.constant 1 : index
    %c0_102 = arith.constant 0 : index
    %c0_103 = arith.constant 0 : index
    %216 = vector.load %arg7[%c1_101, %c0_102, %c0_103] : memref<2x1x64xf32, #tpu.memory_space<vmem>>, vector<1x1x64xf32>
    %217 = vector.shape_cast %216 : vector<1x1x64xf32> to vector<1x64xf32>
    %218 = vector.broadcast %217 : vector<1x64xf32> to vector<64x64xf32>
    %219 = arith.addf %215, %218 : vector<64x64xf32>
    %c1_104 = arith.constant 1 : index
    %c0_105 = arith.constant 0 : index
    %c0_106 = arith.constant 0 : index
    %220 = vector.load %arg8[%c1_104, %c0_105, %c0_106] : memref<2x32x32xf32, #tpu.memory_space<vmem>>, vector<1x32x32xf32>
    %221 = vector.shape_cast %220 : vector<1x32x32xf32> to vector<32x32xf32>
    %cst_107 = arith.constant dense<0.000000e+00> : vector<64x32xf32>
    %222 = tpu.matmul %211, %221, %cst_107 {dimension_numbers = #tpu.dot_dimension_numbers<[1], [0], [0], [1], [0, 0, 1, 1], [], []>} : vector<64x32xf32>, vector<32x32xf32>, vector<64x32xf32> -> vector<64x32xf32>
    %c1_108 = arith.constant 1 : index
    %c0_109 = arith.constant 0 : index
    %c0_110 = arith.constant 0 : index
    %223 = vector.load %arg9[%c1_108, %c0_109, %c0_110] : memref<2x1x32xf32, #tpu.memory_space<vmem>>, vector<1x1x32xf32>
    %224 = vector.shape_cast %223 : vector<1x1x32xf32> to vector<1x32xf32>
    %225 = vector.broadcast %224 : vector<1x32xf32> to vector<64x32xf32>
    %226 = arith.addf %222, %225 : vector<64x32xf32>
    %227 = vector.extract_strided_slice %219 {offsets = [0, 0], sizes = [64, 32], strides = [1, 1]} : vector<64x64xf32> to vector<64x32xf32>
    %228 = vector.shape_cast %227 : vector<64x32xf32> to vector<8x8x32xf32>
    %229 = vector.extract_strided_slice %219 {offsets = [0, 32], sizes = [64, 32], strides = [1, 1]} : vector<64x64xf32> to vector<64x32xf32>
    %230 = vector.shape_cast %229 : vector<64x32xf32> to vector<8x8x32xf32>
    %231 = vector.shape_cast %226 : vector<64x32xf32> to vector<8x8x32xf32>
    %232 = vector.extract_strided_slice %228 {offsets = [0, 0, 0], sizes = [8, 8, 8], strides = [1, 1, 1]} : vector<8x8x32xf32> to vector<8x8x8xf32>
    %233 = vector.extract_strided_slice %230 {offsets = [0, 0, 0], sizes = [8, 8, 8], strides = [1, 1, 1]} : vector<8x8x32xf32> to vector<8x8x8xf32>
    "tpu.trace_start"() <{level = 10 : i32, message = "bqd,bkd->bqk"}> : () -> ()
    %cst_111 = arith.constant dense<0.000000e+00> : vector<8x8x8xf32>
    %234 = tpu.matmul %232, %233, %cst_111 {dimension_numbers = #tpu.dot_dimension_numbers<[2], [2], [1], [1], [0, 0, 0, 1, 1, 1], [0], [0]>} : vector<8x8x8xf32>, vector<8x8x8xf32>, vector<8x8x8xf32> -> vector<8x8x8xf32>
    "tpu.trace_stop"() : () -> ()
    %cst_112 = arith.constant 0.353553385 : f32
    %235 = vector.broadcast %cst_112 : f32 to vector<8x8x8xf32>
    %236 = arith.mulf %234, %235 : vector<8x8x8xf32>
    %237 = vector.broadcast %10 : vector<8x1x8xf32> to vector<8x8x8xf32>
    %238 = arith.addf %236, %237 : vector<8x8x8xf32>
    %cst_113 = arith.constant dense<0xFF800000> : vector<8x8xf32>
    %239 = vector.multi_reduction <maximumf>, %238, %cst_113 [2] : vector<8x8x8xf32> to vector<8x8xf32>
    %240 = vector.shape_cast %239 : vector<8x8xf32> to vector<8x8x1xf32>
    %241 = vector.broadcast %240 : vector<8x8x1xf32> to vector<8x8x8xf32>
    %242 = arith.subf %238, %241 : vector<8x8x8xf32>
    %243 = math.exp %242 : vector<8x8x8xf32>
    %cst_114 = arith.constant dense<0.000000e+00> : vector<8x8xf32>
    %244 = vector.multi_reduction <add>, %243, %cst_114 [2] : vector<8x8x8xf32> to vector<8x8xf32>
    %245 = vector.shape_cast %244 : vector<8x8xf32> to vector<8x8x1xf32>
    %246 = tpu.reciprocal %245 : vector<8x8x1xf32> -> vector<8x8x1xf32>
    %247 = vector.broadcast %246 : vector<8x8x1xf32> to vector<8x8x8xf32>
    %248 = arith.mulf %243, %247 : vector<8x8x8xf32>
    %249 = vector.extract_strided_slice %231 {offsets = [0, 0, 0], sizes = [8, 8, 8], strides = [1, 1, 1]} : vector<8x8x32xf32> to vector<8x8x8xf32>
    "tpu.trace_start"() <{level = 10 : i32, message = "bqk,bkd->bqd"}> : () -> ()
    %cst_115 = arith.constant dense<0.000000e+00> : vector<8x8x8xf32>
    %250 = tpu.matmul %248, %249, %cst_115 {dimension_numbers = #tpu.dot_dimension_numbers<[2], [1], [1], [2], [0, 0, 0, 1, 1, 2], [0], [0]>} : vector<8x8x8xf32>, vector<8x8x8xf32>, vector<8x8x8xf32> -> vector<8x8x8xf32>
    "tpu.trace_stop"() : () -> ()
    %251 = vector.extract_strided_slice %228 {offsets = [0, 0, 8], sizes = [8, 8, 8], strides = [1, 1, 1]} : vector<8x8x32xf32> to vector<8x8x8xf32>
    %252 = vector.extract_strided_slice %230 {offsets = [0, 0, 8], sizes = [8, 8, 8], strides = [1, 1, 1]} : vector<8x8x32xf32> to vector<8x8x8xf32>
    "tpu.trace_start"() <{level = 10 : i32, message = "bqd,bkd->bqk"}> : () -> ()
    %cst_116 = arith.constant dense<0.000000e+00> : vector<8x8x8xf32>
    %253 = tpu.matmul %251, %252, %cst_116 {dimension_numbers = #tpu.dot_dimension_numbers<[2], [2], [1], [1], [0, 0, 0, 1, 1, 1], [0], [0]>} : vector<8x8x8xf32>, vector<8x8x8xf32>, vector<8x8x8xf32> -> vector<8x8x8xf32>
    "tpu.trace_stop"() : () -> ()
    %cst_117 = arith.constant 0.353553385 : f32
    %254 = vector.broadcast %cst_117 : f32 to vector<8x8x8xf32>
    %255 = arith.mulf %253, %254 : vector<8x8x8xf32>
    %256 = vector.broadcast %10 : vector<8x1x8xf32> to vector<8x8x8xf32>
    %257 = arith.addf %255, %256 : vector<8x8x8xf32>
    %cst_118 = arith.constant dense<0xFF800000> : vector<8x8xf32>
    %258 = vector.multi_reduction <maximumf>, %257, %cst_118 [2] : vector<8x8x8xf32> to vector<8x8xf32>
    %259 = vector.shape_cast %258 : vector<8x8xf32> to vector<8x8x1xf32>
    %260 = vector.broadcast %259 : vector<8x8x1xf32> to vector<8x8x8xf32>
    %261 = arith.subf %257, %260 : vector<8x8x8xf32>
    %262 = math.exp %261 : vector<8x8x8xf32>
    %cst_119 = arith.constant dense<0.000000e+00> : vector<8x8xf32>
    %263 = vector.multi_reduction <add>, %262, %cst_119 [2] : vector<8x8x8xf32> to vector<8x8xf32>
    %264 = vector.shape_cast %263 : vector<8x8xf32> to vector<8x8x1xf32>
    %265 = tpu.reciprocal %264 : vector<8x8x1xf32> -> vector<8x8x1xf32>
    %266 = vector.broadcast %265 : vector<8x8x1xf32> to vector<8x8x8xf32>
    %267 = arith.mulf %262, %266 : vector<8x8x8xf32>
    %268 = vector.extract_strided_slice %231 {offsets = [0, 0, 8], sizes = [8, 8, 8], strides = [1, 1, 1]} : vector<8x8x32xf32> to vector<8x8x8xf32>
    "tpu.trace_start"() <{level = 10 : i32, message = "bqk,bkd->bqd"}> : () -> ()
    %cst_120 = arith.constant dense<0.000000e+00> : vector<8x8x8xf32>
    %269 = tpu.matmul %267, %268, %cst_120 {dimension_numbers = #tpu.dot_dimension_numbers<[2], [1], [1], [2], [0, 0, 0, 1, 1, 2], [0], [0]>} : vector<8x8x8xf32>, vector<8x8x8xf32>, vector<8x8x8xf32> -> vector<8x8x8xf32>
    "tpu.trace_stop"() : () -> ()
    %270 = vector.extract_strided_slice %228 {offsets = [0, 0, 16], sizes = [8, 8, 8], strides = [1, 1, 1]} : vector<8x8x32xf32> to vector<8x8x8xf32>
    %271 = vector.extract_strided_slice %230 {offsets = [0, 0, 16], sizes = [8, 8, 8], strides = [1, 1, 1]} : vector<8x8x32xf32> to vector<8x8x8xf32>
    "tpu.trace_start"() <{level = 10 : i32, message = "bqd,bkd->bqk"}> : () -> ()
    %cst_121 = arith.constant dense<0.000000e+00> : vector<8x8x8xf32>
    %272 = tpu.matmul %270, %271, %cst_121 {dimension_numbers = #tpu.dot_dimension_numbers<[2], [2], [1], [1], [0, 0, 0, 1, 1, 1], [0], [0]>} : vector<8x8x8xf32>, vector<8x8x8xf32>, vector<8x8x8xf32> -> vector<8x8x8xf32>
    "tpu.trace_stop"() : () -> ()
    %cst_122 = arith.constant 0.353553385 : f32
    %273 = vector.broadcast %cst_122 : f32 to vector<8x8x8xf32>
    %274 = arith.mulf %272, %273 : vector<8x8x8xf32>
    %275 = vector.broadcast %10 : vector<8x1x8xf32> to vector<8x8x8xf32>
    %276 = arith.addf %274, %275 : vector<8x8x8xf32>
    %cst_123 = arith.constant dense<0xFF800000> : vector<8x8xf32>
    %277 = vector.multi_reduction <maximumf>, %276, %cst_123 [2] : vector<8x8x8xf32> to vector<8x8xf32>
    %278 = vector.shape_cast %277 : vector<8x8xf32> to vector<8x8x1xf32>
    %279 = vector.broadcast %278 : vector<8x8x1xf32> to vector<8x8x8xf32>
    %280 = arith.subf %276, %279 : vector<8x8x8xf32>
    %281 = math.exp %280 : vector<8x8x8xf32>
    %cst_124 = arith.constant dense<0.000000e+00> : vector<8x8xf32>
    %282 = vector.multi_reduction <add>, %281, %cst_124 [2] : vector<8x8x8xf32> to vector<8x8xf32>
    %283 = vector.shape_cast %282 : vector<8x8xf32> to vector<8x8x1xf32>
    %284 = tpu.reciprocal %283 : vector<8x8x1xf32> -> vector<8x8x1xf32>
    %285 = vector.broadcast %284 : vector<8x8x1xf32> to vector<8x8x8xf32>
    %286 = arith.mulf %281, %285 : vector<8x8x8xf32>
    %287 = vector.extract_strided_slice %231 {offsets = [0, 0, 16], sizes = [8, 8, 8], strides = [1, 1, 1]} : vector<8x8x32xf32> to vector<8x8x8xf32>
    "tpu.trace_start"() <{level = 10 : i32, message = "bqk,bkd->bqd"}> : () -> ()
    %cst_125 = arith.constant dense<0.000000e+00> : vector<8x8x8xf32>
    %288 = tpu.matmul %286, %287, %cst_125 {dimension_numbers = #tpu.dot_dimension_numbers<[2], [1], [1], [2], [0, 0, 0, 1, 1, 2], [0], [0]>} : vector<8x8x8xf32>, vector<8x8x8xf32>, vector<8x8x8xf32> -> vector<8x8x8xf32>
    "tpu.trace_stop"() : () -> ()
    %289 = vector.extract_strided_slice %228 {offsets = [0, 0, 24], sizes = [8, 8, 8], strides = [1, 1, 1]} : vector<8x8x32xf32> to vector<8x8x8xf32>
    %290 = vector.extract_strided_slice %230 {offsets = [0, 0, 24], sizes = [8, 8, 8], strides = [1, 1, 1]} : vector<8x8x32xf32> to vector<8x8x8xf32>
    "tpu.trace_start"() <{level = 10 : i32, message = "bqd,bkd->bqk"}> : () -> ()
    %cst_126 = arith.constant dense<0.000000e+00> : vector<8x8x8xf32>
    %291 = tpu.matmul %289, %290, %cst_126 {dimension_numbers = #tpu.dot_dimension_numbers<[2], [2], [1], [1], [0, 0, 0, 1, 1, 1], [0], [0]>} : vector<8x8x8xf32>, vector<8x8x8xf32>, vector<8x8x8xf32> -> vector<8x8x8xf32>
    "tpu.trace_stop"() : () -> ()
    %cst_127 = arith.constant 0.353553385 : f32
    %292 = vector.broadcast %cst_127 : f32 to vector<8x8x8xf32>
    %293 = arith.mulf %291, %292 : vector<8x8x8xf32>
    %294 = vector.broadcast %10 : vector<8x1x8xf32> to vector<8x8x8xf32>
    %295 = arith.addf %293, %294 : vector<8x8x8xf32>
    %cst_128 = arith.constant dense<0xFF800000> : vector<8x8xf32>
    %296 = vector.multi_reduction <maximumf>, %295, %cst_128 [2] : vector<8x8x8xf32> to vector<8x8xf32>
    %297 = vector.shape_cast %296 : vector<8x8xf32> to vector<8x8x1xf32>
    %298 = vector.broadcast %297 : vector<8x8x1xf32> to vector<8x8x8xf32>
    %299 = arith.subf %295, %298 : vector<8x8x8xf32>
    %300 = math.exp %299 : vector<8x8x8xf32>
    %cst_129 = arith.constant dense<0.000000e+00> : vector<8x8xf32>
    %301 = vector.multi_reduction <add>, %300, %cst_129 [2] : vector<8x8x8xf32> to vector<8x8xf32>
    %302 = vector.shape_cast %301 : vector<8x8xf32> to vector<8x8x1xf32>
    %303 = tpu.reciprocal %302 : vector<8x8x1xf32> -> vector<8x8x1xf32>
    %304 = vector.broadcast %303 : vector<8x8x1xf32> to vector<8x8x8xf32>
    %305 = arith.mulf %300, %304 : vector<8x8x8xf32>
    %306 = vector.extract_strided_slice %231 {offsets = [0, 0, 24], sizes = [8, 8, 8], strides = [1, 1, 1]} : vector<8x8x32xf32> to vector<8x8x8xf32>
    "tpu.trace_start"() <{level = 10 : i32, message = "bqk,bkd->bqd"}> : () -> ()
    %cst_130 = arith.constant dense<0.000000e+00> : vector<8x8x8xf32>
    %307 = tpu.matmul %305, %306, %cst_130 {dimension_numbers = #tpu.dot_dimension_numbers<[2], [1], [1], [2], [0, 0, 0, 1, 1, 2], [0], [0]>} : vector<8x8x8xf32>, vector<8x8x8xf32>, vector<8x8x8xf32> -> vector<8x8x8xf32>
    "tpu.trace_stop"() : () -> ()
    %308 = tpu.concatenate %250, %269, %288, %307 in 2 : vector<8x8x8xf32>, vector<8x8x8xf32>, vector<8x8x8xf32>, vector<8x8x8xf32> -> vector<8x8x32xf32>
    %309 = vector.shape_cast %308 : vector<8x8x32xf32> to vector<64x32xf32>
    %c1_131 = arith.constant 1 : index
    %c0_132 = arith.constant 0 : index
    %c0_133 = arith.constant 0 : index
    %310 = vector.load %arg10[%c1_131, %c0_132, %c0_133] : memref<2x32x32xf32, #tpu.memory_space<vmem>>, vector<1x32x32xf32>
    %311 = vector.shape_cast %310 : vector<1x32x32xf32> to vector<32x32xf32>
    %cst_134 = arith.constant dense<0.000000e+00> : vector<64x32xf32>
    %312 = tpu.matmul %309, %311, %cst_134 {dimension_numbers = #tpu.dot_dimension_numbers<[1], [0], [0], [1], [0, 0, 1, 1], [], []>} : vector<64x32xf32>, vector<32x32xf32>, vector<64x32xf32> -> vector<64x32xf32>
    %c1_135 = arith.constant 1 : index
    %c0_136 = arith.constant 0 : index
    %c0_137 = arith.constant 0 : index
    %313 = vector.load %arg11[%c1_135, %c0_136, %c0_137] : memref<2x1x32xf32, #tpu.memory_space<vmem>>, vector<1x1x32xf32>
    %314 = vector.shape_cast %313 : vector<1x1x32xf32> to vector<1x32xf32>
    %315 = vector.broadcast %314 : vector<1x32xf32> to vector<64x32xf32>
    %316 = arith.addf %312, %315 : vector<64x32xf32>
    %317 = arith.addf %185, %316 : vector<64x32xf32>
    %c1_138 = arith.constant 1 : index
    %c0_139 = arith.constant 0 : index
    %c0_140 = arith.constant 0 : index
    %318 = vector.load %arg12[%c1_138, %c0_139, %c0_140] : memref<2x1x32xf32, #tpu.memory_space<vmem>>, vector<1x1x32xf32>
    %319 = vector.shape_cast %318 : vector<1x1x32xf32> to vector<1x32xf32>
    %c1_141 = arith.constant 1 : index
    %c0_142 = arith.constant 0 : index
    %c0_143 = arith.constant 0 : index
    %320 = vector.load %arg13[%c1_141, %c0_142, %c0_143] : memref<2x1x32xf32, #tpu.memory_space<vmem>>, vector<1x1x32xf32>
    %321 = vector.shape_cast %320 : vector<1x1x32xf32> to vector<1x32xf32>
    %cst_144 = arith.constant dense<0.000000e+00> : vector<64xf32>
    %322 = vector.multi_reduction <add>, %317, %cst_144 [1] : vector<64x32xf32> to vector<64xf32>
    %323 = vector.shape_cast %322 : vector<64xf32> to vector<64x1xf32>
    %cst_145 = arith.constant 3.200000e+01 : f32
    %324 = vector.broadcast %cst_145 : f32 to vector<64x1xf32>
    %325 = arith.divf %323, %324 : vector<64x1xf32>
    %326 = vector.broadcast %325 : vector<64x1xf32> to vector<64x32xf32>
    %327 = arith.subf %317, %326 : vector<64x32xf32>
    %328 = arith.mulf %327, %327 : vector<64x32xf32>
    %cst_146 = arith.constant dense<0.000000e+00> : vector<64xf32>
    %329 = vector.multi_reduction <add>, %328, %cst_146 [1] : vector<64x32xf32> to vector<64xf32>
    %330 = vector.shape_cast %329 : vector<64xf32> to vector<64x1xf32>
    %cst_147 = arith.constant 3.200000e+01 : f32
    %331 = vector.broadcast %cst_147 : f32 to vector<64x1xf32>
    %332 = arith.divf %330, %331 : vector<64x1xf32>
    %333 = vector.broadcast %325 : vector<64x1xf32> to vector<64x32xf32>
    %334 = arith.subf %317, %333 : vector<64x32xf32>
    %cst_148 = arith.constant 9.99999974E-6 : f32
    %335 = vector.broadcast %cst_148 : f32 to vector<64x1xf32>
    %336 = arith.addf %332, %335 : vector<64x1xf32>
    %337 = math.rsqrt %336 : vector<64x1xf32>
    %338 = vector.broadcast %337 : vector<64x1xf32> to vector<64x32xf32>
    %339 = arith.mulf %334, %338 : vector<64x32xf32>
    %340 = vector.broadcast %319 : vector<1x32xf32> to vector<64x32xf32>
    %341 = arith.mulf %339, %340 : vector<64x32xf32>
    %342 = vector.broadcast %321 : vector<1x32xf32> to vector<64x32xf32>
    %343 = arith.addf %341, %342 : vector<64x32xf32>
    %c1_149 = arith.constant 1 : index
    %c0_150 = arith.constant 0 : index
    %c0_151 = arith.constant 0 : index
    %344 = vector.load %arg14[%c1_149, %c0_150, %c0_151] : memref<2x32x64xf32, #tpu.memory_space<vmem>>, vector<1x32x64xf32>
    %345 = vector.shape_cast %344 : vector<1x32x64xf32> to vector<32x64xf32>
    %cst_152 = arith.constant dense<0.000000e+00> : vector<64x64xf32>
    %346 = tpu.matmul %343, %345, %cst_152 {dimension_numbers = #tpu.dot_dimension_numbers<[1], [0], [0], [1], [0, 0, 1, 1], [], []>} : vector<64x32xf32>, vector<32x64xf32>, vector<64x64xf32> -> vector<64x64xf32>
    %c1_153 = arith.constant 1 : index
    %c0_154 = arith.constant 0 : index
    %c0_155 = arith.constant 0 : index
    %347 = vector.load %arg15[%c1_153, %c0_154, %c0_155] : memref<2x1x64xf32, #tpu.memory_space<vmem>>, vector<1x1x64xf32>
    %348 = vector.shape_cast %347 : vector<1x1x64xf32> to vector<1x64xf32>
    %349 = vector.broadcast %348 : vector<1x64xf32> to vector<64x64xf32>
    %350 = arith.addf %346, %349 : vector<64x64xf32>
    %cst_156 = arith.constant 0.000000e+00 : f32
    %351 = vector.broadcast %cst_156 : f32 to vector<64x64xf32>
    %352 = arith.maximumf %350, %351 : vector<64x64xf32>
    %c1_157 = arith.constant 1 : index
    %c0_158 = arith.constant 0 : index
    %c0_159 = arith.constant 0 : index
    %353 = vector.load %arg16[%c1_157, %c0_158, %c0_159] : memref<2x64x32xf32, #tpu.memory_space<vmem>>, vector<1x64x32xf32>
    %354 = vector.shape_cast %353 : vector<1x64x32xf32> to vector<64x32xf32>
    %cst_160 = arith.constant dense<0.000000e+00> : vector<64x32xf32>
    %355 = tpu.matmul %352, %354, %cst_160 {dimension_numbers = #tpu.dot_dimension_numbers<[1], [0], [0], [1], [0, 0, 1, 1], [], []>} : vector<64x64xf32>, vector<64x32xf32>, vector<64x32xf32> -> vector<64x32xf32>
    %c1_161 = arith.constant 1 : index
    %c0_162 = arith.constant 0 : index
    %c0_163 = arith.constant 0 : index
    %356 = vector.load %arg17[%c1_161, %c0_162, %c0_163] : memref<2x1x32xf32, #tpu.memory_space<vmem>>, vector<1x1x32xf32>
    %357 = vector.shape_cast %356 : vector<1x1x32xf32> to vector<1x32xf32>
    %358 = vector.broadcast %357 : vector<1x32xf32> to vector<64x32xf32>
    %359 = arith.addf %355, %358 : vector<64x32xf32>
    %360 = arith.addf %317, %359 : vector<64x32xf32>
    %361 = vector.shape_cast %360 : vector<64x32xf32> to vector<8x8x32xf32>
    %c0_164 = arith.constant 0 : index
    %c0_165 = arith.constant 0 : index
    %c0_166 = arith.constant 0 : index
    %362 = vector.load %arg18[%c0_164, %c0_165, %c0_166] : memref<8x8x32xf32, #tpu.memory_space<vmem>>, vector<8x8x32xf32>
    tpu.vector_store %arg18[%c0_164, %c0_165, %c0_166], %361 {strides = array<i32>} : memref<8x8x32xf32, #tpu.memory_space<vmem>>, vector<8x8x32xf32>,
    return
  }
  func.func @transform_0(%arg0: i32) -> (i32, i32, i32) {
    %c0_i32 = arith.constant 0 : i32
    %c0_i32_0 = arith.constant 0 : i32
    %c0_i32_1 = arith.constant 0 : i32
    return %arg0, %c0_i32, %c0_i32_0 : i32, i32, i32
  }
  func.func @transform_1(%arg0: i32) -> (i32, i32, i32) {
    %c0_i32 = arith.constant 0 : i32
    %c0_i32_0 = arith.constant 0 : i32
    %c0_i32_1 = arith.constant 0 : i32
    return %arg0, %c0_i32, %c0_i32_0 : i32, i32, i32
  }
  func.func @transform_2(%arg0: i32) -> (i32, i32) {
    %c0_i32 = arith.constant 0 : i32
    %c0_i32_0 = arith.constant 0 : i32
    return %arg0, %c0_i32 : i32, i32
  }
  func.func @transform_3(%arg0: i32) -> (i32, i32, i32) {
    %c0_i32 = arith.constant 0 : i32
    %c0_i32_0 = arith.constant 0 : i32
    %c0_i32_1 = arith.constant 0 : i32
    %c0_i32_2 = arith.constant 0 : i32
    return %c0_i32, %c0_i32_0, %c0_i32_1 : i32, i32, i32
  }
  func.func @transform_4(%arg0: i32) -> (i32, i32, i32) {
    %c0_i32 = arith.constant 0 : i32
    %c0_i32_0 = arith.constant 0 : i32
    %c0_i32_1 = arith.constant 0 : i32
    %c0_i32_2 = arith.constant 0 : i32
    return %c0_i32, %c0_i32_0, %c0_i32_1 : i32, i32, i32
  }
  func.func @transform_5(%arg0: i32) -> (i32, i32, i32) {
    %c0_i32 = arith.constant 0 : i32
    %c0_i32_0 = arith.constant 0 : i32
    %c0_i32_1 = arith.constant 0 : i32
    %c0_i32_2 = arith.constant 0 : i32
    return %c0_i32, %c0_i32_0, %c0_i32_1 : i32, i32, i32
  }
  func.func @transform_6(%arg0: i32) -> (i32, i32, i32) {
    %c0_i32 = arith.constant 0 : i32
    %c0_i32_0 = arith.constant 0 : i32
    %c0_i32_1 = arith.constant 0 : i32
    %c0_i32_2 = arith.constant 0 : i32
    return %c0_i32, %c0_i32_0, %c0_i32_1 : i32, i32, i32
  }
  func.func @transform_7(%arg0: i32) -> (i32, i32, i32) {
    %c0_i32 = arith.constant 0 : i32
    %c0_i32_0 = arith.constant 0 : i32
    %c0_i32_1 = arith.constant 0 : i32
    %c0_i32_2 = arith.constant 0 : i32
    return %c0_i32, %c0_i32_0, %c0_i32_1 : i32, i32, i32
  }
  func.func @transform_8(%arg0: i32) -> (i32, i32, i32) {
    %c0_i32 = arith.constant 0 : i32
    %c0_i32_0 = arith.constant 0 : i32
    %c0_i32_1 = arith.constant 0 : i32
    %c0_i32_2 = arith.constant 0 : i32
    return %c0_i32, %c0_i32_0, %c0_i32_1 : i32, i32, i32
  }
  func.func @transform_9(%arg0: i32) -> (i32, i32, i32) {
    %c0_i32 = arith.constant 0 : i32
    %c0_i32_0 = arith.constant 0 : i32
    %c0_i32_1 = arith.constant 0 : i32
    %c0_i32_2 = arith.constant 0 : i32
    return %c0_i32, %c0_i32_0, %c0_i32_1 : i32, i32, i32
  }
  func.func @transform_10(%arg0: i32) -> (i32, i32, i32) {
    %c0_i32 = arith.constant 0 : i32
    %c0_i32_0 = arith.constant 0 : i32
    %c0_i32_1 = arith.constant 0 : i32
    %c0_i32_2 = arith.constant 0 : i32
    return %c0_i32, %c0_i32_0, %c0_i32_1 : i32, i32, i32
  }
  func.func @transform_11(%arg0: i32) -> (i32, i32, i32) {
    %c0_i32 = arith.constant 0 : i32
    %c0_i32_0 = arith.constant 0 : i32
    %c0_i32_1 = arith.constant 0 : i32
    %c0_i32_2 = arith.constant 0 : i32
    return %c0_i32, %c0_i32_0, %c0_i32_1 : i32, i32, i32
  }
  func.func @transform_12(%arg0: i32) -> (i32, i32, i32) {
    %c0_i32 = arith.constant 0 : i32
    %c0_i32_0 = arith.constant 0 : i32
    %c0_i32_1 = arith.constant 0 : i32
    %c0_i32_2 = arith.constant 0 : i32
    return %c0_i32, %c0_i32_0, %c0_i32_1 : i32, i32, i32
  }
  func.func @transform_13(%arg0: i32) -> (i32, i32, i32) {
    %c0_i32 = arith.constant 0 : i32
    %c0_i32_0 = arith.constant 0 : i32
    %c0_i32_1 = arith.constant 0 : i32
    %c0_i32_2 = arith.constant 0 : i32
    return %c0_i32, %c0_i32_0, %c0_i32_1 : i32, i32, i32
  }
  func.func @transform_14(%arg0: i32) -> (i32, i32, i32) {
    %c0_i32 = arith.constant 0 : i32
    %c0_i32_0 = arith.constant 0 : i32
    %c0_i32_1 = arith.constant 0 : i32
    %c0_i32_2 = arith.constant 0 : i32
    return %c0_i32, %c0_i32_0, %c0_i32_1 : i32, i32, i32
  }
  func.func @transform_15(%arg0: i32) -> (i32, i32, i32) {
    %c0_i32 = arith.constant 0 : i32
    %c0_i32_0 = arith.constant 0 : i32
    %c0_i32_1 = arith.constant 0 : i32
    %c0_i32_2 = arith.constant 0 : i32
    return %c0_i32, %c0_i32_0, %c0_i32_1 : i32, i32, i32
  }
  func.func @transform_16(%arg0: i32) -> (i32, i32, i32) {
    %c0_i32 = arith.constant 0 : i32
    %c0_i32_0 = arith.constant 0 : i32
    %c0_i32_1 = arith.constant 0 : i32
    %c0_i32_2 = arith.constant 0 : i32
    return %c0_i32, %c0_i32_0, %c0_i32_1 : i32, i32, i32
  }
  func.func @transform_17(%arg0: i32) -> (i32, i32, i32) {
    %c0_i32 = arith.constant 0 : i32
    %c0_i32_0 = arith.constant 0 : i32
    %c0_i32_1 = arith.constant 0 : i32
    return %arg0, %c0_i32, %c0_i32_0 : i32, i32, i32
  }
}

</mosaic_0001>

<bundles_post_ra>
// kernel: tpu_custom_call.1
= control target key start
LH: loop header
LB: loop body
LE: loop exit
PB: predicated region body
PF: predicated region fallthrough
CT: control target
= control target key end

     0   :  { %s17881_s0 = inlined_call_operand.vmem [shape: f32[8,8,32], index: 0, kind: input, shape index: {}]   ;;  %s17882_s1 = inlined_call_operand.vmem [shape: f32[8,8,32], index: 1, kind: input, shape index: {}]   ;;  %s17883_s2 = inlined_call_operand.hbm [shape: f32[8,8], index: 2, kind: input, shape index: {}]   ;;  %s17884_s3 = inlined_call_operand.vmem [shape: f32[2,1,32], index: 3, kind: input, shape index: {}]   ;;  %s17885_s4 = inlined_call_operand.vmem [shape: f32[2,1,32], index: 4, kind: input, shape index: {}]   ;;  %s17886_s5 = inlined_call_operand.vmem [shape: f32[2,32,64], index: 5, kind: input, shape index: {}]   ;;  %s17887_s6 = inlined_call_operand.vmem [shape: f32[2,1,64], index: 6, kind: input, shape index: {}]   ;;  %s17888_s7 = inlined_call_operand.hbm [shape: f32[2,32,32], index: 7, kind: input, shape index: {}]   ;;  %s17889_s8 = inlined_call_operand.vmem [shape: f32[2,1,32], index: 8, kind: input, shape index: {}]   ;;  %s17890_s9 = inlined_call_operand.hbm [shape: f32[2,32,32], index: 9, kind: input, shape index: {}]   ;;  %s17891_s10 = inlined_call_operand.vmem [shape: f32[2,1,32], index: 10, kind: input, shape index: {}]   ;;  %s17892_s11 = inlined_call_operand.vmem [shape: f32[2,1,32], index: 11, kind: input, shape index: {}]   ;;  %s17893_s12 = inlined_call_operand.vmem [shape: f32[2,1,32], index: 12, kind: input, shape index: {}]   ;;  %s17894_s13 = inlined_call_operand.hbm [shape: f32[2,32,64], index: 13, kind: input, shape index: {}]   ;;  %s17895_s14 = inlined_call_operand.vmem [shape: f32[2,1,64], index: 14, kind: input, shape index: {}]   ;;  %s17896_s15 = inlined_call_operand.vmem [shape: f32[2,64,32], index: 15, kind: input, shape index: {}]   ;;  %s17897_s16 = inlined_call_operand.vmem [shape: f32[2,1,32], index: 16, kind: input, shape index: {}]   ;;  %s17898_s17 = inlined_call_operand.hbm [shape: f32[8,8,32], index: 17, kind: output, shape index: {}]  }
   0x1   :  { %17911 = sst [smem:[#allocation22_spill]] %s17881_s0 }
   0x2   :  { %17912 = sst [smem:[#allocation23_spill]] %s17882_s1 }
   0x3   :  { %22 = vsyncpa [#allocation3], 0 }
   0x4   :  { %23 = vsyncpa [#allocation6], 0 }
   0x5   :  { %24 = vsyncpa [#allocation9], 0 }
   0x6   :  { %25 = vsyncpa [#allocation4], 0  ;;  %s15176_s24 = smov [#allocation5]  }
   0x7   :  { %s53_s25 = sshll.u32 %s15176_s24, 4  ;;  %s54_s25 = int_to_ptr.vmem [resolvable:$true] %s53_s25 }
   0x8   :  { %s15076_s26 = scalar_lea.vmem %s54_s25, 1024  ;;  %p15081_p1 = scmp.lt.s32.totalorder %s54_s25, %s54_s25 }
   0x9   :  { %p15077_p0 = scmp.ne.s32.totalorder %s54_s25, %s15076_s26  ;;  %p15082_p2 = scmp.lt.s32.totalorder %s15076_s26, %s15076_s26 }
   0xb   :  { %p15083_p3 = por %p15082_p2, %p15081_p1 }
   0xd   :  { %p15084_p4 = pnand %p15083_p3, %p15077_p0 }
   0xf   :  { %15087 = shalt.err (!%p15084_p4)
}
  0x10   :  { %s17901_s27 = smov 128   ;;  %s15178_s28 = smov 8  }
  0x11   :  { %59 = dma.hbm_to_vmem [thread:$0]  %s17888_s7, 1024, %s54_s25, [#allocation6], %s17901_s27, %s17901_s27, %s15178_s28  }
  0x12   :  { %s15179_s30 = smov [#allocation2]   ;;  %s15180_s19 = smov [#allocation7]  }
  0x13   :  { %s36_s18 = sshll.u32 %s15179_s30, 4  ;;  %s67_s1 = sshll.u32 %s15180_s19, 4  ;;  %s37_s18 = int_to_ptr.vmem [resolvable:$true] %s36_s18  ;;  %s68_s1 = int_to_ptr.vmem [resolvable:$true] %s67_s1 }
  0x14   :  { %s15096_s20 = scalar_lea.vmem %s37_s18, 128  ;;  %p15101_p6 = scmp.lt.s32.totalorder %s37_s18, %s37_s18 }
  0x15   :  { %p15097_p5 = scmp.ne.s32.totalorder %s37_s18, %s15096_s20  ;;  %p15102_p7 = scmp.lt.s32.totalorder %s15096_s20, %s15096_s20 }
  0x17   :  { %p15103_p8 = por %p15102_p7, %p15101_p6 }
  0x19   :  { %p15104_p9 = pnand %p15103_p8, %p15097_p5 }
  0x1b   :  { %15107 = shalt.err (!%p15104_p9)
}
  0x1c   :  { %39 = dma.hbm_to_vmem [thread:$0]  %s17883_s2, 128, %s37_s18, [#allocation3]  }
  0x1d   :  { %s15116_s23 = scalar_lea.vmem %s68_s1, 1024  ;;  %p15121_p11 = scmp.lt.s32.totalorder %s68_s1, %s68_s1 }
  0x1e   :  { %p15117_p10 = scmp.ne.s32.totalorder %s68_s1, %s15116_s23  ;;  %p15122_p12 = scmp.lt.s32.totalorder %s15116_s23, %s15116_s23 }
  0x20   :  { %p15123_p13 = por %p15122_p12, %p15121_p11 }
  0x22   :  { %p15124_p0 = pnand %p15123_p13, %p15117_p10 }
  0x24   :  { %15127 = shalt.err (!%p15124_p0)
}
  0x25   :  { %73 = dma.hbm_to_vmem [thread:$0]  %s17890_s9, 1024, %s68_s1, [#allocation6], %s17901_s27, %s17901_s27, %s15178_s28  }
  0x26   :  { %s15181_s25 = smov [#allocation8]  }
  0x27   :  { %s85_s26 = sshll.u32 %s15181_s25, 4  ;;  %s86_s26 = int_to_ptr.vmem [resolvable:$true] %s85_s26 }
  0x28   :  { %s15136_s29 = scalar_lea.vmem %s86_s26, 1024  ;;  %p15141_p2 = scmp.lt.s32.totalorder %s86_s26, %s86_s26 }
  0x29   :  { %p15137_p1 = scmp.ne.s32.totalorder %s86_s26, %s15136_s29  ;;  %p15142_p3 = scmp.lt.s32.totalorder %s15136_s29, %s15136_s29 }
  0x2b   :  { %p15143_p4 = por %p15142_p3, %p15141_p2 }
  0x2d   :  { %p15144_p5 = pnand %p15143_p4, %p15137_p1 }
  0x2f   :  { %15147 = shalt.err (!%p15144_p5)
}
  0x30   :  { %91 = dma.hbm_to_vmem [thread:$0]  %s17894_s13, 1024, %s86_s26, [#allocation9], %s17901_s27, %s17901_s27, %s15178_s28  }
  0x31   :  { %15168 = dma.done.wait [#allocation3], 128  }
  0x32   :  { %15169 = vsyncadd [#allocation3], 4294967168 }
  0x33   :  { %15170 = dma.done.wait [#allocation6], 2048  }
  0x34   :  { %15171 = vsyncadd [#allocation6], 4294965248 }
  0x35   :  { %15172 = dma.done.wait [#allocation9], 1024  }
  0x36   :  { %15173 = vsyncadd [#allocation9], 4294966272  ;;  %vm181_vm0 = vcmask 261120   ;;  %s17913_s18 = sld [smem:[#allocation22_spill]]  ;;  %v326_v56 = vld [vmem:[%s17886_s5 + $0x18] sm:$0xff]  ;;  %v325_v57 = vld [vmem:[%s17886_s5 + $0x10] sm:$0xff] }
  0x37   :  { %13849 = vmatprep.subr.mxu0 %v326_v56  ;;  %14705 = vmatprep.subr.mxu1 %v326_v56  ;;  %v324_v58 = vld [vmem:[%s17886_s5 + $0x8] sm:$0xff]  ;;  %v323_v59 = vld [vmem:[%s17886_s5] sm:$0xff]  ;;  %s17914_s2 = sld [smem:[#allocation23_spill]]  ;;  %vm15183_vm1 = vmmov 0   ;;  %s15184_s9 = smov 96   ;;  %vm606_vm2 = vcmask 64512  }
  0x38   :  { %13850 = vmatpush3.msra.mxu0 %v326_v56  ;;  %14709 = vmatpush3.msra.mxu1 %v326_v56  ;;  %v15390_v60 = vld [vmem:[#allocation5 + $0x18] sm:$0xff]  ;;  %s15186_s1 = smov 88   ;;  %s15187_s20 = smov 120   ;;  %vm6068_vm4 = vcmask 130048   ;;  %vm6077_vm5 = vcmask 195584   ;;  %vm6531_vm6 = vcmask 523264  }
  0x39   :  { %13851 = vmatprep.subr.mxu0 %v325_v57  ;;  %14706 = vmatprep.subr.mxu1 %v325_v57  ;;  %s15188_s21 = smov 80   ;;  %s15189_s13 = smov 112  }
  0x3a   :  { %13852 = vmatpush3.msra.mxu0 %v325_v57  ;;  %14710 = vmatpush3.msra.mxu1 %v325_v57  ;;  %s15190_s22 = smov 72   ;;  %s15191_s23 = smov 104  }
  0x3b   :  { %13853 = vmatprep.subr.mxu0 %v324_v58  ;;  %14707 = vmatprep.subr.mxu1 %v324_v58  ;;  %s15192_s7 = smov 16   ;;  %s15193_s24 = smov 24  }
  0x3c   :  { %v110_v0 = vld [vmem:[%s17913_s18] sm:$0xff]  ;;  %v112_v1 = vld [vmem:[%s17913_s18 + $0x10] sm:$0xff]  ;;  %v111_v2 = vld [vmem:[%s17913_s18 + $0x8] sm:$0xff]  ;;  %13854 = vmatpush3.msra.mxu0 %v324_v58  ;;  %14711 = vmatpush3.msra.mxu1 %v324_v58 }
  0x3d   :  { %v182_v3 = vsel %vm181_vm0, %v110_v0, 0.0  ;;  %v188_v4 = vsel %vm181_vm0, %v112_v1, 0.0  ;;  %v113_v5 = vld [vmem:[%s17913_s18 + $0x18] sm:$0xff]  ;;  %v185_v6 = vsel %vm181_vm0, %v111_v2, 0.0  ;;  %v114_v8 = vld [vmem:[%s17913_s18 + $0x20] sm:$0xff]  ;;  %v115_v9 = vld [vmem:[%s17913_s18 + $0x28] sm:$0xff]  ;;  %13855 = vmatprep.subr.mxu0 %v323_v59  ;;  %14708 = vmatprep.subr.mxu1 %v323_v59 }
  0x3e   :  { %183 = vadd.xlane.f32.xlu0 %v182_v3  ;;  %189 = vadd.xlane.f32.xlu1 %v188_v4  ;;  %v191_v7 = vsel %vm181_vm0, %v113_v5, 0.0  ;;  %v194_v10 = vsel %vm181_vm0, %v114_v8, 0.0  ;;  %v197_v11 = vsel %vm181_vm0, %v115_v9, 0.0  ;;  %v116_v12 = vld [vmem:[%s17913_s18 + $0x30] sm:$0xff]  ;;  %v117_v13 = vld [vmem:[%s17913_s18 + $0x38] sm:$0xff] }
  0x3f   :  { %v200_v14 = vsel %vm181_vm0, %v116_v12, 0.0  ;;  %v203_v15 = vsel %vm181_vm0, %v117_v13, 0.0  ;;  %13856 = vmatpush3.msra.mxu0 %v323_v59  ;;  %14712 = vmatpush3.msra.mxu1 %v323_v59 }
  0x40   :  { %13869 = vmatprep.subr.mxu1 %v15390_v60 }
  0x42   :  { %186 = vadd.xlane.f32.xlu0 %v185_v6  ;;  %192 = vadd.xlane.f32.xlu1 %v191_v7 }
  0x46   :  { %195 = vadd.xlane.f32.xlu0 %v194_v10  ;;  %198 = vadd.xlane.f32.xlu1 %v197_v11 }
  0x4a   :  { %201 = vadd.xlane.f32.xlu0 %v200_v14  ;;  %204 = vadd.xlane.f32.xlu1 %v203_v15 }
  0xc7   :  { %v184_v16 = vpop.xlane.xlu0 %183  ;;  %v190_v17 = vpop.xlane.xlu1 %189 }
  0xc8   :  { %v207_v18 = vmul.f32 0.03125, %v184_v16  ;;  %v209_v19 = vmul.f32 0.03125, %v190_v17 }
  0xca   :  { %v15338_v20 = vsub.f32 %v110_v0, %v207_v18  ;;  %v15340_v21 = vsub.f32 %v112_v1, %v209_v19 }
  0xcb   :  { %v187_v22 = vpop.xlane.xlu0 %186  ;;  %v193_v23 = vpop.xlane.xlu1 %192 }
  0xcc   :  { %v208_v24 = vmul.f32 0.03125, %v187_v22  ;;  %v210_v25 = vmul.f32 0.03125, %v193_v23  ;;  %v223_v26 = vmul.f32 %v15338_v20, %v15338_v20  ;;  %v225_v27 = vmul.f32 %v15340_v21, %v15340_v21  ;;  %v13154_v23 = vld [vmem:[%s17884_s3] ss:$0 sm:$0xff] }
  0xce   :  { %v15346_v28 = vsub.f32 %v111_v2, %v208_v24  ;;  %v15348_v29 = vsub.f32 %v113_v5, %v210_v25  ;;  %v231_v30 = vsel %vm181_vm0, %v223_v26, 0.0  ;;  %v237_v33 = vsel %vm181_vm0, %v225_v27, 0.0  ;;  %v13155_v26 = vld [vmem:[%s17885_s4] ss:$0 sm:$0xff] }
  0xcf   :  { %232 = vadd.xlane.f32.xlu0 %v231_v30  ;;  %v196_v31 = vpop.xlane.xlu0 %195  ;;  %v199_v32 = vpop.xlane.xlu1 %198 }
  0xd0   :  { %v211_v34 = vmul.f32 0.03125, %v196_v31  ;;  %v212_v35 = vmul.f32 0.03125, %v199_v32  ;;  %v224_v36 = vmul.f32 %v15346_v28, %v15346_v28  ;;  %v226_v37 = vmul.f32 %v15348_v29, %v15348_v29  ;;  %v118_v31 = vld [vmem:[%s17914_s2] sm:$0xff] }
  0xd2   :  { %v15356_v38 = vsub.f32 %v114_v8, %v211_v34  ;;  %v15358_v39 = vsub.f32 %v115_v9, %v212_v35  ;;  %v234_v40 = vsel %vm181_vm0, %v224_v36, 0.0  ;;  %v240_v43 = vsel %vm181_vm0, %v226_v37, 0.0 }
  0xd3   :  { %238 = vadd.xlane.f32.xlu0 %v237_v33  ;;  %235 = vadd.xlane.f32.xlu1 %v234_v40  ;;  %v202_v41 = vpop.xlane.xlu0 %201  ;;  %v205_v42 = vpop.xlane.xlu1 %204  ;;  %v119_v40 = vld [vmem:[%s17914_s2 + $0x8] sm:$0xff] }
  0xd4   :  { %v213_v44 = vmul.f32 0.03125, %v202_v41  ;;  %v214_v45 = vmul.f32 0.03125, %v205_v42  ;;  %v227_v46 = vmul.f32 %v15356_v38, %v15356_v38  ;;  %v228_v47 = vmul.f32 %v15358_v39, %v15358_v39 }
  0xd6   :  { %v15366_v48 = vsub.f32 %v116_v12, %v213_v44  ;;  %v15368_v49 = vsub.f32 %v117_v13, %v214_v45  ;;  %v243_v50 = vsel %vm181_vm0, %v227_v46, 0.0  ;;  %v246_v51 = vsel %vm181_vm0, %v228_v47, 0.0  ;;  %v120_v44 = vld [vmem:[%s17914_s2 + $0x10] sm:$0xff] }
  0xd7   :  { %241 = vadd.xlane.f32.xlu1 %v240_v43  ;;  %244 = vadd.xlane.f32.xlu0 %v243_v50 }
  0xd8   :  { %v229_v52 = vmul.f32 %v15366_v48, %v15366_v48  ;;  %v230_v53 = vmul.f32 %v15368_v49, %v15368_v49 }
  0xda   :  { %v249_v54 = vsel %vm181_vm0, %v229_v52, 0.0  ;;  %v252_v55 = vsel %vm181_vm0, %v230_v53, 0.0  ;;  %v121_v52 = vld [vmem:[%s17914_s2 + $0x18] sm:$0xff] }
  0xdb   :  { %247 = vadd.xlane.f32.xlu1 %v246_v51  ;;  %250 = vadd.xlane.f32.xlu0 %v249_v54 }
  0xdf   :  { %253 = vadd.xlane.f32.xlu1 %v252_v55 }
 0x158   :  { %v233_v61 = vpop.xlane.xlu0 %232 }
 0x159   :  { %v255_v62 = vmul.f32 0.03125, %v233_v61 }
 0x15b   :  { %v263_v63 = vadd.f32 1e-05, %v255_v62 }
 0x15c   :  { %v236_v0 = vpop.xlane.xlu1 %235  ;;  %v239_v1 = vpop.xlane.xlu0 %238 }
 0x15d   :  { %14732 = vrsqrt.f32 %v263_v63  ;;  %v256_v2 = vmul.f32 0.03125, %v236_v0  ;;  %v257_v3 = vmul.f32 0.03125, %v239_v1  ;;  %v123_v63 = vld [vmem:[%s17914_s2 + $0x28] sm:$0xff] }
 0x15f   :  { %v264_v4 = vadd.f32 1e-05, %v256_v2  ;;  %v265_v5 = vadd.f32 1e-05, %v257_v3 }
 0x160   :  { %v242_v6 = vpop.xlane.xlu1 %241  ;;  %v245_v7 = vpop.xlane.xlu0 %244 }
 0x161   :  { %14734 = vrsqrt.f32 %v264_v4  ;;  %v258_v8 = vmul.f32 0.03125, %v242_v6  ;;  %v259_v9 = vmul.f32 0.03125, %v245_v7  ;;  %v465_v6 = vld [vmem:[#allocation5 + $0x10] sm:$0xff] }
 0x162   :  { %14736 = vrsqrt.f32 %v265_v5  ;;  %v125_v7 = vld [vmem:[%s17914_s2 + $0x38] sm:$0xff] }
 0x163   :  { %v266_v10 = vadd.f32 1e-05, %v258_v8  ;;  %v267_v11 = vadd.f32 1e-05, %v259_v9  ;;  %v464_v9 = vld [vmem:[#allocation5 + $0x8] sm:$0xff] }
 0x164   :  { %v248_v12 = vpop.xlane.xlu1 %247  ;;  %v251_v13 = vpop.xlane.xlu0 %250 }
 0x165   :  { %14738 = vrsqrt.f32 %v266_v10  ;;  %v260_v14 = vmul.f32 0.03125, %v248_v12  ;;  %v261_v15 = vmul.f32 0.03125, %v251_v13  ;;  %v463_v10 = vld [vmem:[#allocation5] sm:$0xff] }
 0x166   :  { %14740 = vrsqrt.f32 %v267_v11  ;;  %v13156_v11 = vld [vmem:[%s17887_s6] ss:$0 sm:$0xff] }
 0x167   :  { %v268_v16 = vadd.f32 1e-05, %v260_v14  ;;  %v269_v17 = vadd.f32 1e-05, %v261_v15 }
 0x168   :  { %v254_v18 = vpop.xlane.xlu1 %253 }
 0x169   :  { %14742 = vrsqrt.f32 %v268_v16  ;;  %v262_v19 = vmul.f32 0.03125, %v254_v18 }
 0x16a   :  { %v14733_v22 = vpop.eup %14732  ;;  %14744 = vrsqrt.f32 %v269_v17 }
 0x16b   :  { %v270_v24 = vadd.f32 1e-05, %v262_v19  ;;  %v279_v25 = vmul.f32 %v14733_v22, %v15338_v20 }
 0x16d   :  { %14746 = vrsqrt.f32 %v270_v24  ;;  %v293_v27 = vmul.f32 %v13154_v23, %v279_v25 }
 0x16e   :  { %v14735_v30 = vpop.eup %14734 }
 0x16f   :  { %v14737_v32 = vpop.eup %14736  ;;  %v307_v33 = vadd.f32 %v13155_v26, %v293_v27  ;;  %v280_v34 = vmul.f32 %v14735_v30, %v15346_v28 }
 0x170   :  { %v281_v35 = vmul.f32 %v14737_v32, %v15340_v21 }
 0x171   :  { %v315_v36 = vadd.f32 %v307_v33, %v118_v31  ;;  %v294_v37 = vmul.f32 %v13154_v23, %v280_v34  ;;  %v15490_v34 = vld [vmem:[%s17889_s8] ss:$0 sm:$0xff] }
 0x172   :  { %v14739_v20 = vpop.eup %14738  ;;  %v295_v41 = vmul.f32 %v13154_v23, %v281_v35 }
 0x173   :  { %v14741_v42 = vpop.eup %14740  ;;  %13857 = vmatprep.mubr.msk.f32.mxu0 %vm181_vm0, %v315_v36  ;;  %v308_v43 = vadd.f32 %v13155_v26, %v294_v37  ;;  %v282_v28 = vmul.f32 %v14739_v20, %v15348_v29  ;;  %v122_v29 = vld [vmem:[%s17914_s2 + $0x20] sm:$0xff] }
 0x174   :  { %v309_v45 = vadd.f32 %v13155_v26, %v295_v41  ;;  %v283_v21 = vmul.f32 %v14741_v42, %v15356_v38 }
 0x175   :  { %v316_v46 = vadd.f32 %v308_v43, %v119_v40  ;;  %v296_v47 = vmul.f32 %v13154_v23, %v282_v28 }
 0x176   :  { %v14743_v50 = vpop.eup %14742  ;;  %v317_v51 = vadd.f32 %v309_v45, %v120_v44  ;;  %v297_v53 = vmul.f32 %v13154_v23, %v283_v21 }
 0x177   :  { %v14745_v54 = vpop.eup %14744  ;;  %13858 = vmatmul.mubr.msk.f32.vlgmr.msra.gmra.mxu0 %vm181_vm0, %v316_v46  ;;  %v310_v55 = vadd.f32 %v13155_v26, %v296_v47  ;;  %v284_v56 = vmul.f32 %v14743_v50, %v15358_v39  ;;  %v124_v39 = vld [vmem:[%s17914_s2 + $0x30] sm:$0xff] }
 0x178   :  { %13860 = vmatprep.mubr.msk.f32.mxu0 %vm181_vm0, %v317_v51  ;;  %v311_v38 = vadd.f32 %v13155_v26, %v297_v53  ;;  %v285_v57 = vmul.f32 %v14745_v54, %v15366_v48  ;;  %v15185_v54 = vmov 1966171168  }
 0x179   :  { %v318_v58 = vadd.f32 %v310_v55, %v121_v52  ;;  %v298_v59 = vmul.f32 %v13154_v23, %v284_v56  ;;  %v126_v56 = vld [vmem:[#allocation2] sm:$0xff] }
 0x17a   :  { %v14747_v61 = vpop.eup %14746  ;;  %v319_v62 = vadd.f32 %v311_v38, %v122_v29  ;;  %v299_v0 = vmul.f32 %v13154_v23, %v285_v57  ;;  %v134_v29 = vlaneseq  ;;  %vm127_vm3 = vcmp.gt.f32.partialorder %v126_v56, 0.5 }
 0x17b   :  { %13861 = vmatmul.mubr.msk.f32.gmra.mxu0 %vm181_vm0, %v318_v58  ;;  %v312_v1 = vadd.f32 %v13155_v26, %v298_v59  ;;  %v286_v2 = vmul.f32 %v14747_v61, %v15368_v49 }
 0x17c   :  { %13863 = vmatprep.mubr.msk.f32.mxu1 %vm181_vm0, %v319_v62  ;;  %v313_v48 = vadd.f32 %v13155_v26, %v299_v0  ;;  %v135_v57 = vshrl.u32 %v134_v29, 7 }
 0x17d   :  { %v320_v3 = vadd.f32 %v312_v1, %v123_v63  ;;  %v300_v4 = vmul.f32 %v13154_v23, %v286_v2 }
 0x17e   :  { %v321_v5 = vadd.f32 %v313_v48, %v124_v39  ;;  %v1230_v0 = vsub.s32 0, %v135_v57 }
 0x17f   :  { %13864 = vmatmul.mubr.msk.f32.vlgmr.msra.gmra.mxu1 %vm181_vm0, %v320_v3  ;;  %v314_v8 = vadd.f32 %v13155_v26, %v300_v4 }
 0x180   :  { %13866 = vmatprep.mubr.msk.f32.mxu1 %vm181_vm0, %v321_v5  ;;  %13870 = vmatpush3.msra.mxu1 %v15390_v60  ;;  %v17902_v60 = vmov 0.0  }
 0x181   :  { %13871 = vmatprep.subr.mxu1 %v465_v6  ;;  %v322_v49 = vadd.f32 %v314_v8, %v125_v7  ;;  %13889 = vmatprep.subr.mxu0 %v17902_v60  ;;  %v128_v59 = vsel %vm127_vm3, -9e+15, %v17902_v60 }
 0x182   :  { %13872 = vmatpush3.msra.mxu1 %v465_v6  ;;  %13891 = vmatprep.mubr.msk.f32.mxu0 %vm15183_vm1, %v17902_v60 }
 0x183   :  { %13867 = vmatmul.mubr.msk.f32.gmra.mxu1 %vm181_vm0, %v322_v49  ;;  %13873 = vmatprep.subr.mxu1 %v464_v9 }
 0x184   :  { %13874 = vmatpush3.msra.mxu1 %v464_v9  ;;  %13877 = vmatprep.mubr.msk.f32.mxu1 %vm181_vm0, %v307_v33 }
 0x185   :  { %13875 = vmatprep.subr.mxu1 %v463_v10 }
 0x186   :  { %13876 = vmatpush3.msra.mxu1 %v463_v10 }
 0x187   :  { %13878 = vmatmul.mubr.msk.f32.vlgmr.msra.gmra.mxu1 %vm181_vm0, %v308_v43  ;;  %13894 = vmatprep.subr.mxu1 %v17902_v60 }
 0x188   :  { %13880 = vmatprep.mubr.msk.f32.mxu1 %vm181_vm0, %v309_v45 }
 0x18b   :  { %13881 = vmatmul.mubr.msk.f32.gmra.mxu1 %vm181_vm0, %v310_v55  ;;  %v132_v55 = vunpack.c.l.s4 %v15185_v54 }
 0x18c   :  { %13883 = vmatprep.mubr.msk.f32.mxu1 %vm181_vm0, %v311_v38 }
 0x18d   :  { %v133_v38 = vunpack.c.0.s8 %v132_v55 }
 0x18f   :  { %13884 = vmatmul.mubr.msk.f32.gmra.mxu1 %vm181_vm0, %v312_v1  ;;  %v136_v58 = vsub.s32 %v133_v38, %v135_v57 }
 0x190   :  { %13886 = vmatprep.mubr.msk.f32.mxu1 %vm181_vm0, %v313_v48  ;;  %v130_v48 = vcombine.high %v128_v59, %v128_v59 }
 0x191   :  { %v137_v61 = vrot.slane %v128_v59, %v136_v58 }
 0x192   :  { %v144_v49 = vrot.slane %v130_v48, %v136_v58 }
 0x193   :  { %13887 = vmatmul.mubr.msk.f32.gmra.mxu1 %vm181_vm0, %v314_v8  ;;  %v145_v62 = vcombine.high %v137_v61, %v137_v61  ;;  %v153_v1 = vrot.slane %v137_v61, %v136_v58 }
 0x194   :  { %13896 = vmatprep.mubr.msk.f32.mxu1 %vm15183_vm1, %v17902_v60 }
 0x195   :  { %v167_v63 = vrot.slane %v145_v62, %v136_v58  ;;  %v15570_v5 = vrot.slane %v153_v1, %v1230_v0 }
 0x197   :  { %v15568_v2 = vrot.slane %v167_v63, %v1230_v0 }
 0x237   :  { %v13859_v12 = vpop.f32.mrf.mxu0 }
 0x238   :  { %v15457_v13 = vadd.f32 %v13859_v12, %v13156_v11 }
 0x239   :  { %v424_v14 = vpop.f32.mrf.mxu0 }
 0x23a   :  { %v15459_v15 = vadd.f32 %v13156_v11, %v424_v14  ;;  %682 = vrot.lane.b32.xlu1 %v15457_v13, %s15184_s9  ;;  %v177_v14 = vcombine.high %v167_v63, %v167_v63 }
 0x23b   :  { %v13862_v16 = vpop.f32.mrf.mxu0 }
 0x23c   :  { %604 = vrot.lane.b32.xlu0 %v15459_v15, %s15184_s9  ;;  %v15469_v23 = vadd.f32 %v13862_v16, %v13156_v11  ;;  %v146_v16 = vcombine.high %v144_v49, %v144_v49 }
 0x23d   :  { %v434_v17 = vpop.f32.mrf.mxu0 }
 0x23e   :  { %v15465_v18 = vadd.f32 %v13156_v11, %v434_v17 }
 0x23f   :  { %v13865_v19 = vpop.f32.mrf.mxu1 }
 0x240   :  { %759 = vrot.lane.b32.xlu1 %v15465_v18, %s15184_s9  ;;  %v15477_v27 = vadd.f32 %v13865_v19, %v13156_v11  ;;  %v175_v19 = vcombine.high %v153_v1, %v153_v1 }
 0x241   :  { %v444_v22 = vpop.f32.mrf.mxu1 }
 0x242   :  { %v15471_v24 = vadd.f32 %v13156_v11, %v444_v22 }
 0x243   :  { %v13868_v25 = vpop.f32.mrf.mxu1 }
 0x244   :  { %836 = vrot.lane.b32.xlu1 %v15469_v23, %s15184_s9  ;;  %913 = vrot.lane.b32.xlu0 %v15471_v24, %s15184_s9  ;;  %v15485_v33 = vadd.f32 %v13868_v25, %v13156_v11 }
 0x245   :  { %v454_v26 = vpop.f32.mrf.mxu1 }
 0x246   :  { %v15479_v30 = vadd.f32 %v13156_v11, %v454_v26  ;;  %v15582_v26 = vrot.slane %v177_v14, %v1230_v0 }
 0x247   :  { %v13879_v31 = vpop.f32.mrf.mxu1 }
 0x248   :  { %990 = vrot.lane.b32.xlu1 %v15477_v27, %s15184_s9  ;;  %1067 = vrot.lane.b32.xlu0 %v15479_v30, %s15184_s9  ;;  %v15554_v53 = vadd.f32 %v13879_v31, %v15490_v34  ;;  %v174_v31 = vrot.slane %v146_v16, %v136_v58 }
 0x249   :  { %v564_v32 = vpop.f32.mrf.mxu1 }
 0x24a   :  { %v15540_v51 = vadd.f32 %v15490_v34, %v564_v32 }
 0x24b   :  { %v13882_v35 = vpop.f32.mrf.mxu1 }
 0x24c   :  { %v15493_v36 = vadd.f32 %v13882_v35, %v15490_v34  ;;  %1144 = vrot.lane.b32.xlu1 %v15485_v33, %s15184_s9 }
 0x24d   :  { %v15497_v37 = vpop.f32.mrf.mxu1 }
 0x24f   :  { %v13885_v20 = vpop.f32.mrf.mxu1 }
 0x250   :  { %v15500_v40 = vadd.f32 %v13885_v20, %v15490_v34 }
 0x251   :  { %v15502_v41 = vpop.f32.mrf.mxu1 }
 0x253   :  { %v13888_v42 = vpop.f32.mrf.mxu1 }
 0x254   :  { %v15505_v43 = vadd.f32 %v13888_v42, %v15490_v34  ;;  %v15584_v42 = vrot.slane %v175_v19, %v1230_v0 }
 0x255   :  { %v15566_v39 = vpop.f32.mrf.mxu1 }
 0x2ac   :  { %v683_v44 = vpop.permute.xlu1 %682 }
 0x2ad   :  { %13895 = vmatpush3.xpose.msk.msra.mxu1 %vm606_vm2, %v683_v44 }
 0x2ae   :  { %v605_v28 = vpop.permute.xlu0 %604  ;;  %13904 = vmatprep.subr.mxu1 %v17902_v60 }
 0x2af   :  { %13890 = vmatpush3.xpose.msk.msra.mxu0 %vm606_vm2, %v605_v28  ;;  %v160_v28 = vrot.slane %v144_v49, %v136_v58 }
 0x2b0   :  { %13897 = vmatmul.mubr.msk.f32.vlgmr.msra.gmra.mxu1 %vm606_vm2, %v15457_v13  ;;  %13899 = vmatprep.subr.mxu0 %v17902_v60 }
 0x2b1   :  { %13906 = vmatprep.mubr.msk.f32.mxu1 %vm15183_vm1, %v17902_v60  ;;  %v176_v29 = vcombine.high %v160_v28, %v160_v28  ;;  %v15591_v59 = vrot.slane %v160_v28, %v1230_v0 }
 0x2b2   :  { %v760_v45 = vpop.permute.xlu1 %759  ;;  %13892 = vmatmul.mubr.msk.f32.vlgmr.msra.gmra.mxu0 %vm606_vm2, %v15459_v15 }
 0x2b3   :  { %13900 = vmatpush3.xpose.msk.msra.mxu0 %vm606_vm2, %v760_v45  ;;  %13901 = vmatprep.mubr.msk.f32.mxu0 %vm15183_vm1, %v17902_v60 }
 0x2b4   :  { %13909 = vmatprep.subr.mxu0 %v17902_v60 }
 0x2b6   :  { %v837_v21 = vpop.permute.xlu1 %836  ;;  %13902 = vmatmul.mubr.msk.f32.vlgmr.msra.gmra.mxu0 %vm606_vm2, %v15465_v18  ;;  %v914_v46 = vpop.permute.xlu0 %913 }
 0x2b7   :  { %13905 = vmatpush3.xpose.msk.msra.mxu1 %vm606_vm2, %v837_v21  ;;  %13910 = vmatpush3.xpose.msk.msra.mxu0 %vm606_vm2, %v914_v46 }
 0x2b8   :  { %13911 = vmatprep.mubr.msk.f32.mxu0 %vm15183_vm1, %v17902_v60  ;;  %13914 = vmatprep.subr.mxu1 %v17902_v60 }
 0x2b9   :  { %13919 = vmatprep.subr.mxu0 %v17902_v60 }
 0x2ba   :  { %v991_v47 = vpop.permute.xlu1 %990  ;;  %13907 = vmatmul.mubr.msk.f32.vlgmr.msra.gmra.mxu1 %vm606_vm2, %v15469_v23  ;;  %13912 = vmatmul.mubr.msk.f32.vlgmr.msra.gmra.mxu0 %vm606_vm2, %v15471_v24  ;;  %v1068_v50 = vpop.permute.xlu0 %1067 }
 0x2bb   :  { %13915 = vmatpush3.xpose.msk.msra.mxu1 %vm606_vm2, %v991_v47  ;;  %13920 = vmatpush3.xpose.msk.msra.mxu0 %vm606_vm2, %v1068_v50  ;;  %v15587_v47 = vrot.slane %v174_v31, %v1230_v0  ;;  %v178_v50 = vcombine.high %v174_v31, %v174_v31 }
 0x2bc   :  { %13916 = vmatprep.mubr.msk.f32.mxu1 %vm15183_vm1, %v17902_v60  ;;  %13921 = vmatprep.mubr.msk.f32.mxu0 %vm15183_vm1, %v17902_v60 }
 0x2bd   :  { %13924 = vmatprep.subr.mxu1 %v17902_v60  ;;  %13929 = vmatprep.subr.mxu0 %v17902_v60  ;;  %v15594_v63 = vrot.slane %v178_v50, %v1230_v0 }
 0x2be   :  { %13917 = vmatmul.mubr.msk.f32.vlgmr.msra.gmra.mxu1 %vm606_vm2, %v15477_v27  ;;  %v1145_v52 = vpop.permute.xlu1 %1144  ;;  %13922 = vmatmul.mubr.msk.f32.vlgmr.msra.gmra.mxu0 %vm606_vm2, %v15479_v30 }
 0x2bf   :  { %13925 = vmatpush3.xpose.msk.msra.mxu1 %vm606_vm2, %v1145_v52  ;;  %13930 = vmatpush3.msra.mxu0 %v15540_v51 }
 0x2c0   :  { %13926 = vmatprep.mubr.msk.f32.mxu1 %vm15183_vm1, %v17902_v60  ;;  %13934 = vmatprep.subr.mxu1 %v17902_v60 }
 0x2c1   :  { %13931 = vmatprep.mubr.msk.f32.mxu0 %vm15183_vm1, %v17902_v60  ;;  %13939 = vmatprep.subr.mxu0 %v17902_v60 }
 0x2c2   :  { %13927 = vmatmul.mubr.msk.f32.vlgmr.msra.gmra.mxu1 %vm606_vm2, %v15485_v33 }
 0x2c3   :  { %13935 = vmatpush3.msra.mxu1 %v15554_v53  ;;  %13936 = vmatprep.mubr.msk.f32.mxu1 %vm15183_vm1, %v17902_v60 }
 0x2c4   :  { %13944 = vmatprep.subr.mxu1 %v17902_v60 }
 0x370   :  { %v754_v3 = vpop.f32.mrf.mxu1 }
 0x371   :  { %v1221_v4 = vmul.f32 0.35355338, %v754_v3  ;;  %v15597_v3 = vrot.slane %v176_v29, %v1230_v0 }
 0x372   :  { %v677_v6 = vpop.f32.mrf.mxu0  ;;  %v13898_v7 = vpop.f32.mrf.mxu1 }
 0x373   :  { %v1220_v8 = vmul.f32 0.35355338, %v677_v6  ;;  %v15573_v9 = vadd.f32 %v15568_v2, %v1221_v4 }
 0x374   :  { %v13893_v10 = vpop.f32.mrf.mxu0 }
 0x375   :  { %v1279_v11 = vsel %vm606_vm2, %v15573_v9, -inf  ;;  %v15578_v12 = vadd.f32 %v15570_v5, %v1220_v8 }
 0x376   :  { %1280 = vmax.xlane.f32.xlu1 %v1279_v11  ;;  %v831_v17 = vpop.f32.mrf.mxu0 }
 0x377   :  { %v1276_v22 = vsel %vm606_vm2, %v15578_v12, -inf  ;;  %v1222_v32 = vmul.f32 0.35355338, %v831_v17 }
 0x378   :  { %1277 = vmax.xlane.f32.xlu0 %v1276_v22  ;;  %v13903_v25 = vpop.f32.mrf.mxu0 }
 0x379   :  { %v1270_v55 = vadd.f32 %v15584_v42, %v1222_v32 }
 0x37a   :  { %v908_v35 = vpop.f32.mrf.mxu1  ;;  %v985_v20 = vpop.f32.mrf.mxu0 }
 0x37b   :  { %v1223_v44 = vmul.f32 0.35355338, %v908_v35  ;;  %v1224_v56 = vmul.f32 0.35355338, %v985_v20  ;;  %v1282_v48 = vsel %vm606_vm2, %v1270_v55, -inf }
 0x37c   :  { %v13908_v45 = vpop.f32.mrf.mxu1  ;;  %v13913_v21 = vpop.f32.mrf.mxu0 }
 0x37d   :  { %v1271_v46 = vadd.f32 %v15582_v26, %v1223_v44  ;;  %v1272_v8 = vadd.f32 %v15591_v59, %v1224_v56 }
 0x37e   :  { %v1062_v52 = vpop.f32.mrf.mxu1  ;;  %v1139_v54 = vpop.f32.mrf.mxu0 }
 0x37f   :  { %v1225_v38 = vmul.f32 0.35355338, %v1062_v52  ;;  %v1285_v57 = vsel %vm606_vm2, %v1271_v46, -inf  ;;  %v1226_v4 = vmul.f32 0.35355338, %v1139_v54  ;;  %v1288_v14 = vsel %vm606_vm2, %v1272_v8, -inf }
 0x380   :  { %v13918_v61 = vpop.f32.mrf.mxu1  ;;  %1286 = vmax.xlane.f32.xlu0 %v1285_v57  ;;  %v13923_v58 = vpop.f32.mrf.mxu0 }
 0x381   :  { %v1273_v62 = vadd.f32 %v15587_v47, %v1225_v38  ;;  %v1274_v16 = vadd.f32 %v15597_v3, %v1226_v4 }
 0x382   :  { %v1216_v1 = vpop.f32.mrf.mxu1 }
 0x383   :  { %v1227_v6 = vmul.f32 0.35355338, %v1216_v1  ;;  %v1291_v7 = vsel %vm606_vm2, %v1273_v62, -inf  ;;  %v1294_v0 = vsel %vm606_vm2, %v1274_v16, -inf }
 0x384   :  { %1292 = vmax.xlane.f32.xlu1 %v1291_v7  ;;  %v13928_v49 = vpop.f32.mrf.mxu1  ;;  %1283 = vmax.xlane.f32.xlu0 %v1282_v48 }
 0x385   :  { %v1275_v10 = vadd.f32 %v15594_v63, %v1227_v6 }
 0x387   :  { %v1297_v11 = vsel %vm606_vm2, %v1275_v10, -inf }
 0x388   :  { %1298 = vmax.xlane.f32.xlu1 %v1297_v11  ;;  %1289 = vmax.xlane.f32.xlu0 %v1288_v14 }
 0x38c   :  { %1295 = vmax.xlane.f32.xlu0 %v1294_v0 }
 0x399   :  { %2028 = vrot.lane.b32.xlu1 %v15457_v13, %s15186_s1 }
 0x39d   :  { %1948 = vrot.lane.b32.xlu1 %v15459_v15, %s15187_s20 }
 0x3a1   :  { %2026 = vrot.lane.b32.xlu1 %v15457_v13, %s15187_s20 }
 0x3a2   :  { %1950 = vrot.lane.b32.xlu0 %v15459_v15, %s15186_s1 }
 0x3a5   :  { %2184 = vrot.lane.b32.xlu1 %v15469_v23, %s15186_s1 }
 0x3a6   :  { %2106 = vrot.lane.b32.xlu0 %v15465_v18, %s15186_s1 }
 0x3ff   :  { %v1281_v17 = vpop.xlane.xlu1 %1280 }
 0x400   :  { %v1301_v19 = vsub.f32 %v15573_v9, %v1281_v17 }
 0x401   :  { %v1278_v22 = vpop.xlane.xlu0 %1277 }
 0x402   :  { %v1310_v25 = vmul.f32 1.442695, %v1301_v19  ;;  %v1300_v31 = vsub.f32 %v15578_v12, %v1278_v22 }
 0x404   :  { %14748 = vpow2.f32 %v1310_v25  ;;  %v1308_v32 = vmul.f32 1.442695, %v1300_v31 }
 0x406   :  { %14750 = vpow2.f32 %v1308_v32 }
 0x409   :  { %v1287_v35 = vpop.xlane.xlu0 %1286 }
 0x40a   :  { %v1303_v20 = vsub.f32 %v1271_v46, %v1287_v35 }
 0x40c   :  { %v1314_v44 = vmul.f32 1.442695, %v1303_v20 }
 0x40d   :  { %v1293_v28 = vpop.xlane.xlu1 %1292  ;;  %v1284_v45 = vpop.xlane.xlu0 %1283 }
 0x40e   :  { %14752 = vpow2.f32 %v1314_v44  ;;  %v1305_v21 = vsub.f32 %v1273_v62, %v1293_v28  ;;  %v1302_v50 = vsub.f32 %v1270_v55, %v1284_v45 }
 0x410   :  { %v1318_v52 = vmul.f32 1.442695, %v1305_v21  ;;  %v1312_v54 = vmul.f32 1.442695, %v1302_v50 }
 0x411   :  { %v15620_v29 = vpop.eup %14748  ;;  %v1299_v9 = vpop.xlane.xlu1 %1298 }
 0x412   :  { %v1290_v56 = vpop.xlane.xlu0 %1289  ;;  %14754 = vpow2.f32 %v1318_v52  ;;  %v1307_v38 = vsub.f32 %v1275_v10, %v1299_v9  ;;  %v1327_v57 = vsel %vm606_vm2, %v15620_v29, 0.0 }
 0x413   :  { %v1304_v12 = vsub.f32 %v1272_v8, %v1290_v56  ;;  %v14751_v61 = vpop.eup %14750  ;;  %14756 = vpow2.f32 %v1312_v54  ;;  %1328 = vadd.xlane.f32.xlu1 %v1327_v57 }
 0x414   :  { %v1322_v46 = vmul.f32 1.442695, %v1307_v38  ;;  %v1324_v62 = vsel %vm606_vm2, %v14751_v61, 0.0  ;;  %v15685_v38 = vadd.f32 %v15490_v34, %v15497_v37 }
 0x415   :  { %v1316_v58 = vmul.f32 1.442695, %v1304_v12  ;;  %1325 = vadd.xlane.f32.xlu0 %v1324_v62  ;;  %v15669_v22 = vpop.permute.xlu1 %2028 }
 0x416   :  { %v1296_v55 = vpop.xlane.xlu0 %1295  ;;  %14758 = vpow2.f32 %v1322_v46 }
 0x417   :  { %v1306_v1 = vsub.f32 %v1274_v16, %v1296_v55  ;;  %14760 = vpow2.f32 %v1316_v58 }
 0x419   :  { %v1320_v48 = vmul.f32 1.442695, %v1306_v1  ;;  %v15671_v25 = vpop.permute.xlu1 %1948 }
 0x41a   :  { %v15675_v32 = vpop.permute.xlu0 %1950 }
 0x41b   :  { %14762 = vpow2.f32 %v1320_v48  ;;  %v15625_v4 = vpop.eup %14752  ;;  %v15706_v48 = vadd.f32 %v15490_v34, %v15502_v41 }
 0x41c   :  { %v1333_v6 = vsel %vm606_vm2, %v15625_v4, 0.0 }
 0x41d   :  { %1334 = vadd.xlane.f32.xlu1 %v1333_v6  ;;  %v15673_v31 = vpop.permute.xlu1 %2026 }
 0x41e   :  { %v15679_v20 = vpop.permute.xlu0 %2106 }
 0x41f   :  { %v15629_v7 = vpop.eup %14754 }
 0x420   :  { %v15631_v8 = vpop.eup %14756  ;;  %v1339_v49 = vsel %vm606_vm2, %v15629_v7, 0.0 }
 0x421   :  { %1340 = vadd.xlane.f32.xlu1 %v1339_v49  ;;  %v1330_v10 = vsel %vm606_vm2, %v15631_v8, 0.0  ;;  %v15677_v35 = vpop.permute.xlu1 %2184 }
 0x422   :  { %1331 = vadd.xlane.f32.xlu0 %v1330_v10 }
 0x423   :  { %v15637_v11 = vpop.eup %14758 }
 0x424   :  { %v15639_v14 = vpop.eup %14760  ;;  %v1345_v16 = vsel %vm606_vm2, %v15637_v11, 0.0 }
 0x425   :  { %1346 = vadd.xlane.f32.xlu1 %v1345_v16  ;;  %v1336_v0 = vsel %vm606_vm2, %v15639_v14, 0.0 }
 0x426   :  { %1337 = vadd.xlane.f32.xlu0 %v1336_v0 }
 0x428   :  { %v15645_v17 = vpop.eup %14762 }
 0x429   :  { %v1342_v19 = vsel %vm606_vm2, %v15645_v17, 0.0 }
 0x42a   :  { %1343 = vadd.xlane.f32.xlu0 %v1342_v19 }
 0x436   :  { %2182 = vrot.lane.b32.xlu1 %v15469_v23, %s15187_s20 }
 0x43a   :  { %2340 = vrot.lane.b32.xlu1 %v15477_v27, %s15186_s1 }
 0x43e   :  { %2338 = vrot.lane.b32.xlu1 %v15477_v27, %s15187_s20 }
 0x440   :  { %2104 = vrot.lane.b32.xlu0 %v15465_v18, %s15187_s20 }
 0x442   :  { %2496 = vrot.lane.b32.xlu1 %v15485_v33, %s15186_s1 }
 0x444   :  { %2262 = vrot.lane.b32.xlu0 %v15471_v24, %s15186_s1 }
 0x446   :  { %2494 = vrot.lane.b32.xlu1 %v15485_v33, %s15187_s20 }
 0x448   :  { %2260 = vrot.lane.b32.xlu0 %v15471_v24, %s15187_s20 }
 0x44c   :  { %2418 = vrot.lane.b32.xlu0 %v15479_v30, %s15186_s1 }
 0x450   :  { %2416 = vrot.lane.b32.xlu0 %v15479_v30, %s15187_s20 }
 0x49c   :  { %v1329_v44 = vpop.xlane.xlu1 %1328 }
 0x49d   :  { %14764 = vrcp.f32 %v1329_v44 }
 0x49e   :  { %v1326_v28 = vpop.xlane.xlu0 %1325 }
 0x49f   :  { %14766 = vrcp.f32 %v1326_v28 }
 0x4a6   :  { %v1335_v45 = vpop.xlane.xlu1 %1334 }
 0x4a7   :  { %14768 = vrcp.f32 %v1335_v45 }
 0x4aa   :  { %v14765_v21 = vpop.eup %14764  ;;  %v1341_v50 = vpop.xlane.xlu1 %1340 }
 0x4ab   :  { %14770 = vrcp.f32 %v1341_v50  ;;  %v1332_v52 = vpop.xlane.xlu0 %1331  ;;  %v1357_v54 = vmul.f32 %v14765_v21, %v15620_v29 }
 0x4ac   :  { %v14767_v9 = vpop.eup %14766  ;;  %14772 = vrcp.f32 %v1332_v52 }
 0x4ad   :  { %13937 = vmatmul.mubr.msk.f32.vlgmr.msra.gmra.mxu1 %vm606_vm2, %v1357_v54  ;;  %v1356_v56 = vmul.f32 %v14767_v9, %v14751_v61 }
 0x4ae   :  { %13945 = vmatpush3.msra.mxu1 %v15493_v36  ;;  %v1347_v12 = vpop.xlane.xlu1 %1346  ;;  %13946 = vmatprep.mubr.msk.f32.mxu1 %vm15183_vm1, %v17902_v60 }
 0x4af   :  { %14774 = vrcp.f32 %v1347_v12  ;;  %v1338_v57 = vpop.xlane.xlu0 %1337  ;;  %13932 = vmatmul.mubr.msk.f32.vlgmr.msra.gmra.mxu0 %vm606_vm2, %v1356_v56  ;;  %13954 = vmatprep.subr.mxu1 %v17902_v60 }
 0x4b0   :  { %14776 = vrcp.f32 %v1338_v57  ;;  %13940 = vmatpush3.msra.mxu0 %v15685_v38  ;;  %13941 = vmatprep.mubr.msk.f32.mxu0 %vm15183_vm1, %v17902_v60 }
 0x4b1   :  { %13949 = vmatprep.subr.mxu0 %v17902_v60 }
 0x4b2   :  { %v2183_v46 = vpop.permute.xlu1 %2182 }
 0x4b3   :  { %v1344_v37 = vpop.xlane.xlu0 %1343 }
 0x4b4   :  { %v14769_v29 = vpop.eup %14768  ;;  %14778 = vrcp.f32 %v1344_v37 }
 0x4b5   :  { %v1359_v61 = vmul.f32 %v14769_v29, %v15625_v4 }
 0x4b6   :  { %v2341_v49 = vpop.permute.xlu1 %2340 }
 0x4b7   :  { %13947 = vmatmul.mubr.msk.f32.vlgmr.msra.gmra.mxu1 %vm606_vm2, %v1359_v61  ;;  %v2105_v4 = vpop.permute.xlu0 %2104 }
 0x4b8   :  { %v14771_v58 = vpop.eup %14770  ;;  %13955 = vmatpush3.msra.mxu1 %v15500_v40  ;;  %13956 = vmatprep.mubr.msk.f32.mxu1 %vm15183_vm1, %v17902_v60 }
 0x4b9   :  { %v14773_v62 = vpop.eup %14772  ;;  %13964 = vmatprep.subr.mxu1 %v17902_v60  ;;  %v1361_v55 = vmul.f32 %v14771_v58, %v15629_v7 }
 0x4ba   :  { %v1358_v1 = vmul.f32 %v14773_v62, %v15631_v8  ;;  %v15721_v8 = vadd.f32 %v15490_v34, %v15566_v39 }
 0x4bb   :  { %13957 = vmatmul.mubr.msk.f32.vlgmr.msra.gmra.mxu1 %vm606_vm2, %v1361_v55  ;;  %v2263_v16 = vpop.permute.xlu0 %2262 }
 0x4bc   :  { %v14775_v6 = vpop.eup %14774  ;;  %13942 = vmatmul.mubr.msk.f32.vlgmr.msra.gmra.mxu0 %vm606_vm2, %v1358_v1  ;;  %13965 = vmatpush3.msra.mxu1 %v15505_v43 }
 0x4bd   :  { %v14777_v10 = vpop.eup %14776  ;;  %13950 = vmatpush3.msra.mxu0 %v15706_v48  ;;  %13966 = vmatprep.mubr.msk.f32.mxu1 %vm15183_vm1, %v17902_v60  ;;  %v1363_v7 = vmul.f32 %v14775_v6, %v15637_v11 }
 0x4be   :  { %13974 = vmatprep.subr.mxu1 %v17902_v60  ;;  %13951 = vmatprep.mubr.msk.f32.mxu0 %vm15183_vm1, %v17902_v60  ;;  %v1360_v41 = vmul.f32 %v14777_v10, %v15639_v14  ;;  %v2339_v14 = vpop.permute.xlu1 %2338 }
 0x4bf   :  { %13959 = vmatprep.subr.mxu0 %v17902_v60  ;;  %13967 = vmatmul.mubr.msk.f32.vlgmr.msra.gmra.mxu1 %vm606_vm2, %v1363_v7  ;;  %v2261_v39 = vpop.permute.xlu0 %2260 }
 0x4c0   :  { %13952 = vmatmul.mubr.msk.f32.vlgmr.msra.gmra.mxu0 %vm606_vm2, %v1360_v41  ;;  %13975 = vmatpush3.xpose.msk.msra.mxu1 %vm606_vm2, %v15669_v22 }
 0x4c1   :  { %v14779_v11 = vpop.eup %14778  ;;  %13960 = vmatpush3.msra.mxu0 %v15721_v8  ;;  %13976 = vmatprep.mubr.msk.f32.mxu1 %vm15183_vm1, %v17902_v60 }
 0x4c2   :  { %13984 = vmatprep.subr.mxu1 %v17902_v60  ;;  %13961 = vmatprep.mubr.msk.f32.mxu0 %vm15183_vm1, %v17902_v60  ;;  %v1362_v34 = vmul.f32 %v14779_v11, %v15645_v17  ;;  %v2497_v0 = vpop.permute.xlu1 %2496 }
 0x4c3   :  { %13969 = vmatprep.subr.mxu0 %v17902_v60  ;;  %13977 = vmatmul.mubr.msk.f32.vlgmr.msra.gmra.mxu1 %vm606_vm2, %v15673_v31  ;;  %v2419_v17 = vpop.permute.xlu0 %2418 }
 0x4c4   :  { %13962 = vmatmul.mubr.msk.f32.vlgmr.msra.gmra.mxu0 %vm606_vm2, %v1362_v34  ;;  %13985 = vmatpush3.xpose.msk.msra.mxu1 %vm606_vm2, %v15677_v35 }
 0x4c5   :  { %13970 = vmatpush3.xpose.msk.msra.mxu0 %vm606_vm2, %v15675_v32  ;;  %13971 = vmatprep.mubr.msk.f32.mxu0 %vm15183_vm1, %v17902_v60 }
 0x4c6   :  { %13979 = vmatprep.subr.mxu0 %v17902_v60  ;;  %13986 = vmatprep.mubr.msk.f32.mxu1 %vm15183_vm1, %v17902_v60  ;;  %v2495_v19 = vpop.permute.xlu1 %2494 }
 0x4c7   :  { %13994 = vmatprep.subr.mxu1 %v17902_v60  ;;  %13987 = vmatmul.mubr.msk.f32.vlgmr.msra.gmra.mxu1 %vm606_vm2, %v2183_v46  ;;  %v2417_v22 = vpop.permute.xlu0 %2416 }
 0x4c8   :  { %13972 = vmatmul.mubr.msk.f32.vlgmr.msra.gmra.mxu0 %vm606_vm2, %v15671_v25  ;;  %13995 = vmatpush3.xpose.msk.msra.mxu1 %vm606_vm2, %v2341_v49 }
 0x4c9   :  { %13980 = vmatpush3.xpose.msk.msra.mxu0 %vm606_vm2, %v15679_v20  ;;  %13981 = vmatprep.mubr.msk.f32.mxu0 %vm15183_vm1, %v17902_v60 }
 0x4ca   :  { %13989 = vmatprep.subr.mxu0 %v17902_v60  ;;  %13996 = vmatprep.mubr.msk.f32.mxu1 %vm15183_vm1, %v17902_v60 }
 0x4cb   :  { %14004 = vmatprep.subr.mxu1 %v17902_v60  ;;  %13997 = vmatmul.mubr.msk.f32.vlgmr.msra.gmra.mxu1 %vm606_vm2, %v2339_v14 }
 0x4cc   :  { %13982 = vmatmul.mubr.msk.f32.vlgmr.msra.gmra.mxu0 %vm606_vm2, %v2105_v4  ;;  %14005 = vmatpush3.xpose.msk.msra.mxu1 %vm606_vm2, %v2497_v0 }
 0x4cd   :  { %13990 = vmatpush3.xpose.msk.msra.mxu0 %vm606_vm2, %v2263_v16  ;;  %13991 = vmatprep.mubr.msk.f32.mxu0 %vm15183_vm1, %v17902_v60 }
 0x4ce   :  { %13999 = vmatprep.subr.mxu0 %v17902_v60  ;;  %14006 = vmatprep.mubr.msk.f32.mxu1 %vm15183_vm1, %v17902_v60 }
 0x4cf   :  { %14007 = vmatmul.mubr.msk.f32.vlgmr.msra.gmra.mxu1 %vm606_vm2, %v2495_v19  ;;  %14014 = vmatprep.subr.mxu1 %v17902_v60 }
 0x4d0   :  { %13992 = vmatmul.mubr.msk.f32.vlgmr.msra.gmra.mxu0 %vm606_vm2, %v2261_v39  ;;  %14016 = vmatprep.mubr.msk.f32.mxu1 %vm15183_vm1, %v17902_v60 }
 0x4d1   :  { %14000 = vmatpush3.xpose.msk.msra.mxu0 %vm606_vm2, %v2419_v17  ;;  %14001 = vmatprep.mubr.msk.f32.mxu0 %vm15183_vm1, %v17902_v60 }
 0x4d2   :  { %14009 = vmatprep.subr.mxu0 %v17902_v60 }
 0x4d4   :  { %14002 = vmatmul.mubr.msk.f32.vlgmr.msra.gmra.mxu0 %vm606_vm2, %v2417_v22 }
 0x4d5   :  { %14011 = vmatprep.mubr.msk.f32.mxu0 %vm15183_vm1, %v17902_v60 }
 0x56d   :  { %v15782_v25 = vpop.f32.mrf.mxu1 }
 0x56f   :  { %v15784_v31 = vpop.f32.mrf.mxu0  ;;  %v13938_v32 = vpop.f32.mrf.mxu1 }
 0x571   :  { %v13933_v35 = vpop.f32.mrf.mxu0 }
 0x577   :  { %v15786_v20 = vpop.f32.mrf.mxu1 }
 0x579   :  { %v13948_v44 = vpop.f32.mrf.mxu1 }
 0x57b   :  { %v15788_v28 = vpop.f32.mrf.mxu1 }
 0x57c   :  { %v15790_v45 = vpop.f32.mrf.mxu0 }
 0x57d   :  { %v13958_v21 = vpop.f32.mrf.mxu1 }
 0x57e   :  { %v13943_v50 = vpop.f32.mrf.mxu0 }
 0x57f   :  { %v15792_v52 = vpop.f32.mrf.mxu1 }
 0x580   :  { %v15794_v54 = vpop.f32.mrf.mxu0 }
 0x581   :  { %v13968_v9 = vpop.f32.mrf.mxu1 }
 0x582   :  { %v13953_v56 = vpop.f32.mrf.mxu0 }
 0x583   :  { %v2100_v12 = vpop.f32.mrf.mxu1 }
 0x584   :  { %v15796_v57 = vpop.f32.mrf.mxu0  ;;  %v2573_v37 = vmul.f32 0.35355338, %v2100_v12 }
 0x585   :  { %v13978_v29 = vpop.f32.mrf.mxu1 }
 0x586   :  { %v13963_v61 = vpop.f32.mrf.mxu0  ;;  %v15799_v46 = vadd.f32 %v2573_v37, %v15568_v2 }
 0x587   :  { %v2256_v58 = vpop.f32.mrf.mxu1 }
 0x588   :  { %v2022_v62 = vpop.f32.mrf.mxu0  ;;  %v2591_v55 = vsel %vm606_vm2, %v15799_v46, -inf  ;;  %v2575_v4 = vmul.f32 0.35355338, %v2256_v58 }
 0x589   :  { %v2572_v1 = vmul.f32 0.35355338, %v2022_v62  ;;  %2592 = vmax.xlane.f32.xlu1 %v2591_v55  ;;  %v13988_v6 = vpop.f32.mrf.mxu1 }
 0x58a   :  { %v13973_v49 = vpop.f32.mrf.mxu0  ;;  %v2583_v39 = vadd.f32 %v2575_v4, %v15582_v26 }
 0x58b   :  { %v2412_v10 = vpop.f32.mrf.mxu1  ;;  %v2580_v7 = vadd.f32 %v2572_v1, %v15570_v5 }
 0x58c   :  { %v2178_v41 = vpop.f32.mrf.mxu0  ;;  %v2577_v11 = vmul.f32 0.35355338, %v2412_v10  ;;  %v2597_v50 = vsel %vm606_vm2, %v2583_v39, -inf }
 0x58d   :  { %v2574_v16 = vmul.f32 0.35355338, %v2178_v41  ;;  %v13998_v14 = vpop.f32.mrf.mxu1  ;;  %v2588_v34 = vsel %vm606_vm2, %v2580_v7, -inf }
 0x58e   :  { %2589 = vmax.xlane.f32.xlu0 %v2588_v34  ;;  %v13983_v0 = vpop.f32.mrf.mxu0  ;;  %v2585_v17 = vadd.f32 %v2577_v11, %v15587_v47 }
 0x58f   :  { %v2568_v19 = vpop.f32.mrf.mxu1  ;;  %v2582_v9 = vadd.f32 %v2574_v16, %v15584_v42 }
 0x590   :  { %v2334_v22 = vpop.f32.mrf.mxu0  ;;  %v2579_v32 = vmul.f32 0.35355338, %v2568_v19  ;;  %v2603_v35 = vsel %vm606_vm2, %v2585_v17, -inf }
 0x591   :  { %v2576_v44 = vmul.f32 0.35355338, %v2334_v22  ;;  %2604 = vmax.xlane.f32.xlu1 %v2603_v35  ;;  %v14008_v21 = vpop.f32.mrf.mxu1  ;;  %v2594_v58 = vsel %vm606_vm2, %v2582_v9, -inf }
 0x592   :  { %2598 = vmax.xlane.f32.xlu0 %v2597_v50  ;;  %v13993_v56 = vpop.f32.mrf.mxu0  ;;  %v2587_v12 = vadd.f32 %v2579_v32, %v15594_v63 }
 0x593   :  { %v2584_v62 = vadd.f32 %v2576_v44, %v15591_v59 }
 0x594   :  { %v2490_v37 = vpop.f32.mrf.mxu0  ;;  %v2609_v29 = vsel %vm606_vm2, %v2587_v12, -inf }
 0x595   :  { %v2578_v61 = vmul.f32 0.35355338, %v2490_v37  ;;  %2610 = vmax.xlane.f32.xlu1 %v2609_v29  ;;  %v2600_v1 = vsel %vm606_vm2, %v2584_v62, -inf }
 0x596   :  { %2595 = vmax.xlane.f32.xlu0 %v2594_v58  ;;  %v14003_v55 = vpop.f32.mrf.mxu0 }
 0x597   :  { %v2586_v4 = vadd.f32 %v2578_v61, %v15597_v3 }
 0x599   :  { %v2606_v6 = vsel %vm606_vm2, %v2586_v4, -inf }
 0x59a   :  { %2601 = vmax.xlane.f32.xlu0 %v2600_v1 }
 0x59e   :  { %2607 = vmax.xlane.f32.xlu0 %v2606_v6 }
 0x5a6   :  { %2754 = vrot.lane.b32.xlu1 %v15554_v53, %s15187_s20 }
 0x5aa   :  { %2831 = vrot.lane.b32.xlu1 %v15685_v38, %s15187_s20 }
 0x5ae   :  { %2908 = vrot.lane.b32.xlu1 %v15493_v36, %s15187_s20 }
 0x5b2   :  { %3062 = vrot.lane.b32.xlu1 %v15500_v40, %s15187_s20 }
 0x5b4   :  { %2677 = vrot.lane.b32.xlu0 %v15540_v51, %s15187_s20 }
 0x5b6   :  { %3216 = vrot.lane.b32.xlu1 %v15505_v43, %s15187_s20 }
 0x5b8   :  { %2985 = vrot.lane.b32.xlu0 %v15706_v48, %s15187_s20 }
 0x5ba   :  { %3372 = vrot.lane.b32.xlu1 %v15457_v13, %s15188_s21 }
 0x5bc   :  { %3139 = vrot.lane.b32.xlu0 %v15721_v8, %s15187_s20 }
 0x5be   :  { %3370 = vrot.lane.b32.xlu1 %v15457_v13, %s15189_s13 }
 0x5c0   :  { %3294 = vrot.lane.b32.xlu0 %v15459_v15, %s15188_s21 }
 0x5c2   :  { %3528 = vrot.lane.b32.xlu1 %v15469_v23, %s15188_s21 }
 0x5c4   :  { %3292 = vrot.lane.b32.xlu0 %v15459_v15, %s15189_s13 }
 0x5c8   :  { %3450 = vrot.lane.b32.xlu0 %v15465_v18, %s15188_s21 }
 0x612   :  { %v2593_v49 = vpop.xlane.xlu1 %2592 }
 0x613   :  { %v2613_v10 = vsub.f32 %v15799_v46, %v2593_v49 }
 0x615   :  { %v2622_v41 = vmul.f32 1.442695, %v2613_v10 }
 0x617   :  { %14780 = vpow2.f32 %v2622_v41  ;;  %v2590_v11 = vpop.xlane.xlu0 %2589 }
 0x618   :  { %v2612_v16 = vsub.f32 %v2580_v7, %v2590_v11 }
 0x61a   :  { %v2620_v14 = vmul.f32 1.442695, %v2612_v16  ;;  %v2605_v34 = vpop.xlane.xlu1 %2604 }
 0x61b   :  { %v2617_v0 = vsub.f32 %v2585_v17, %v2605_v34  ;;  %v2599_v19 = vpop.xlane.xlu0 %2598 }
 0x61c   :  { %14782 = vpow2.f32 %v2620_v14  ;;  %v2615_v22 = vsub.f32 %v2583_v39, %v2599_v19 }
 0x61d   :  { %v2630_v32 = vmul.f32 1.442695, %v2617_v0 }
 0x61e   :  { %v2626_v35 = vmul.f32 1.442695, %v2615_v22  ;;  %v2611_v44 = vpop.xlane.xlu1 %2610 }
 0x61f   :  { %v2619_v21 = vsub.f32 %v2587_v12, %v2611_v44  ;;  %v2596_v50 = vpop.xlane.xlu0 %2595 }
 0x620   :  { %14784 = vpow2.f32 %v2626_v35  ;;  %v2614_v56 = vsub.f32 %v2582_v9, %v2596_v50 }
 0x621   :  { %14786 = vpow2.f32 %v2630_v32  ;;  %v2634_v37 = vmul.f32 1.442695, %v2619_v21 }
 0x622   :  { %v2624_v46 = vmul.f32 1.442695, %v2614_v56  ;;  %v2755_v29 = vpop.permute.xlu1 %2754 }
 0x623   :  { %v2602_v61 = vpop.xlane.xlu0 %2601  ;;  %14015 = vmatpush3.msra.mxu1 %v2755_v29 }
 0x624   :  { %v15846_v7 = vpop.eup %14780  ;;  %14788 = vpow2.f32 %v2624_v46  ;;  %v2616_v17 = vsub.f32 %v2584_v62, %v2602_v61  ;;  %14024 = vmatprep.subr.mxu1 %v17902_v60 }
 0x625   :  { %v2639_v39 = vsel %vm606_vm2, %v15846_v7, 0.0  ;;  %14790 = vpow2.f32 %v2634_v37 }
 0x626   :  { %v2628_v12 = vmul.f32 1.442695, %v2616_v17  ;;  %2640 = vadd.xlane.f32.xlu1 %v2639_v39  ;;  %v2832_v35 = vpop.permute.xlu1 %2831 }
 0x627   :  { %v2608_v58 = vpop.xlane.xlu0 %2607 }
 0x628   :  { %14792 = vpow2.f32 %v2628_v12  ;;  %v2618_v9 = vsub.f32 %v2586_v4, %v2608_v58 }
 0x629   :  { %v15851_v55 = vpop.eup %14782 }
 0x62a   :  { %v2632_v1 = vmul.f32 1.442695, %v2618_v9  ;;  %v2636_v6 = vsel %vm606_vm2, %v15851_v55, 0.0  ;;  %v2909_v44 = vpop.permute.xlu1 %2908 }
 0x62b   :  { %2637 = vadd.xlane.f32.xlu0 %v2636_v6  ;;  %v2678_v49 = vpop.permute.xlu0 %2677 }
 0x62c   :  { %14794 = vpow2.f32 %v2632_v1  ;;  %14010 = vmatpush3.msra.mxu0 %v2678_v49 }
 0x62d   :  { %v15855_v62 = vpop.eup %14784  ;;  %14019 = vmatprep.subr.mxu0 %v17902_v60 }
 0x62e   :  { %v2645_v10 = vsel %vm606_vm2, %v15855_v62, 0.0  ;;  %v15860_v41 = vpop.eup %14786  ;;  %v3063_v21 = vpop.permute.xlu1 %3062 }
 0x62f   :  { %2646 = vadd.xlane.f32.xlu1 %v2645_v10  ;;  %v2651_v11 = vsel %vm606_vm2, %v15860_v41, 0.0  ;;  %v2986_v50 = vpop.permute.xlu0 %2985 }
 0x631   :  { %v15862_v4 = vpop.eup %14788 }
 0x632   :  { %v2642_v16 = vsel %vm606_vm2, %v15862_v4, 0.0  ;;  %v15868_v14 = vpop.eup %14790  ;;  %v3217_v56 = vpop.permute.xlu1 %3216 }
 0x633   :  { %2652 = vadd.xlane.f32.xlu1 %v2651_v11  ;;  %2643 = vadd.xlane.f32.xlu0 %v2642_v16  ;;  %v2657_v0 = vsel %vm606_vm2, %v15868_v14, 0.0  ;;  %v15900_v37 = vpop.permute.xlu0 %3139 }
 0x635   :  { %v15870_v34 = vpop.eup %14792 }
 0x636   :  { %v2648_v19 = vsel %vm606_vm2, %v15870_v34, 0.0  ;;  %v3373_v46 = vpop.permute.xlu1 %3372 }
 0x637   :  { %2658 = vadd.xlane.f32.xlu1 %v2657_v0  ;;  %2649 = vadd.xlane.f32.xlu0 %v2648_v19  ;;  %v15902_v29 = vpop.permute.xlu0 %3294 }
 0x639   :  { %v15876_v22 = vpop.eup %14794 }
 0x63a   :  { %v2654_v32 = vsel %vm606_vm2, %v15876_v22, 0.0  ;;  %v15904_v61 = vpop.permute.xlu1 %3370 }
 0x63b   :  { %2655 = vadd.xlane.f32.xlu0 %v2654_v32  ;;  %v15906_v17 = vpop.permute.xlu0 %3292 }
 0x63e   :  { %v15908_v39 = vpop.permute.xlu1 %3528 }
 0x63f   :  { %v15910_v58 = vpop.permute.xlu0 %3450 }
 0x648   :  { %3526 = vrot.lane.b32.xlu1 %v15469_v23, %s15189_s13 }
 0x64c   :  { %3684 = vrot.lane.b32.xlu1 %v15477_v27, %s15188_s21 }
 0x650   :  { %3682 = vrot.lane.b32.xlu1 %v15477_v27, %s15189_s13 }
 0x651   :  { %3448 = vrot.lane.b32.xlu0 %v15465_v18, %s15189_s13 }
 0x654   :  { %3840 = vrot.lane.b32.xlu1 %v15485_v33, %s15188_s21 }
 0x655   :  { %3606 = vrot.lane.b32.xlu0 %v15471_v24, %s15188_s21 }
 0x658   :  { %3838 = vrot.lane.b32.xlu1 %v15485_v33, %s15189_s13 }
 0x659   :  { %3604 = vrot.lane.b32.xlu0 %v15471_v24, %s15189_s13 }
 0x65d   :  { %3762 = vrot.lane.b32.xlu0 %v15479_v30, %s15188_s21 }
 0x661   :  { %3760 = vrot.lane.b32.xlu0 %v15479_v30, %s15189_s13 }
 0x6af   :  { %v2641_v12 = vpop.xlane.xlu1 %2640 }
 0x6b0   :  { %14796 = vrcp.f32 %v2641_v12 }
 0x6b4   :  { %v2638_v9 = vpop.xlane.xlu0 %2637 }
 0x6b5   :  { %14798 = vrcp.f32 %v2638_v9 }
 0x6b8   :  { %v2647_v1 = vpop.xlane.xlu1 %2646 }
 0x6b9   :  { %14800 = vrcp.f32 %v2647_v1 }
 0x6bc   :  { %v2653_v6 = vpop.xlane.xlu1 %2652  ;;  %v2644_v49 = vpop.xlane.xlu0 %2643 }
 0x6bd   :  { %v14797_v10 = vpop.eup %14796  ;;  %14802 = vrcp.f32 %v2653_v6 }
 0x6be   :  { %14804 = vrcp.f32 %v2644_v49  ;;  %v2669_v11 = vmul.f32 %v14797_v10, %v15846_v7 }
 0x6c0   :  { %v2659_v16 = vpop.xlane.xlu1 %2658  ;;  %v2650_v0 = vpop.xlane.xlu0 %2649  ;;  %14017 = vmatmul.mubr.msk.f32.vlgmr.msra.gmra.mxu1 %vm606_vm2, %v2669_v11 }
 0x6c1   :  { %14806 = vrcp.f32 %v2659_v16  ;;  %14025 = vmatpush3.msra.mxu1 %v2909_v44  ;;  %14026 = vmatprep.mubr.msk.f32.mxu1 %vm15183_vm1, %v17902_v60 }
 0x6c2   :  { %v14799_v19 = vpop.eup %14798  ;;  %14808 = vrcp.f32 %v2650_v0  ;;  %14034 = vmatprep.subr.mxu1 %v17902_v60 }
 0x6c3   :  { %v2668_v32 = vmul.f32 %v14799_v19, %v15851_v55 }
 0x6c4   :  { %v2656_v12 = vpop.xlane.xlu0 %2655  ;;  %v3527_v9 = vpop.permute.xlu1 %3526 }
 0x6c5   :  { %14810 = vrcp.f32 %v2656_v12  ;;  %14012 = vmatmul.mubr.msk.f32.vlgmr.msra.gmra.mxu0 %vm606_vm2, %v2668_v32 }
 0x6c6   :  { %v14801_v7 = vpop.eup %14800  ;;  %14020 = vmatpush3.msra.mxu0 %v2832_v35  ;;  %14021 = vmatprep.mubr.msk.f32.mxu0 %vm15183_vm1, %v17902_v60 }
 0x6c7   :  { %v2671_v44 = vmul.f32 %v14801_v7, %v15855_v62  ;;  %14029 = vmatprep.subr.mxu0 %v17902_v60 }
 0x6c8   :  { %v3449_v49 = vpop.permute.xlu0 %3448  ;;  %v3685_v10 = vpop.permute.xlu1 %3684 }
 0x6c9   :  { %14027 = vmatmul.mubr.msk.f32.vlgmr.msra.gmra.mxu1 %vm606_vm2, %v2671_v44 }
 0x6ca   :  { %v14803_v1 = vpop.eup %14802  ;;  %14035 = vmatpush3.msra.mxu1 %v3063_v21  ;;  %14036 = vmatprep.mubr.msk.f32.mxu1 %vm15183_vm1, %v17902_v60 }
 0x6cb   :  { %v14805_v55 = vpop.eup %14804  ;;  %14044 = vmatprep.subr.mxu1 %v17902_v60  ;;  %v2673_v35 = vmul.f32 %v14803_v1, %v15860_v41 }
 0x6cc   :  { %v2670_v6 = vmul.f32 %v14805_v55, %v15862_v4 }
 0x6cd   :  { %14037 = vmatmul.mubr.msk.f32.vlgmr.msra.gmra.mxu1 %vm606_vm2, %v2673_v35 }
 0x6ce   :  { %v14807_v62 = vpop.eup %14806  ;;  %14022 = vmatmul.mubr.msk.f32.vlgmr.msra.gmra.mxu0 %vm606_vm2, %v2670_v6  ;;  %14045 = vmatpush3.msra.mxu1 %v3217_v56  ;;  %v3683_v56 = vpop.permute.xlu1 %3682 }
 0x6cf   :  { %v14809_v11 = vpop.eup %14808  ;;  %14030 = vmatpush3.msra.mxu0 %v2986_v50  ;;  %14046 = vmatprep.mubr.msk.f32.mxu1 %vm15183_vm1, %v17902_v60  ;;  %v2675_v21 = vmul.f32 %v14807_v62, %v15868_v14  ;;  %v3607_v50 = vpop.permute.xlu0 %3606 }
 0x6d0   :  { %14054 = vmatprep.subr.mxu1 %v17902_v60  ;;  %14031 = vmatprep.mubr.msk.f32.mxu0 %vm15183_vm1, %v17902_v60  ;;  %v2672_v41 = vmul.f32 %v14809_v11, %v15870_v34 }
 0x6d1   :  { %14039 = vmatprep.subr.mxu0 %v17902_v60  ;;  %14047 = vmatmul.mubr.msk.f32.vlgmr.msra.gmra.mxu1 %vm606_vm2, %v2675_v21 }
 0x6d2   :  { %v14811_v4 = vpop.eup %14810  ;;  %14032 = vmatmul.mubr.msk.f32.vlgmr.msra.gmra.mxu0 %vm606_vm2, %v2672_v41  ;;  %14055 = vmatpush3.xpose.msk.msra.mxu1 %vm606_vm2, %v3373_v46 }
 0x6d3   :  { %14040 = vmatpush3.msra.mxu0 %v15900_v37  ;;  %14056 = vmatprep.mubr.msk.f32.mxu1 %vm15183_vm1, %v17902_v60  ;;  %v2674_v14 = vmul.f32 %v14811_v4, %v15876_v22  ;;  %v3605_v34 = vpop.permute.xlu0 %3604  ;;  %v3841_v22 = vpop.permute.xlu1 %3840 }
 0x6d4   :  { %14064 = vmatprep.subr.mxu1 %v17902_v60  ;;  %14041 = vmatprep.mubr.msk.f32.mxu0 %vm15183_vm1, %v17902_v60 }
 0x6d5   :  { %14049 = vmatprep.subr.mxu0 %v17902_v60  ;;  %14057 = vmatmul.mubr.msk.f32.vlgmr.msra.gmra.mxu1 %vm606_vm2, %v15904_v61 }
 0x6d6   :  { %14042 = vmatmul.mubr.msk.f32.vlgmr.msra.gmra.mxu0 %vm606_vm2, %v2674_v14  ;;  %14065 = vmatpush3.xpose.msk.msra.mxu1 %vm606_vm2, %v15908_v39 }
 0x6d7   :  { %14050 = vmatpush3.xpose.msk.msra.mxu0 %vm606_vm2, %v15902_v29  ;;  %14051 = vmatprep.mubr.msk.f32.mxu0 %vm15183_vm1, %v17902_v60  ;;  %v3763_v37 = vpop.permute.xlu0 %3762  ;;  %v3839_v46 = vpop.permute.xlu1 %3838 }
 0x6d8   :  { %14059 = vmatprep.subr.mxu0 %v17902_v60  ;;  %14066 = vmatprep.mubr.msk.f32.mxu1 %vm15183_vm1, %v17902_v60 }
 0x6d9   :  { %14074 = vmatprep.subr.mxu1 %v17902_v60  ;;  %14067 = vmatmul.mubr.msk.f32.vlgmr.msra.gmra.mxu1 %vm606_vm2, %v3527_v9 }
 0x6da   :  { %14052 = vmatmul.mubr.msk.f32.vlgmr.msra.gmra.mxu0 %vm606_vm2, %v15906_v17  ;;  %14075 = vmatpush3.xpose.msk.msra.mxu1 %vm606_vm2, %v3685_v10 }
 0x6db   :  { %14060 = vmatpush3.xpose.msk.msra.mxu0 %vm606_vm2, %v15910_v58  ;;  %14061 = vmatprep.mubr.msk.f32.mxu0 %vm15183_vm1, %v17902_v60  ;;  %v3761_v29 = vpop.permute.xlu0 %3760 }
 0x6dc   :  { %14069 = vmatprep.subr.mxu0 %v17902_v60  ;;  %14076 = vmatprep.mubr.msk.f32.mxu1 %vm15183_vm1, %v17902_v60 }
 0x6dd   :  { %14084 = vmatprep.subr.mxu1 %v17902_v60  ;;  %14077 = vmatmul.mubr.msk.f32.vlgmr.msra.gmra.mxu1 %vm606_vm2, %v3683_v56 }
 0x6de   :  { %14062 = vmatmul.mubr.msk.f32.vlgmr.msra.gmra.mxu0 %vm606_vm2, %v3449_v49  ;;  %14085 = vmatpush3.xpose.msk.msra.mxu1 %vm606_vm2, %v3841_v22 }
 0x6df   :  { %14070 = vmatpush3.xpose.msk.msra.mxu0 %vm606_vm2, %v3607_v50  ;;  %14071 = vmatprep.mubr.msk.f32.mxu0 %vm15183_vm1, %v17902_v60 }
 0x6e0   :  { %14079 = vmatprep.subr.mxu0 %v17902_v60  ;;  %14086 = vmatprep.mubr.msk.f32.mxu1 %vm15183_vm1, %v17902_v60 }
 0x6e1   :  { %14087 = vmatmul.mubr.msk.f32.vlgmr.msra.gmra.mxu1 %vm606_vm2, %v3839_v46  ;;  %14094 = vmatprep.subr.mxu1 %v17902_v60 }
 0x6e2   :  { %14072 = vmatmul.mubr.msk.f32.vlgmr.msra.gmra.mxu0 %vm606_vm2, %v3605_v34  ;;  %14096 = vmatprep.mubr.msk.f32.mxu1 %vm15183_vm1, %v17902_v60 }
 0x6e3   :  { %14080 = vmatpush3.xpose.msk.msra.mxu0 %vm606_vm2, %v3763_v37  ;;  %14081 = vmatprep.mubr.msk.f32.mxu0 %vm15183_vm1, %v17902_v60 }
 0x6e4   :  { %14089 = vmatprep.subr.mxu0 %v17902_v60 }
 0x6e6   :  { %14082 = vmatmul.mubr.msk.f32.vlgmr.msra.gmra.mxu0 %vm606_vm2, %v3761_v29 }
 0x6e7   :  { %14091 = vmatprep.mubr.msk.f32.mxu0 %vm15183_vm1, %v17902_v60 }
 0x780   :  { %v15996_v61 = vpop.f32.mrf.mxu1 }
 0x782   :  { %v14018_v17 = vpop.f32.mrf.mxu1 }
 0x785   :  { %v15998_v39 = vpop.f32.mrf.mxu0 }
 0x787   :  { %v14013_v58 = vpop.f32.mrf.mxu0 }
 0x789   :  { %v16000_v16 = vpop.f32.mrf.mxu1 }
 0x78b   :  { %v14028_v0 = vpop.f32.mrf.mxu1 }
 0x78d   :  { %v16002_v19 = vpop.f32.mrf.mxu1 }
 0x78e   :  { %v16004_v32 = vpop.f32.mrf.mxu0 }
 0x78f   :  { %v14038_v12 = vpop.f32.mrf.mxu1 }
 0x790   :  { %v14023_v7 = vpop.f32.mrf.mxu0 }
 0x791   :  { %v16006_v44 = vpop.f32.mrf.mxu1 }
 0x792   :  { %v16008_v9 = vpop.f32.mrf.mxu0 }
 0x793   :  { %v14048_v1 = vpop.f32.mrf.mxu1 }
 0x794   :  { %v14033_v55 = vpop.f32.mrf.mxu0 }
 0x795   :  { %v3444_v35 = vpop.f32.mrf.mxu1 }
 0x796   :  { %v16010_v6 = vpop.f32.mrf.mxu0  ;;  %v3917_v49 = vmul.f32 0.35355338, %v3444_v35 }
 0x797   :  { %v14058_v62 = vpop.f32.mrf.mxu1 }
 0x798   :  { %v3925_v10 = vadd.f32 %v3917_v49, %v15568_v2  ;;  %v14043_v11 = vpop.f32.mrf.mxu0 }
 0x799   :  { %v3600_v21 = vpop.f32.mrf.mxu1 }
 0x79a   :  { %v3366_v41 = vpop.f32.mrf.mxu0  ;;  %v3935_v4 = vsel %vm606_vm2, %v3925_v10, -inf  ;;  %v3919_v14 = vmul.f32 0.35355338, %v3600_v21 }
 0x79b   :  { %v3916_v50 = vmul.f32 0.35355338, %v3366_v41  ;;  %3936 = vmax.xlane.f32.xlu1 %v3935_v4  ;;  %v14068_v56 = vpop.f32.mrf.mxu1 }
 0x79c   :  { %v14053_v34 = vpop.f32.mrf.mxu0  ;;  %v3927_v12 = vadd.f32 %v3919_v14, %v15582_v26 }
 0x79d   :  { %v3756_v22 = vpop.f32.mrf.mxu1  ;;  %v3924_v37 = vadd.f32 %v3916_v50, %v15570_v5 }
 0x79e   :  { %v3522_v46 = vpop.f32.mrf.mxu0  ;;  %v3921_v29 = vmul.f32 0.35355338, %v3756_v22  ;;  %v3941_v4 = vsel %vm606_vm2, %v3927_v12, -inf }
 0x79f   :  { %v3918_v17 = vmul.f32 0.35355338, %v3522_v46  ;;  %v14078_v58 = vpop.f32.mrf.mxu1  ;;  %v3932_v0 = vsel %vm606_vm2, %v3924_v37, -inf }
 0x7a0   :  { %v3929_v7 = vadd.f32 %v3921_v29, %v15587_v47  ;;  %3933 = vmax.xlane.f32.xlu0 %v3932_v0  ;;  %v14063_v1 = vpop.f32.mrf.mxu0 }
 0x7a1   :  { %v3912_v55 = vpop.f32.mrf.mxu1  ;;  %v3926_v11 = vadd.f32 %v3918_v17, %v15584_v42 }
 0x7a2   :  { %v3678_v35 = vpop.f32.mrf.mxu0  ;;  %v3923_v49 = vmul.f32 0.35355338, %v3912_v55  ;;  %v3947_v62 = vsel %vm606_vm2, %v3929_v7, -inf }
 0x7a3   :  { %v3920_v21 = vmul.f32 0.35355338, %v3678_v35  ;;  %3948 = vmax.xlane.f32.xlu1 %v3947_v62  ;;  %v14088_v41 = vpop.f32.mrf.mxu1  ;;  %v3938_v29 = vsel %vm606_vm2, %v3926_v11, -inf }
 0x7a4   :  { %v3931_v50 = vadd.f32 %v3923_v49, %v15594_v63  ;;  %3942 = vmax.xlane.f32.xlu0 %v3941_v4  ;;  %v14073_v14 = vpop.f32.mrf.mxu0 }
 0x7a5   :  { %v3928_v22 = vadd.f32 %v3920_v21, %v15591_v59 }
 0x7a6   :  { %v3834_v56 = vpop.f32.mrf.mxu0  ;;  %v3953_v34 = vsel %vm606_vm2, %v3931_v50, -inf }
 0x7a7   :  { %v3922_v46 = vmul.f32 0.35355338, %v3834_v56  ;;  %3954 = vmax.xlane.f32.xlu1 %v3953_v34  ;;  %v3944_v0 = vsel %vm606_vm2, %v3928_v22, -inf }
 0x7a8   :  { %3939 = vmax.xlane.f32.xlu0 %v3938_v29  ;;  %v14083_v17 = vpop.f32.mrf.mxu0 }
 0x7a9   :  { %v3930_v58 = vadd.f32 %v3922_v46, %v15597_v3 }
 0x7ab   :  { %v3950_v1 = vsel %vm606_vm2, %v3930_v58, -inf }
 0x7ac   :  { %3945 = vmax.xlane.f32.xlu0 %v3944_v0 }
 0x7b0   :  { %3951 = vmax.xlane.f32.xlu0 %v3950_v1 }
 0x7b8   :  { %4096 = vrot.lane.b32.xlu1 %v15554_v53, %s15189_s13 }
 0x7bc   :  { %4172 = vrot.lane.b32.xlu1 %v15685_v38, %s15189_s13 }
 0x7c0   :  { %4248 = vrot.lane.b32.xlu1 %v15493_v36, %s15189_s13 }
 0x7c4   :  { %4400 = vrot.lane.b32.xlu1 %v15500_v40, %s15189_s13 }
 0x7c6   :  { %4020 = vrot.lane.b32.xlu0 %v15540_v51, %s15189_s13 }
 0x7c8   :  { %4552 = vrot.lane.b32.xlu1 %v15505_v43, %s15189_s13 }
 0x7ca   :  { %4324 = vrot.lane.b32.xlu0 %v15706_v48, %s15189_s13 }
 0x7cc   :  { %4708 = vrot.lane.b32.xlu1 %v15457_v13, %s15190_s22 }
 0x7ce   :  { %4476 = vrot.lane.b32.xlu0 %v15721_v8, %s15189_s13 }
 0x7d0   :  { %4706 = vrot.lane.b32.xlu1 %v15457_v13, %s15191_s23 }
 0x7d2   :  { %4630 = vrot.lane.b32.xlu0 %v15459_v15, %s15190_s22 }
 0x7d6   :  { %4628 = vrot.lane.b32.xlu0 %v15459_v15, %s15191_s23 }
 0x824   :  { %v3937_v55 = vpop.xlane.xlu1 %3936 }
 0x825   :  { %v3957_v35 = vsub.f32 %v3925_v10, %v3937_v55 }
 0x827   :  { %v3966_v49 = vmul.f32 1.442695, %v3957_v35 }
 0x829   :  { %14812 = vpow2.f32 %v3966_v49  ;;  %v3934_v62 = vpop.xlane.xlu0 %3933 }
 0x82a   :  { %v3956_v21 = vsub.f32 %v3924_v37, %v3934_v62 }
 0x82c   :  { %v3964_v41 = vmul.f32 1.442695, %v3956_v21  ;;  %v3949_v4 = vpop.xlane.xlu1 %3948 }
 0x82d   :  { %v3961_v14 = vsub.f32 %v3929_v7, %v3949_v4  ;;  %v3943_v56 = vpop.xlane.xlu0 %3942 }
 0x82e   :  { %14814 = vpow2.f32 %v3964_v41  ;;  %v3959_v34 = vsub.f32 %v3927_v12, %v3943_v56 }
 0x82f   :  { %v3974_v46 = vmul.f32 1.442695, %v3961_v14 }
 0x830   :  { %v3970_v13 = vmul.f32 1.442695, %v3959_v34  ;;  %v3955_v29 = vpop.xlane.xlu1 %3954 }
 0x831   :  { %v3963_v17 = vsub.f32 %v3931_v50, %v3955_v29  ;;  %v3940_v0 = vpop.xlane.xlu0 %3939 }
 0x832   :  { %14816 = vpow2.f32 %v3970_v13  ;;  %v3958_v1 = vsub.f32 %v3926_v11, %v3940_v0 }
 0x833   :  { %14818 = vpow2.f32 %v3974_v46  ;;  %v3978_v15 = vmul.f32 1.442695, %v3963_v17 }
 0x834   :  { %v3968_v10 = vmul.f32 1.442695, %v3958_v1  ;;  %v4097_v55 = vpop.permute.xlu1 %4096 }
 0x835   :  { %v3946_v35 = vpop.xlane.xlu0 %3945  ;;  %14095 = vmatpush3.msra.mxu1 %v4097_v55 }
 0x836   :  { %v16052_v37 = vpop.eup %14812  ;;  %14820 = vpow2.f32 %v3968_v10  ;;  %v3960_v7 = vsub.f32 %v3928_v22, %v3946_v35  ;;  %14104 = vmatprep.subr.mxu1 %v17902_v60 }
 0x837   :  { %v3983_v12 = vsel %vm606_vm2, %v16052_v37, 0.0  ;;  %14822 = vpow2.f32 %v3978_v15 }
 0x838   :  { %v3972_v50 = vmul.f32 1.442695, %v3960_v7  ;;  %3984 = vadd.xlane.f32.xlu1 %v3983_v12 }
 0x839   :  { %v3952_v49 = vpop.xlane.xlu0 %3951 }
 0x83a   :  { %14824 = vpow2.f32 %v3972_v50  ;;  %v3962_v11 = vsub.f32 %v3930_v58, %v3952_v49 }
 0x83b   :  { %v16057_v62 = vpop.eup %14814 }
 0x83c   :  { %v3976_v21 = vmul.f32 1.442695, %v3962_v11  ;;  %v3980_v41 = vsel %vm606_vm2, %v16057_v62, 0.0 }
 0x83d   :  { %3981 = vadd.xlane.f32.xlu0 %v3980_v41  ;;  %v4021_v4 = vpop.permute.xlu0 %4020 }
 0x83e   :  { %14826 = vpow2.f32 %v3976_v21  ;;  %14090 = vmatpush3.msra.mxu0 %v4021_v4 }
 0x83f   :  { %v16061_v22 = vpop.eup %14816  ;;  %14099 = vmatprep.subr.mxu0 %v17902_v60 }
 0x840   :  { %v3989_v14 = vsel %vm606_vm2, %v16061_v22, 0.0  ;;  %v16066_v56 = vpop.eup %14818 }
 0x841   :  { %3990 = vadd.xlane.f32.xlu1 %v3989_v14  ;;  %v3995_v34 = vsel %vm606_vm2, %v16066_v56, 0.0  ;;  %v4325_v10 = vpop.permute.xlu0 %4324 }
 0x843   :  { %v16068_v58 = vpop.eup %14820 }
 0x844   :  { %v3986_v46 = vsel %vm606_vm2, %v16068_v58, 0.0  ;;  %v16074_v13 = vpop.eup %14822 }
 0x845   :  { %3996 = vadd.xlane.f32.xlu1 %v3995_v34  ;;  %3987 = vadd.xlane.f32.xlu0 %v3986_v46  ;;  %v4001_v17 = vsel %vm606_vm2, %v16074_v13, 0.0  ;;  %v16110_v35 = vpop.permute.xlu0 %4476 }
 0x847   :  { %v16076_v29 = vpop.eup %14824 }
 0x848   :  { %v3992_v0 = vsel %vm606_vm2, %v16076_v29, 0.0 }
 0x849   :  { %4002 = vadd.xlane.f32.xlu1 %v4001_v17  ;;  %3993 = vadd.xlane.f32.xlu0 %v3992_v0  ;;  %v16112_v12 = vpop.permute.xlu0 %4630 }
 0x84b   :  { %v16082_v1 = vpop.eup %14826 }
 0x84c   :  { %v3998_v15 = vsel %vm606_vm2, %v16082_v1, 0.0 }
 0x84d   :  { %3999 = vadd.xlane.f32.xlu0 %v3998_v15 }
 0x85a   :  { %4864 = vrot.lane.b32.xlu1 %v15469_v23, %s15190_s22 }
 0x85e   :  { %4862 = vrot.lane.b32.xlu1 %v15469_v23, %s15191_s23  ;;  %v4173_v23 = vpop.permute.xlu1 %4172 }
 0x862   :  { %5020 = vrot.lane.b32.xlu1 %v15477_v27, %s15190_s22 }
 0x863   :  { %4786 = vrot.lane.b32.xlu0 %v15465_v18, %s15190_s22 }
 0x866   :  { %5018 = vrot.lane.b32.xlu1 %v15477_v27, %s15191_s23 }
 0x867   :  { %4784 = vrot.lane.b32.xlu0 %v15465_v18, %s15191_s23  ;;  %v4249_v18 = vpop.permute.xlu1 %4248 }
 0x86a   :  { %5176 = vrot.lane.b32.xlu1 %v15485_v33, %s15190_s22 }
 0x86b   :  { %4942 = vrot.lane.b32.xlu0 %v15471_v24, %s15190_s22  ;;  %v4401_v27 = vpop.permute.xlu1 %4400 }
 0x86e   :  { %5174 = vrot.lane.b32.xlu1 %v15485_v33, %s15191_s23 }
 0x86f   :  { %4940 = vrot.lane.b32.xlu0 %v15471_v24, %s15191_s23  ;;  %v4553_v55 = vpop.permute.xlu1 %4552  ;;  %v16116_v24 = vpop.permute.xlu0 %4628 }
 0x873   :  { %5098 = vrot.lane.b32.xlu0 %v15479_v30, %s15190_s22  ;;  %v4709_v7 = vpop.permute.xlu1 %4708 }
 0x877   :  { %5096 = vrot.lane.b32.xlu0 %v15479_v30, %s15191_s23  ;;  %v16114_v33 = vpop.permute.xlu1 %4706 }
 0x8c1   :  { %v3985_v50 = vpop.xlane.xlu1 %3984 }
 0x8c2   :  { %14828 = vrcp.f32 %v3985_v50 }
 0x8c6   :  { %v3982_v49 = vpop.xlane.xlu0 %3981 }
 0x8c7   :  { %14830 = vrcp.f32 %v3982_v49 }
 0x8ca   :  { %v3991_v11 = vpop.xlane.xlu1 %3990 }
 0x8cb   :  { %14832 = vrcp.f32 %v3991_v11 }
 0x8ce   :  { %v3997_v30 = vpop.xlane.xlu1 %3996  ;;  %v3988_v21 = vpop.xlane.xlu0 %3987 }
 0x8cf   :  { %v14829_v41 = vpop.eup %14828  ;;  %14834 = vrcp.f32 %v3997_v30 }
 0x8d0   :  { %14836 = vrcp.f32 %v3988_v21  ;;  %v4013_v4 = vmul.f32 %v14829_v41, %v16052_v37 }
 0x8d2   :  { %v4003_v14 = vpop.xlane.xlu1 %4002  ;;  %v3994_v34 = vpop.xlane.xlu0 %3993  ;;  %14097 = vmatmul.mubr.msk.f32.vlgmr.msra.gmra.mxu1 %vm606_vm2, %v4013_v4 }
 0x8d3   :  { %14838 = vrcp.f32 %v4003_v14  ;;  %14105 = vmatpush3.msra.mxu1 %v4249_v18  ;;  %14106 = vmatprep.mubr.msk.f32.mxu1 %vm15183_vm1, %v17902_v60 }
 0x8d4   :  { %v14831_v46 = vpop.eup %14830  ;;  %14840 = vrcp.f32 %v3994_v34  ;;  %14114 = vmatprep.subr.mxu1 %v17902_v60 }
 0x8d5   :  { %v4012_v17 = vmul.f32 %v14831_v46, %v16057_v62 }
 0x8d6   :  { %v4865_v0 = vpop.permute.xlu1 %4864  ;;  %v4000_v15 = vpop.xlane.xlu0 %3999 }
 0x8d7   :  { %14842 = vrcp.f32 %v4000_v15  ;;  %14092 = vmatmul.mubr.msk.f32.vlgmr.msra.gmra.mxu0 %vm606_vm2, %v4012_v17 }
 0x8d8   :  { %v14833_v37 = vpop.eup %14832  ;;  %14100 = vmatpush3.msra.mxu0 %v4173_v23  ;;  %14101 = vmatprep.mubr.msk.f32.mxu0 %vm15183_vm1, %v17902_v60 }
 0x8d9   :  { %v4015_v18 = vmul.f32 %v14833_v37, %v16061_v22  ;;  %14109 = vmatprep.subr.mxu0 %v17902_v60 }
 0x8da   :  { %v4863_v50 = vpop.permute.xlu1 %4862  ;;  %v4787_v49 = vpop.permute.xlu0 %4786 }
 0x8db   :  { %14107 = vmatmul.mubr.msk.f32.vlgmr.msra.gmra.mxu1 %vm606_vm2, %v4015_v18 }
 0x8dc   :  { %v14835_v11 = vpop.eup %14834  ;;  %14115 = vmatpush3.msra.mxu1 %v4401_v27  ;;  %14116 = vmatprep.mubr.msk.f32.mxu1 %vm15183_vm1, %v17902_v60 }
 0x8dd   :  { %v14837_v62 = vpop.eup %14836  ;;  %14124 = vmatprep.subr.mxu1 %v17902_v60  ;;  %v4017_v23 = vmul.f32 %v14835_v11, %v16066_v56 }
 0x8de   :  { %v4014_v30 = vmul.f32 %v14837_v62, %v16068_v58  ;;  %v4785_v21 = vpop.permute.xlu0 %4784  ;;  %v5021_v41 = vpop.permute.xlu1 %5020 }
 0x8df   :  { %14117 = vmatmul.mubr.msk.f32.vlgmr.msra.gmra.mxu1 %vm606_vm2, %v4017_v23 }
 0x8e0   :  { %v14839_v22 = vpop.eup %14838  ;;  %14102 = vmatmul.mubr.msk.f32.vlgmr.msra.gmra.mxu0 %vm606_vm2, %v4014_v30  ;;  %14125 = vmatpush3.msra.mxu1 %v4553_v55 }
 0x8e1   :  { %v14841_v4 = vpop.eup %14840  ;;  %14110 = vmatpush3.msra.mxu0 %v4325_v10  ;;  %14126 = vmatprep.mubr.msk.f32.mxu1 %vm15183_vm1, %v17902_v60  ;;  %v4019_v27 = vmul.f32 %v14839_v22, %v16074_v13 }
 0x8e2   :  { %14134 = vmatprep.subr.mxu1 %v17902_v60  ;;  %14111 = vmatprep.mubr.msk.f32.mxu0 %vm15183_vm1, %v17902_v60  ;;  %v4016_v56 = vmul.f32 %v14841_v4, %v16076_v29  ;;  %v4943_v10 = vpop.permute.xlu0 %4942  ;;  %v5019_v55 = vpop.permute.xlu1 %5018 }
 0x8e3   :  { %14119 = vmatprep.subr.mxu0 %v17902_v60  ;;  %14127 = vmatmul.mubr.msk.f32.vlgmr.msra.gmra.mxu1 %vm606_vm2, %v4019_v27 }
 0x8e4   :  { %v14843_v58 = vpop.eup %14842  ;;  %14112 = vmatmul.mubr.msk.f32.vlgmr.msra.gmra.mxu0 %vm606_vm2, %v4016_v56  ;;  %14135 = vmatpush3.xpose.msk.msra.mxu1 %vm606_vm2, %v4709_v7 }
 0x8e5   :  { %14120 = vmatpush3.msra.mxu0 %v16110_v35  ;;  %14136 = vmatprep.mubr.msk.f32.mxu1 %vm15183_vm1, %v17902_v60  ;;  %v4018_v13 = vmul.f32 %v14843_v58, %v16082_v1 }
 0x8e6   :  { %14144 = vmatprep.subr.mxu1 %v17902_v60  ;;  %14121 = vmatprep.mubr.msk.f32.mxu0 %vm15183_vm1, %v17902_v60  ;;  %v4941_v29 = vpop.permute.xlu0 %4940  ;;  %v5177_v1 = vpop.permute.xlu1 %5176 }
 0x8e7   :  { %14129 = vmatprep.subr.mxu0 %v17902_v60  ;;  %14137 = vmatmul.mubr.msk.f32.vlgmr.msra.gmra.mxu1 %vm606_vm2, %v16114_v33 }
 0x8e8   :  { %14122 = vmatmul.mubr.msk.f32.vlgmr.msra.gmra.mxu0 %vm606_vm2, %v4018_v13  ;;  %14145 = vmatpush3.xpose.msk.msra.mxu1 %vm606_vm2, %v4865_v0 }
 0x8e9   :  { %14130 = vmatpush3.xpose.msk.msra.mxu0 %vm606_vm2, %v16112_v12  ;;  %14146 = vmatprep.mubr.msk.f32.mxu1 %vm15183_vm1, %v17902_v60 }
 0x8ea   :  { %14154 = vmatprep.subr.mxu1 %v17902_v60  ;;  %14131 = vmatprep.mubr.msk.f32.mxu0 %vm15183_vm1, %v17902_v60  ;;  %v5099_v35 = vpop.permute.xlu0 %5098  ;;  %v5175_v7 = vpop.permute.xlu1 %5174 }
 0x8eb   :  { %14139 = vmatprep.subr.mxu0 %v17902_v60  ;;  %14147 = vmatmul.mubr.msk.f32.vlgmr.msra.gmra.mxu1 %vm606_vm2, %v4863_v50 }
 0x8ec   :  { %14132 = vmatmul.mubr.msk.f32.vlgmr.msra.gmra.mxu0 %vm606_vm2, %v16116_v24  ;;  %14155 = vmatpush3.xpose.msk.msra.mxu1 %vm606_vm2, %v5021_v41 }
 0x8ed   :  { %14140 = vmatpush3.xpose.msk.msra.mxu0 %vm606_vm2, %v4787_v49  ;;  %14141 = vmatprep.mubr.msk.f32.mxu0 %vm15183_vm1, %v17902_v60 }
 0x8ee   :  { %14149 = vmatprep.subr.mxu0 %v17902_v60  ;;  %14156 = vmatprep.mubr.msk.f32.mxu1 %vm15183_vm1, %v17902_v60  ;;  %v5097_v12 = vpop.permute.xlu0 %5096 }
 0x8ef   :  { %14164 = vmatprep.subr.mxu1 %v17902_v60  ;;  %14157 = vmatmul.mubr.msk.f32.vlgmr.msra.gmra.mxu1 %vm606_vm2, %v5019_v55 }
 0x8f0   :  { %14142 = vmatmul.mubr.msk.f32.vlgmr.msra.gmra.mxu0 %vm606_vm2, %v4785_v21  ;;  %14165 = vmatpush3.xpose.msk.msra.mxu1 %vm606_vm2, %v5177_v1 }
 0x8f1   :  { %14150 = vmatpush3.xpose.msk.msra.mxu0 %vm606_vm2, %v4943_v10  ;;  %14151 = vmatprep.mubr.msk.f32.mxu0 %vm15183_vm1, %v17902_v60 }
 0x8f2   :  { %14159 = vmatprep.subr.mxu0 %v17902_v60  ;;  %14166 = vmatprep.mubr.msk.f32.mxu1 %vm15183_vm1, %v17902_v60 }
 0x8f3   :  { %14167 = vmatmul.mubr.msk.f32.vlgmr.msra.gmra.mxu1 %vm606_vm2, %v5175_v7  ;;  %14174 = vmatprep.subr.mxu1 %v17902_v60 }
 0x8f4   :  { %14152 = vmatmul.mubr.msk.f32.vlgmr.msra.gmra.mxu0 %vm606_vm2, %v4941_v29  ;;  %14176 = vmatprep.mubr.msk.f32.mxu1 %vm15183_vm1, %v17902_v60 }
 0x8f5   :  { %14160 = vmatpush3.xpose.msk.msra.mxu0 %vm606_vm2, %v5099_v35  ;;  %14161 = vmatprep.mubr.msk.f32.mxu0 %vm15183_vm1, %v17902_v60 }
 0x8f6   :  { %14169 = vmatprep.subr.mxu0 %v17902_v60 }
 0x8f8   :  { %14162 = vmatmul.mubr.msk.f32.vlgmr.msra.gmra.mxu0 %vm606_vm2, %v5097_v12 }
 0x8f9   :  { %14171 = vmatprep.mubr.msk.f32.mxu0 %vm15183_vm1, %v17902_v60 }
 0x992   :  { %v16200_v33 = vpop.f32.mrf.mxu1 }
 0x994   :  { %v14098_v24 = vpop.f32.mrf.mxu1 }
 0x997   :  { %v16202_v14 = vpop.f32.mrf.mxu0 }
 0x999   :  { %v14093_v34 = vpop.f32.mrf.mxu0 }
 0x99b   :  { %v16204_v46 = vpop.f32.mrf.mxu1 }
 0x99d   :  { %v14108_v17 = vpop.f32.mrf.mxu1 }
 0x99f   :  { %v16206_v0 = vpop.f32.mrf.mxu1 }
 0x9a0   :  { %v16208_v15 = vpop.f32.mrf.mxu0 }
 0x9a1   :  { %v14118_v37 = vpop.f32.mrf.mxu1 }
 0x9a2   :  { %v14103_v18 = vpop.f32.mrf.mxu0 }
 0x9a3   :  { %v16210_v50 = vpop.f32.mrf.mxu1 }
 0x9a4   :  { %v16212_v49 = vpop.f32.mrf.mxu0 }
 0x9a5   :  { %v14128_v11 = vpop.f32.mrf.mxu1 }
 0x9a6   :  { %v14113_v62 = vpop.f32.mrf.mxu0 }
 0x9a7   :  { %v4780_v23 = vpop.f32.mrf.mxu1 }
 0x9a8   :  { %v16214_v30 = vpop.f32.mrf.mxu0  ;;  %v5253_v21 = vmul.f32 0.35355338, %v4780_v23 }
 0x9a9   :  { %v14138_v22 = vpop.f32.mrf.mxu1 }
 0x9aa   :  { %v5261_v41 = vadd.f32 %v5253_v21, %v15568_v2  ;;  %v14123_v4 = vpop.f32.mrf.mxu0 }
 0x9ab   :  { %v4936_v27 = vpop.f32.mrf.mxu1 }
 0x9ac   :  { %v4702_v56 = vpop.f32.mrf.mxu0  ;;  %v5271_v58 = vsel %vm606_vm2, %v5261_v41, -inf  ;;  %v5255_v13 = vmul.f32 0.35355338, %v4936_v27 }
 0x9ad   :  { %v5252_v10 = vmul.f32 0.35355338, %v4702_v56  ;;  %5272 = vmax.xlane.f32.xlu1 %v5271_v58  ;;  %v14148_v55 = vpop.f32.mrf.mxu1 }
 0x9ae   :  { %v14133_v29 = vpop.f32.mrf.mxu0  ;;  %v16220_v24 = vadd.f32 %v5255_v13, %v15582_v26 }
 0x9af   :  { %v5260_v1 = vadd.f32 %v5252_v10, %v15570_v5  ;;  %v5092_v35 = vpop.f32.mrf.mxu1 }
 0x9b0   :  { %v4858_v7 = vpop.f32.mrf.mxu0  ;;  %v5257_v12 = vmul.f32 0.35355338, %v5092_v35  ;;  %v5277_v58 = vsel %vm606_vm2, %v16220_v24, -inf }
 0x9b1   :  { %v5254_v34 = vmul.f32 0.35355338, %v4858_v7  ;;  %v14158_v17 = vpop.f32.mrf.mxu1  ;;  %v5268_v37 = vsel %vm606_vm2, %v5260_v1, -inf }
 0x9b2   :  { %v16224_v18 = vadd.f32 %v5257_v12, %v15587_v47  ;;  %5269 = vmax.xlane.f32.xlu0 %v5268_v37  ;;  %v14143_v11 = vpop.f32.mrf.mxu0 }
 0x9b3   :  { %v5248_v62 = vpop.f32.mrf.mxu1  ;;  %v5262_v4 = vadd.f32 %v5254_v34, %v15584_v42 }
 0x9b4   :  { %v5014_v23 = vpop.f32.mrf.mxu0  ;;  %v5259_v21 = vmul.f32 0.35355338, %v5248_v62  ;;  %v5283_v22 = vsel %vm606_vm2, %v16224_v18, -inf }
 0x9b5   :  { %v5256_v27 = vmul.f32 0.35355338, %v5014_v23  ;;  %5284 = vmax.xlane.f32.xlu1 %v5283_v22  ;;  %v14168_v56 = vpop.f32.mrf.mxu1  ;;  %v5274_v12 = vsel %vm606_vm2, %v5262_v4, -inf }
 0x9b6   :  { %v5267_v10 = vadd.f32 %v5259_v21, %v15594_v63  ;;  %5278 = vmax.xlane.f32.xlu0 %v5277_v58  ;;  %v14153_v13 = vpop.f32.mrf.mxu0 }
 0x9b7   :  { %v5264_v35 = vadd.f32 %v5256_v27, %v15591_v59 }
 0x9b8   :  { %v5170_v55 = vpop.f32.mrf.mxu0  ;;  %v5289_v29 = vsel %vm606_vm2, %v5267_v10, -inf }
 0x9b9   :  { %v5258_v7 = vmul.f32 0.35355338, %v5170_v55  ;;  %5290 = vmax.xlane.f32.xlu1 %v5289_v29  ;;  %v5280_v37 = vsel %vm606_vm2, %v5264_v35, -inf }
 0x9ba   :  { %5275 = vmax.xlane.f32.xlu0 %v5274_v12  ;;  %v14163_v34 = vpop.f32.mrf.mxu0 }
 0x9bb   :  { %v5266_v17 = vadd.f32 %v5258_v7, %v15597_v3 }
 0x9bd   :  { %v5286_v11 = vsel %vm606_vm2, %v5266_v17, -inf }
 0x9be   :  { %5281 = vmax.xlane.f32.xlu0 %v5280_v37 }
 0x9c2   :  { %5287 = vmax.xlane.f32.xlu0 %v5286_v11 }
 0x9ca   :  { %5432 = vrot.lane.b32.xlu1 %v15554_v53, %s15191_s23 }
 0x9ce   :  { %5508 = vrot.lane.b32.xlu1 %v15685_v38, %s15191_s23 }
 0x9d2   :  { %5584 = vrot.lane.b32.xlu1 %v15493_v36, %s15191_s23 }
 0x9d8   :  { %5356 = vrot.lane.b32.xlu0 %v15540_v51, %s15191_s23 }
 0xa36   :  { %v5273_v62 = vpop.xlane.xlu1 %5272 }
 0xa37   :  { %v5293_v23 = vsub.f32 %v5261_v41, %v5273_v62 }
 0xa39   :  { %v5302_v21 = vmul.f32 1.442695, %v5293_v23 }
 0xa3b   :  { %14844 = vpow2.f32 %v5302_v21  ;;  %v5270_v22 = vpop.xlane.xlu0 %5269 }
 0xa3c   :  { %v5292_v27 = vsub.f32 %v5260_v1, %v5270_v22 }
 0xa3e   :  { %v5300_v56 = vmul.f32 1.442695, %v5292_v27  ;;  %v5285_v58 = vpop.xlane.xlu1 %5284 }
 0xa3f   :  { %v5279_v13 = vpop.xlane.xlu0 %5278  ;;  %v5297_v37 = vsub.f32 %v16224_v18, %v5285_v58 }
 0xa40   :  { %14846 = vpow2.f32 %v5300_v56  ;;  %v5295_v34 = vsub.f32 %v16220_v24, %v5279_v13 }
 0xa41   :  { %v5310_v23 = vmul.f32 1.442695, %v5297_v37 }
 0xa42   :  { %v5291_v53 = vpop.xlane.xlu1 %5290  ;;  %v5306_v11 = vmul.f32 1.442695, %v5295_v34 }
 0xa43   :  { %v5276_v55 = vpop.xlane.xlu0 %5275  ;;  %v5299_v21 = vsub.f32 %v5267_v10, %v5291_v53 }
 0xa44   :  { %v5294_v62 = vsub.f32 %v5262_v4, %v5276_v55  ;;  %14848 = vpow2.f32 %v5306_v11 }
 0xa45   :  { %14850 = vpow2.f32 %v5310_v23  ;;  %v5314_v56 = vmul.f32 1.442695, %v5299_v21 }
 0xa46   :  { %v5433_v29 = vpop.permute.xlu1 %5432  ;;  %v5304_v22 = vmul.f32 1.442695, %v5294_v62 }
 0xa47   :  { %v5282_v38 = vpop.xlane.xlu0 %5281  ;;  %14175 = vmatpush3.msra.mxu1 %v5433_v29 }
 0xa48   :  { %v16246_v7 = vpop.eup %14844  ;;  %14184 = vmatprep.subr.mxu1 %v17902_v60  ;;  %v5296_v27 = vsub.f32 %v5264_v35, %v5282_v38  ;;  %14852 = vpow2.f32 %v5304_v22 }
 0xa49   :  { %v5319_v36 = vsel %vm606_vm2, %v16246_v7, 0.0  ;;  %14854 = vpow2.f32 %v5314_v56 }
 0xa4a   :  { %5320 = vadd.xlane.f32.xlu1 %v5319_v36  ;;  %v5308_v29 = vmul.f32 1.442695, %v5296_v27 }
 0xa4b   :  { %v5288_v51 = vpop.xlane.xlu0 %5287 }
 0xa4c   :  { %v5298_v36 = vsub.f32 %v5266_v17, %v5288_v51  ;;  %14856 = vpow2.f32 %v5308_v29 }
 0xa4d   :  { %v16251_v41 = vpop.eup %14846 }
 0xa4e   :  { %v5316_v1 = vsel %vm606_vm2, %v16251_v41, 0.0 }
 0xa4f   :  { %5317 = vadd.xlane.f32.xlu0 %v5316_v1  ;;  %v5357_v12 = vpop.permute.xlu0 %5356 }
 0xa50   :  { %14170 = vmatpush3.msra.mxu0 %v5357_v12 }
 0xa51   :  { %14179 = vmatprep.subr.mxu0 %v17902_v60 }
 0xa5b   :  { %5736 = vrot.lane.b32.xlu1 %v15500_v40, %s15191_s23  ;;  %v5312_v40 = vmul.f32 1.442695, %v5298_v36 }
 0xa5d   :  { %14858 = vpow2.f32 %v5312_v40  ;;  %v6089_v40 = vld [vmem:[#allocation7 + $0x18] sm:$0xff] }
 0xa65   :  { %5660 = vrot.lane.b32.xlu0 %v15706_v48, %s15191_s23  ;;  %v16262_v48 = vpop.eup %14848 }
 0xa66   :  { %v5325_v24 = vsel %vm606_vm2, %v16262_v48, 0.0  ;;  %v16266_v18 = vpop.eup %14850 }
 0xa67   :  { %v16268_v4 = vpop.eup %14852  ;;  %v5331_v10 = vsel %vm606_vm2, %v16266_v18, 0.0 }
 0xa68   :  { %v16272_v35 = vpop.eup %14854  ;;  %v5322_v17 = vsel %vm606_vm2, %v16268_v4, 0.0 }
 0xa69   :  { %v16276_v58 = vpop.eup %14856  ;;  %v5337_v13 = vsel %vm606_vm2, %v16272_v35, 0.0 }
 0xa6a   :  { %v5328_v53 = vsel %vm606_vm2, %v16276_v58, 0.0  ;;  %v16282_v55 = vpop.eup %14858 }
 0xa6b   :  { %v5334_v38 = vsel %vm606_vm2, %v16282_v55, 0.0 }
 0xa7f   :  { %5326 = vadd.xlane.f32.xlu1 %v5325_v24  ;;  %v6087_v24 = vld [vmem:[#allocation7 + $0x8] sm:$0xff] }
 0xa83   :  { %5332 = vadd.xlane.f32.xlu1 %v5331_v10 }
 0xa84   :  { %5323 = vadd.xlane.f32.xlu0 %v5322_v17 }
 0xa87   :  { %5338 = vadd.xlane.f32.xlu1 %v5337_v13 }
 0xa88   :  { %5329 = vadd.xlane.f32.xlu0 %v5328_v53 }
 0xa8c   :  { %5335 = vadd.xlane.f32.xlu0 %v5334_v38 }
 0xa98   :  { %5888 = vrot.lane.b32.xlu1 %v15505_v43, %s15191_s23  ;;  %v5509_v43 = vpop.permute.xlu1 %5508 }
 0xa9c   :  { %5974 = vrot.lane.b32.xlu1 %v15996_v61, %s15178_s28 }
 0xaa0   :  { %6006 = vrot.lane.b32.xlu1 %v16200_v33, %s15192_s7 }
 0xaa2   :  { %5812 = vrot.lane.b32.xlu0 %v15721_v8, %s15191_s23  ;;  %v5585_v8 = vpop.permute.xlu1 %5584 }
 0xaa4   :  { %5978 = vrot.lane.b32.xlu1 %v16000_v16, %s15178_s28 }
 0xaa6   :  { %5972 = vrot.lane.b32.xlu0 %v15998_v39, %s15178_s28 }
 0xaa8   :  { %6010 = vrot.lane.b32.xlu1 %v16204_v46, %s15192_s7 }
 0xaaa   :  { %6004 = vrot.lane.b32.xlu0 %v16202_v14, %s15192_s7 }
 0xaac   :  { %5982 = vrot.lane.b32.xlu1 %v16002_v19, %s15178_s28 }
 0xaae   :  { %5976 = vrot.lane.b32.xlu0 %v16004_v32, %s15178_s28 }
 0xab0   :  { %6014 = vrot.lane.b32.xlu1 %v16206_v0, %s15192_s7 }
 0xab2   :  { %6008 = vrot.lane.b32.xlu0 %v16208_v15, %s15192_s7 }
 0xab6   :  { %5980 = vrot.lane.b32.xlu0 %v16008_v9, %s15178_s28 }
 0xaba   :  { %6012 = vrot.lane.b32.xlu0 %v16212_v49, %s15192_s7 }
 0xad3   :  { %v5321_v61 = vpop.xlane.xlu1 %5320 }
 0xad4   :  { %14860 = vrcp.f32 %v5321_v61 }
 0xad7   :  { %v5737_v33 = vpop.permute.xlu1 %5736 }
 0xad8   :  { %v5318_v39 = vpop.xlane.xlu0 %5317 }
 0xad9   :  { %14862 = vrcp.f32 %v5318_v39 }
 0xadc   :  { %v5661_v46 = vpop.permute.xlu0 %5660 }
 0xae1   :  { %v14861_v16 = vpop.eup %14860 }
 0xae2   :  { %v5349_v19 = vmul.f32 %v14861_v16, %v16246_v7 }
 0xae4   :  { %14177 = vmatmul.mubr.msk.f32.vlgmr.msra.gmra.mxu1 %vm606_vm2, %v5349_v19 }
 0xae5   :  { %14185 = vmatpush3.msra.mxu1 %v5585_v8  ;;  %14186 = vmatprep.mubr.msk.f32.mxu1 %vm15183_vm1, %v17902_v60 }
 0xae6   :  { %v14863_v32 = vpop.eup %14862  ;;  %14194 = vmatprep.subr.mxu1 %v17902_v60 }
 0xae7   :  { %v5348_v9 = vmul.f32 %v14863_v32, %v16251_v41 }
 0xae9   :  { %14172 = vmatmul.mubr.msk.f32.vlgmr.msra.gmra.mxu0 %vm606_vm2, %v5348_v9 }
 0xaea   :  { %14180 = vmatpush3.msra.mxu0 %v5509_v43  ;;  %14181 = vmatprep.mubr.msk.f32.mxu0 %vm15183_vm1, %v17902_v60 }
 0xaeb   :  { %14189 = vmatprep.subr.mxu0 %v17902_v60 }
 0xb08   :  { %v5327_v14 = vpop.xlane.xlu1 %5326 }
 0xb09   :  { %14864 = vrcp.f32 %v5327_v14 }
 0xb0c   :  { %v5333_v0 = vpop.xlane.xlu1 %5332 }
 0xb0d   :  { %14866 = vrcp.f32 %v5333_v0  ;;  %v5324_v15 = vpop.xlane.xlu0 %5323 }
 0xb0e   :  { %14868 = vrcp.f32 %v5324_v15 }
 0xb10   :  { %v5339_v49 = vpop.xlane.xlu1 %5338 }
 0xb11   :  { %14870 = vrcp.f32 %v5339_v49  ;;  %v5330_v7 = vpop.xlane.xlu0 %5329 }
 0xb12   :  { %14872 = vrcp.f32 %v5330_v7 }
 0xb14   :  { %v5889_v62 = vpop.permute.xlu1 %5888 }
 0xb15   :  { %v5336_v51 = vpop.xlane.xlu0 %5335 }
 0xb16   :  { %v14865_v41 = vpop.eup %14864  ;;  %14874 = vrcp.f32 %v5336_v51 }
 0xb17   :  { %v5351_v1 = vmul.f32 %v14865_v41, %v16262_v48  ;;  %v6088_v48 = vld [vmem:[#allocation7 + $0x10] sm:$0xff] }
 0xb19   :  { %14187 = vmatmul.mubr.msk.f32.vlgmr.msra.gmra.mxu1 %vm606_vm2, %v5351_v1  ;;  %v5813_v56 = vpop.permute.xlu0 %5812 }
 0xb1a   :  { %v14867_v12 = vpop.eup %14866  ;;  %14195 = vmatpush3.msra.mxu1 %v5737_v33  ;;  %14196 = vmatprep.mubr.msk.f32.mxu1 %vm15183_vm1, %v17902_v60 }
 0xb1b   :  { %v14869_v34 = vpop.eup %14868  ;;  %14204 = vmatprep.subr.mxu1 %v17902_v60  ;;  %v5353_v37 = vmul.f32 %v14867_v12, %v16266_v18  ;;  %v6086_v18 = vld [vmem:[#allocation7] sm:$0xff] }
 0xb1c   :  { %v5350_v11 = vmul.f32 %v14869_v34, %v16268_v4 }
 0xb1d   :  { %14197 = vmatmul.mubr.msk.f32.vlgmr.msra.gmra.mxu1 %vm606_vm2, %v5353_v37  ;;  %v5973_v19 = vpop.permute.xlu0 %5972 }
 0xb1e   :  { %v14871_v23 = vpop.eup %14870  ;;  %14182 = vmatmul.mubr.msk.f32.vlgmr.msra.gmra.mxu0 %vm606_vm2, %v5350_v11  ;;  %14205 = vmatpush3.msra.mxu1 %v5889_v62  ;;  %v6060_v51 = vsel %vm606_vm2, %v15784_v31, %v5973_v19 }
 0xb1f   :  { %v14873_v21 = vpop.eup %14872  ;;  %14190 = vmatpush3.msra.mxu0 %v5661_v46  ;;  %14206 = vmatprep.mubr.msk.f32.mxu1 %vm15183_vm1, %v17902_v60  ;;  %v5355_v22 = vmul.f32 %v14871_v23, %v16272_v35 }
 0xb20   :  { %14191 = vmatprep.mubr.msk.f32.mxu0 %vm15183_vm1, %v17902_v60  ;;  %14199 = vmatprep.subr.mxu0 %v17902_v60  ;;  %v5352_v27 = vmul.f32 %v14873_v21, %v16276_v58 }
 0xb21   :  { %14207 = vmatmul.mubr.msk.f32.vlgmr.msra.gmra.mxu1 %vm606_vm2, %v5355_v22  ;;  %v6005_v9 = vpop.permute.xlu0 %6004 }
 0xb22   :  { %14192 = vmatmul.mubr.msk.f32.vlgmr.msra.gmra.mxu0 %vm606_vm2, %v5352_v27  ;;  %v6069_v12 = vsel %vm6068_vm4, %v6060_v51, %v6005_v9 }
 0xb23   :  { %v14875_v29 = vpop.eup %14874  ;;  %14200 = vmatpush3.msra.mxu0 %v5813_v56  ;;  %14201 = vmatprep.mubr.msk.f32.mxu0 %vm15183_vm1, %v17902_v60 }
 0xb24   :  { %v5354_v36 = vmul.f32 %v14875_v29, %v16282_v55  ;;  %14209 = vmatprep.subr.mxu0 %v6089_v40 }
 0xb25   :  { %v5977_v14 = vpop.permute.xlu0 %5976 }
 0xb26   :  { %14202 = vmatmul.mubr.msk.f32.vlgmr.msra.gmra.mxu0 %vm606_vm2, %v5354_v36  ;;  %v6062_v22 = vsel %vm606_vm2, %v15790_v45, %v5977_v14 }
 0xb27   :  { %14210 = vmatpush3.msra.mxu0 %v6089_v40 }
 0xb28   :  { %14211 = vmatprep.subr.mxu0 %v6088_v48 }
 0xb29   :  { %14212 = vmatpush3.msra.mxu0 %v6088_v48  ;;  %v6009_v0 = vpop.permute.xlu0 %6008 }
 0xb2a   :  { %14213 = vmatprep.subr.mxu0 %v6087_v24  ;;  %v6071_v56 = vsel %vm6068_vm4, %v6062_v22, %v6009_v0 }
 0xb2b   :  { %14214 = vmatpush3.msra.mxu0 %v6087_v24 }
 0xb2c   :  { %14215 = vmatprep.subr.mxu0 %v6086_v18 }
 0xb2d   :  { %14216 = vmatpush3.msra.mxu0 %v6086_v18 }
 0xba4   :  { %v5504_v4 = vpop.f32.mrf.mxu1 }
 0xba5   :  { %6038 = vrot.lane.b32.xlu1 %v5504_v4, %s15193_s24 }
 0xba6   :  { %v14178_v10 = vpop.f32.mrf.mxu1 }
 0xba9   :  { %v5428_v35 = vpop.f32.mrf.mxu0  ;;  %5986 = vrot.lane.b32.xlu1 %v16006_v44, %s15178_s28 }
 0xbaa   :  { %6036 = vrot.lane.b32.xlu0 %v5428_v35, %s15193_s24 }
 0xbab   :  { %v14173_v17 = vpop.f32.mrf.mxu0 }
 0xbae   :  { %5984 = vrot.lane.b32.xlu0 %v16010_v6, %s15178_s28 }
 0xbd9   :  { %v5656_v58 = vpop.f32.mrf.mxu1 }
 0xbda   :  { %6042 = vrot.lane.b32.xlu1 %v5656_v58, %s15193_s24 }
 0xbdb   :  { %v14188_v13 = vpop.f32.mrf.mxu1 }
 0xbdd   :  { %v5808_v53 = vpop.f32.mrf.mxu1 }
 0xbde   :  { %v5580_v55 = vpop.f32.mrf.mxu0  ;;  %6018 = vrot.lane.b32.xlu1 %v16210_v50, %s15192_s7  ;;  %v5975_v50 = vpop.permute.xlu1 %5974 }
 0xbdf   :  { %6040 = vrot.lane.b32.xlu0 %v5580_v55, %s15193_s24  ;;  %v14198_v38 = vpop.f32.mrf.mxu1  ;;  %v6061_v1 = vsel %vm606_vm2, %v15782_v25, %v5975_v50  ;;  %v15053_v50 = vld [vmem:[%s17913_s18] sm:$0xff] }
 0xbe0   :  { %v14183_v43 = vpop.f32.mrf.mxu0 }
 0xbe1   :  { %v5960_v44 = vpop.f32.mrf.mxu1 }
 0xbe2   :  { %v5732_v8 = vpop.f32.mrf.mxu0  ;;  %6046 = vrot.lane.b32.xlu1 %v5808_v53, %s15193_s24  ;;  %v6007_v32 = vpop.permute.xlu1 %6006 }
 0xbe3   :  { %6016 = vrot.lane.b32.xlu0 %v16214_v30, %s15192_s7  ;;  %v14208_v6 = vpop.f32.mrf.mxu1  ;;  %v5981_v30 = vpop.permute.xlu0 %5980  ;;  %v6070_v37 = vsel %vm6068_vm4, %v6061_v1, %v6007_v32 }
 0xbe4   :  { %v14193_v61 = vpop.f32.mrf.mxu0  ;;  %v6064_v45 = vsel %vm606_vm2, %v15794_v54, %v5981_v30 }
 0xbe5   :  { %v15052_v61 = vld [vmem:[%s17913_s18 + $0x8] sm:$0xff] }
 0xbe6   :  { %v5884_v39 = vpop.f32.mrf.mxu0  ;;  %6050 = vrot.lane.b32.xlu1 %v5960_v44, %s15193_s24  ;;  %v5979_v33 = vpop.permute.xlu1 %5978 }
 0xbe7   :  { %6044 = vrot.lane.b32.xlu0 %v5732_v8, %s15193_s24  ;;  %v6013_v7 = vpop.permute.xlu0 %6012  ;;  %v6063_v27 = vsel %vm606_vm2, %v15786_v20, %v5979_v33 }
 0xbe8   :  { %v14203_v16 = vpop.f32.mrf.mxu0  ;;  %v6073_v4 = vsel %vm6068_vm4, %v6064_v45, %v6013_v7 }
 0xbea   :  { %v6011_v46 = vpop.permute.xlu1 %6010 }
 0xbeb   :  { %6048 = vrot.lane.b32.xlu0 %v5884_v39, %s15193_s24  ;;  %v6072_v36 = vsel %vm6068_vm4, %v6063_v27, %v6011_v46 }
 0xbee   :  { %v5983_v15 = vpop.permute.xlu1 %5982 }
 0xbef   :  { %v6065_v20 = vsel %vm606_vm2, %v15788_v28, %v5983_v15  ;;  %v15054_v15 = vld [vmem:[%s17913_s18 + $0x10] sm:$0xff] }
 0xbf2   :  { %v6015_v49 = vpop.permute.xlu1 %6014 }
 0xbf3   :  { %v6074_v35 = vsel %vm6068_vm4, %v6065_v20, %v6015_v49  ;;  %v15055_v49 = vld [vmem:[%s17913_s18 + $0x18] sm:$0xff] }
 0xc17   :  { %v6039_v41 = vpop.permute.xlu1 %6038 }
 0xc18   :  { %v6079_v62 = vsel %vm6077_vm5, %v6070_v37, %v6039_v41 }
 0xc1b   :  { %v5987_v23 = vpop.permute.xlu1 %5986 }
 0xc1c   :  { %v6037_v34 = vpop.permute.xlu0 %6036  ;;  %v6067_v28 = vsel %vm606_vm2, %v15792_v52, %v5987_v23 }
 0xc1d   :  { %v6078_v11 = vsel %vm6077_vm5, %v6069_v12, %v6037_v34  ;;  %v15056_v34 = vld [vmem:[%s17913_s18 + $0x28] sm:$0xff] }
 0xc1e   :  { %14217 = vmatprep.mubr.msk.f32.mxu0 %vm181_vm0, %v6078_v11 }
 0xc1f   :  { %14218 = vmatmul.mubr.msk.f32.vlgmr.msra.gmra.mxu0 %vm181_vm0, %v6079_v62 }
 0xc20   :  { %v5985_v21 = vpop.permute.xlu0 %5984 }
 0xc21   :  { %v6066_v13 = vsel %vm606_vm2, %v15796_v57, %v5985_v21  ;;  %v13270_v57 = vld [vmem:[%s17891_s10] ss:$0 sm:$0xff] }
 0xc4c   :  { %v6043_v31 = vpop.permute.xlu1 %6042 }
 0xc4d   :  { %v6081_v48 = vsel %vm6077_vm5, %v6072_v36, %v6043_v31  ;;  %v15057_v31 = vld [vmem:[%s17913_s18 + $0x20] sm:$0xff] }
 0xc50   :  { %v6019_v25 = vpop.permute.xlu1 %6018 }
 0xc51   :  { %v6041_v29 = vpop.permute.xlu0 %6040  ;;  %v6076_v38 = vsel %vm6068_vm4, %v6067_v28, %v6019_v25 }
 0xc52   :  { %v6080_v40 = vsel %vm6077_vm5, %v6071_v56, %v6041_v29  ;;  %v15058_v56 = vld [vmem:[%s17913_s18 + $0x38] sm:$0xff] }
 0xc53   :  { %14220 = vmatprep.mubr.msk.f32.mxu0 %vm181_vm0, %v6080_v40 }
 0xc54   :  { %14221 = vmatmul.mubr.msk.f32.gmra.mxu0 %vm181_vm0, %v6081_v48  ;;  %v6047_v18 = vpop.permute.xlu1 %6046  ;;  %v15059_v48 = vld [vmem:[%s17913_s18 + $0x30] sm:$0xff] }
 0xc55   :  { %v6017_v24 = vpop.permute.xlu0 %6016  ;;  %v6083_v58 = vsel %vm6077_vm5, %v6074_v35, %v6047_v18 }
 0xc56   :  { %v6075_v54 = vsel %vm6068_vm4, %v6066_v13, %v6017_v24 }
 0xc58   :  { %v6051_v53 = vpop.permute.xlu1 %6050 }
 0xc59   :  { %v6045_v10 = vpop.permute.xlu0 %6044  ;;  %v6085_v44 = vsel %vm6077_vm5, %v6076_v38, %v6051_v53  ;;  %v6370_v38 = vld [vmem:[#allocation8 + $0x10] sm:$0xff] }
 0xc5a   :  { %v6082_v17 = vsel %vm6077_vm5, %v6073_v4, %v6045_v10 }
 0xc5b   :  { %14223 = vmatprep.mubr.msk.f32.mxu0 %vm181_vm0, %v6082_v17 }
 0xc5c   :  { %14224 = vmatmul.mubr.msk.f32.gmra.mxu0 %vm181_vm0, %v6083_v58 }
 0xc5d   :  { %v6049_v55 = vpop.permute.xlu0 %6048 }
 0xc5e   :  { %v6084_v43 = vsel %vm6077_vm5, %v6075_v54, %v6049_v55  ;;  %v6371_v55 = vld [vmem:[#allocation8 + $0x18] sm:$0xff] }
 0xc5f   :  { %14226 = vmatprep.mubr.msk.f32.mxu0 %vm181_vm0, %v6084_v43  ;;  %14229 = vmatprep.subr.mxu1 %v6371_v55  ;;  %v6369_v43 = vld [vmem:[#allocation8 + $0x8] sm:$0xff] }
 0xc60   :  { %14227 = vmatmul.mubr.msk.f32.gmra.mxu0 %vm181_vm0, %v6085_v44  ;;  %14230 = vmatpush3.msra.mxu1 %v6371_v55  ;;  %v6368_v44 = vld [vmem:[#allocation8] sm:$0xff]  ;;  %v13279_v55 = vld [vmem:[%s17892_s11] ss:$0 sm:$0xff] }
 0xc61   :  { %14231 = vmatprep.subr.mxu1 %v6370_v38 }
 0xc62   :  { %14232 = vmatpush3.msra.mxu1 %v6370_v38 }
 0xc63   :  { %14233 = vmatprep.subr.mxu1 %v6369_v43 }
 0xc64   :  { %14234 = vmatpush3.msra.mxu1 %v6369_v43 }
 0xc65   :  { %14235 = vmatprep.subr.mxu1 %v6368_v44 }
 0xc66   :  { %14236 = vmatpush3.msra.mxu1 %v6368_v44 }
 0xcdf   :  { %v14219_v8 = vpop.f32.mrf.mxu0 }
 0xce0   :  { %v6193_v6 = vadd.f32 %v14219_v8, %v13270_v57 }
 0xce1   :  { %v6187_v52 = vpop.f32.mrf.mxu0 }
 0xce2   :  { %v16408_v39 = vadd.f32 %v15052_v61, %v6193_v6  ;;  %v6188_v16 = vadd.f32 %v13270_v57, %v6187_v52 }
 0xce4   :  { %v16413_v19 = vadd.f32 %v15053_v50, %v6188_v16  ;;  %v6239_v32 = vsel %vm181_vm0, %v16408_v39, 0.0 }
 0xce5   :  { %6240 = vadd.xlane.f32.xlu1 %v6239_v32 }
 0xce6   :  { %v6236_v9 = vsel %vm181_vm0, %v16413_v19, 0.0 }
 0xce7   :  { %6237 = vadd.xlane.f32.xlu0 %v6236_v9 }
 0xd14   :  { %v14222_v33 = vpop.f32.mrf.mxu0 }
 0xd15   :  { %v6203_v46 = vadd.f32 %v14222_v33, %v13270_v57 }
 0xd16   :  { %v6197_v14 = vpop.f32.mrf.mxu0 }
 0xd17   :  { %v6198_v0 = vadd.f32 %v13270_v57, %v6197_v14  ;;  %v16427_v7 = vadd.f32 %v15055_v49, %v6203_v46 }
 0xd19   :  { %v16422_v30 = vadd.f32 %v15054_v15, %v6198_v0  ;;  %v6245_v62 = vsel %vm181_vm0, %v16427_v7, 0.0 }
 0xd1b   :  { %v6242_v51 = vsel %vm181_vm0, %v16422_v30, 0.0 }
 0xd1c   :  { %6243 = vadd.xlane.f32.xlu0 %v6242_v51  ;;  %v14225_v41 = vpop.f32.mrf.mxu0 }
 0xd1d   :  { %v6213_v1 = vadd.f32 %v14225_v41, %v13270_v57 }
 0xd1e   :  { %v6207_v12 = vpop.f32.mrf.mxu0 }
 0xd1f   :  { %v16434_v37 = vadd.f32 %v15056_v34, %v6213_v1  ;;  %v6208_v11 = vadd.f32 %v13270_v57, %v6207_v12 }
 0xd20   :  { %6246 = vadd.xlane.f32.xlu0 %v6245_v62  ;;  %v14228_v23 = vpop.f32.mrf.mxu0 }
 0xd21   :  { %v16441_v21 = vadd.f32 %v15057_v31, %v6208_v11  ;;  %v6223_v22 = vadd.f32 %v14228_v23, %v13270_v57  ;;  %v6251_v25 = vsel %vm181_vm0, %v16434_v37, 0.0 }
 0xd22   :  { %6252 = vadd.xlane.f32.xlu1 %v6251_v25  ;;  %v6217_v27 = vpop.f32.mrf.mxu0 }
 0xd23   :  { %v16448_v29 = vadd.f32 %v15058_v56, %v6223_v22  ;;  %v6218_v36 = vadd.f32 %v13270_v57, %v6217_v27  ;;  %v6248_v40 = vsel %vm181_vm0, %v16441_v21, 0.0 }
 0xd24   :  { %6249 = vadd.xlane.f32.xlu0 %v6248_v40 }
 0xd25   :  { %v16455_v24 = vadd.f32 %v15059_v48, %v6218_v36  ;;  %v6257_v18 = vsel %vm181_vm0, %v16448_v29, 0.0  ;;  %v6523_v48 = vld [vmem:[%s17896_s15 + $0x38] sm:$0xff] }
 0xd26   :  { %6258 = vadd.xlane.f32.xlu1 %v6257_v18  ;;  %v6522_v18 = vld [vmem:[%s17896_s15 + $0x30] sm:$0xff]  ;;  %14249 = vmatprep.subr.mxu0 %v6523_v48 }
 0xd27   :  { %v6254_v45 = vsel %vm181_vm0, %v16455_v24, 0.0  ;;  %14250 = vmatpush3.msra.mxu0 %v6523_v48 }
 0xd28   :  { %6255 = vadd.xlane.f32.xlu0 %v6254_v45  ;;  %v6521_v45 = vld [vmem:[%s17896_s15 + $0x28] sm:$0xff]  ;;  %14251 = vmatprep.subr.mxu0 %v6522_v18 }
 0xd29   :  { %14252 = vmatpush3.msra.mxu0 %v6522_v18 }
 0xd2a   :  { %14253 = vmatprep.subr.mxu0 %v6521_v45 }
 0xd2b   :  { %14254 = vmatpush3.msra.mxu0 %v6521_v45 }
 0xd6e   :  { %v6241_v20 = vpop.xlane.xlu1 %6240 }
 0xd6f   :  { %v6261_v4 = vmul.f32 0.03125, %v6241_v20  ;;  %v6520_v20 = vld [vmem:[%s17896_s15 + $0x20] sm:$0xff] }
 0xd70   :  { %v6238_v10 = vpop.xlane.xlu0 %6237  ;;  %14255 = vmatprep.subr.mxu0 %v6520_v20 }
 0xd71   :  { %v16462_v35 = vsub.f32 %v16408_v39, %v6261_v4  ;;  %v6260_v17 = vmul.f32 0.03125, %v6238_v10  ;;  %14256 = vmatpush3.msra.mxu0 %v6520_v20 }
 0xd73   :  { %v16465_v58 = vsub.f32 %v16413_v19, %v6260_v17  ;;  %v6277_v13 = vmul.f32 %v16462_v35, %v16462_v35 }
 0xd75   :  { %v6287_v53 = vsel %vm181_vm0, %v6277_v13, 0.0  ;;  %v6276_v28 = vmul.f32 %v16465_v58, %v16465_v58 }
 0xd76   :  { %6288 = vadd.xlane.f32.xlu1 %v6287_v53 }
 0xd77   :  { %v6284_v54 = vsel %vm181_vm0, %v6276_v28, 0.0 }
 0xd78   :  { %6285 = vadd.xlane.f32.xlu0 %v6284_v54 }
 0xda5   :  { %v6244_v57 = vpop.xlane.xlu0 %6243 }
 0xda6   :  { %v6262_v8 = vmul.f32 0.03125, %v6244_v57 }
 0xda8   :  { %v16474_v6 = vsub.f32 %v16422_v30, %v6262_v8  ;;  %v13280_v8 = vld [vmem:[%s17893_s12] ss:$0 sm:$0xff] }
 0xda9   :  { %v6247_v52 = vpop.xlane.xlu0 %6246 }
 0xdaa   :  { %v6263_v61 = vmul.f32 0.03125, %v6247_v52  ;;  %v6278_v16 = vmul.f32 %v16474_v6, %v16474_v6 }
 0xdab   :  { %v6253_v50 = vpop.xlane.xlu1 %6252 }
 0xdac   :  { %v16479_v32 = vsub.f32 %v16427_v7, %v6263_v61  ;;  %v6265_v9 = vmul.f32 0.03125, %v6253_v50  ;;  %v6290_v33 = vsel %vm181_vm0, %v6278_v16, 0.0 }
 0xdad   :  { %6291 = vadd.xlane.f32.xlu0 %v6290_v33  ;;  %v6250_v14 = vpop.xlane.xlu0 %6249 }
 0xdae   :  { %v16483_v46 = vsub.f32 %v16434_v37, %v6265_v9  ;;  %v6264_v0 = vmul.f32 0.03125, %v6250_v14  ;;  %v6279_v15 = vmul.f32 %v16479_v32, %v16479_v32 }
 0xdaf   :  { %v6259_v49 = vpop.xlane.xlu1 %6258 }
 0xdb0   :  { %v16488_v51 = vsub.f32 %v16441_v21, %v6264_v0  ;;  %v6267_v41 = vmul.f32 0.03125, %v6259_v49  ;;  %v6293_v1 = vsel %vm181_vm0, %v6279_v15, 0.0  ;;  %v6281_v12 = vmul.f32 %v16483_v46, %v16483_v46 }
 0xdb1   :  { %6294 = vadd.xlane.f32.xlu1 %v6293_v1  ;;  %v6256_v34 = vpop.xlane.xlu0 %6255 }
 0xdb2   :  { %v16494_v11 = vsub.f32 %v16448_v29, %v6267_v41  ;;  %v6266_v62 = vmul.f32 0.03125, %v6256_v34  ;;  %v6280_v23 = vmul.f32 %v16488_v51, %v16488_v51  ;;  %v6299_v22 = vsel %vm181_vm0, %v6281_v12, 0.0 }
 0xdb4   :  { %v16499_v31 = vsub.f32 %v16455_v24, %v6266_v62  ;;  %v6296_v25 = vsel %vm181_vm0, %v6280_v23, 0.0  ;;  %v6283_v27 = vmul.f32 %v16494_v11, %v16494_v11 }
 0xdb5   :  { %6300 = vadd.xlane.f32.xlu1 %v6299_v22  ;;  %6297 = vadd.xlane.f32.xlu0 %v6296_v25 }
 0xdb6   :  { %v6282_v56 = vmul.f32 %v16499_v31, %v16499_v31  ;;  %v6305_v36 = vsel %vm181_vm0, %v6283_v27, 0.0 }
 0xdb8   :  { %v6302_v40 = vsel %vm181_vm0, %v6282_v56, 0.0 }
 0xdb9   :  { %6306 = vadd.xlane.f32.xlu1 %v6305_v36  ;;  %6303 = vadd.xlane.f32.xlu0 %v6302_v40 }
 0xdff   :  { %v6289_v4 = vpop.xlane.xlu1 %6288 }
 0xe00   :  { %v6309_v10 = vmul.f32 0.03125, %v6289_v4 }
 0xe01   :  { %v6286_v17 = vpop.xlane.xlu0 %6285 }
 0xe02   :  { %v6317_v13 = vadd.f32 1e-05, %v6309_v10  ;;  %v6308_v53 = vmul.f32 0.03125, %v6286_v17 }
 0xe04   :  { %14876 = vrsqrt.f32 %v6317_v13  ;;  %v6316_v28 = vadd.f32 1e-05, %v6308_v53 }
 0xe06   :  { %14878 = vrsqrt.f32 %v6316_v28 }
 0xe11   :  { %v14877_v54 = vpop.eup %14876 }
 0xe12   :  { %v6333_v38 = vmul.f32 %v14877_v54, %v16462_v35 }
 0xe13   :  { %v14879_v43 = vpop.eup %14878 }
 0xe14   :  { %v6332_v44 = vmul.f32 %v14879_v43, %v16465_v58  ;;  %v6347_v57 = vmul.f32 %v13279_v55, %v6333_v38 }
 0xe16   :  { %v6346_v52 = vmul.f32 %v13279_v55, %v6332_v44  ;;  %v6361_v16 = vadd.f32 %v13280_v8, %v6347_v57 }
 0xe18   :  { %v6360_v61 = vadd.f32 %v13280_v8, %v6346_v52 }
 0xe1a   :  { %14237 = vmatprep.mubr.msk.f32.mxu1 %vm181_vm0, %v6360_v61 }
 0xe1b   :  { %14238 = vmatmul.mubr.msk.f32.vlgmr.msra.gmra.mxu1 %vm181_vm0, %v6361_v16  ;;  %v6519_v16 = vld [vmem:[%s17896_s15 + $0x18] sm:$0xff] }
 0xe1c   :  { %14257 = vmatprep.subr.mxu0 %v6519_v16 }
 0xe1d   :  { %14258 = vmatpush3.msra.mxu0 %v6519_v16 }
 0xe36   :  { %v6292_v50 = vpop.xlane.xlu0 %6291 }
 0xe37   :  { %v6310_v9 = vmul.f32 0.03125, %v6292_v50 }
 0xe39   :  { %v6318_v33 = vadd.f32 1e-05, %v6310_v9 }
 0xe3a   :  { %v6295_v14 = vpop.xlane.xlu1 %6294 }
 0xe3b   :  { %14880 = vrsqrt.f32 %v6318_v33  ;;  %v6311_v35 = vmul.f32 0.03125, %v6295_v14 }
 0xe3d   :  { %v6319_v0 = vadd.f32 1e-05, %v6311_v35 }
 0xe3e   :  { %v6301_v58 = vpop.xlane.xlu1 %6300  ;;  %v6298_v15 = vpop.xlane.xlu0 %6297 }
 0xe3f   :  { %14882 = vrsqrt.f32 %v6319_v0  ;;  %v6313_v49 = vmul.f32 0.03125, %v6301_v58  ;;  %v6312_v41 = vmul.f32 0.03125, %v6298_v15 }
 0xe41   :  { %v6321_v1 = vadd.f32 1e-05, %v6313_v49  ;;  %v6320_v12 = vadd.f32 1e-05, %v6312_v41 }
 0xe42   :  { %v6307_v34 = vpop.xlane.xlu1 %6306  ;;  %v6304_v62 = vpop.xlane.xlu0 %6303 }
 0xe43   :  { %14884 = vrsqrt.f32 %v6321_v1  ;;  %v6315_v23 = vmul.f32 0.03125, %v6307_v34  ;;  %v6314_v22 = vmul.f32 0.03125, %v6304_v62 }
 0xe44   :  { %14886 = vrsqrt.f32 %v6320_v12 }
 0xe45   :  { %v6323_v25 = vadd.f32 1e-05, %v6315_v23  ;;  %v6322_v27 = vadd.f32 1e-05, %v6314_v22 }
 0xe47   :  { %14888 = vrsqrt.f32 %v6323_v25 }
 0xe48   :  { %v14881_v56 = vpop.eup %14880  ;;  %14890 = vrsqrt.f32 %v6322_v27 }
 0xe49   :  { %v6334_v36 = vmul.f32 %v14881_v56, %v16474_v6 }
 0xe4b   :  { %v6348_v40 = vmul.f32 %v13279_v55, %v6334_v36 }
 0xe4c   :  { %v14883_v48 = vpop.eup %14882 }
 0xe4d   :  { %v6362_v18 = vadd.f32 %v13280_v8, %v6348_v40  ;;  %v6335_v45 = vmul.f32 %v14883_v48, %v16479_v32 }
 0xe4f   :  { %14240 = vmatprep.mubr.msk.f32.mxu1 %vm181_vm0, %v6362_v18  ;;  %v6349_v20 = vmul.f32 %v13279_v55, %v6335_v45 }
 0xe50   :  { %v14885_v4 = vpop.eup %14884 }
 0xe51   :  { %v14887_v10 = vpop.eup %14886  ;;  %v6363_v17 = vadd.f32 %v13280_v8, %v6349_v20  ;;  %v6337_v13 = vmul.f32 %v14885_v4, %v16483_v46  ;;  %v13290_v20 = vld [vmem:[%s17897_s16] ss:$0 sm:$0xff] }
 0xe52   :  { %v6336_v53 = vmul.f32 %v14887_v10, %v16488_v51 }
 0xe53   :  { %14241 = vmatmul.mubr.msk.f32.gmra.mxu1 %vm181_vm0, %v6363_v17  ;;  %v6351_v28 = vmul.f32 %v13279_v55, %v6337_v13 }
 0xe54   :  { %v14889_v54 = vpop.eup %14888  ;;  %v6350_v6 = vmul.f32 %v13279_v55, %v6336_v53 }
 0xe55   :  { %v14891_v38 = vpop.eup %14890  ;;  %v6365_v43 = vadd.f32 %v13280_v8, %v6351_v28  ;;  %v6339_v44 = vmul.f32 %v14889_v54, %v16494_v11  ;;  %v6518_v11 = vld [vmem:[%s17896_s15 + $0x10] sm:$0xff] }
 0xe56   :  { %v6364_v32 = vadd.f32 %v13280_v8, %v6350_v6  ;;  %v6338_v57 = vmul.f32 %v14891_v38, %v16499_v31  ;;  %14259 = vmatprep.subr.mxu0 %v6518_v11  ;;  %v6517_v31 = vld [vmem:[%s17896_s15 + $0x8] sm:$0xff] }
 0xe57   :  { %v6353_v52 = vmul.f32 %v13279_v55, %v6339_v44  ;;  %14260 = vmatpush3.msra.mxu0 %v6518_v11 }
 0xe58   :  { %14243 = vmatprep.mubr.msk.f32.mxu1 %vm181_vm0, %v6364_v32  ;;  %v6352_v61 = vmul.f32 %v13279_v55, %v6338_v57  ;;  %14261 = vmatprep.subr.mxu0 %v6517_v31  ;;  %v6516_v55 = vld [vmem:[%s17896_s15] sm:$0xff] }
 0xe59   :  { %14244 = vmatmul.mubr.msk.f32.gmra.mxu1 %vm181_vm0, %v6365_v43  ;;  %v6367_v46 = vadd.f32 %v13280_v8, %v6353_v52  ;;  %14262 = vmatpush3.msra.mxu0 %v6517_v31 }
 0xe5a   :  { %v6366_v51 = vadd.f32 %v13280_v8, %v6352_v61  ;;  %14263 = vmatprep.subr.mxu0 %v6516_v55  ;;  %v13281_v8 = vld [vmem:[%s17895_s14] ss:$0 sm:$0xff] }
 0xe5b   :  { %14264 = vmatpush3.msra.mxu0 %v6516_v55 }
 0xe5c   :  { %14246 = vmatprep.mubr.msk.f32.mxu1 %vm181_vm0, %v6366_v51 }
 0xe5d   :  { %14247 = vmatmul.mubr.msk.f32.gmra.mxu1 %vm181_vm0, %v6367_v46 }
 0xedb   :  { %v14239_v50 = vpop.f32.mrf.mxu1 }
 0xedc   :  { %v6475_v9 = vadd.f32 %v14239_v50, %v13281_v8 }
 0xedd   :  { %v6469_v33 = vpop.f32.mrf.mxu1 }
 0xede   :  { %v6470_v14 = vadd.f32 %v13281_v8, %v6469_v33  ;;  %v6509_v0 = vmax.f32 %v6475_v9, 0.0 }
 0xee0   :  { %v6508_v35 = vmax.f32 %v6470_v14, 0.0 }
 0xee2   :  { %14265 = vmatprep.mubr.msk.f32.mxu0 %vm6531_vm6, %v6508_v35 }
 0xee3   :  { %14266 = vmatmul.mubr.msk.f32.vlgmr.msra.gmra.mxu0 %vm6531_vm6, %v6509_v0 }
 0xf13   :  { %v14242_v58 = vpop.f32.mrf.mxu1 }
 0xf14   :  { %v6485_v15 = vadd.f32 %v14242_v58, %v13281_v8 }
 0xf15   :  { %v6479_v49 = vpop.f32.mrf.mxu1 }
 0xf16   :  { %v6480_v41 = vadd.f32 %v13281_v8, %v6479_v49  ;;  %v6511_v12 = vmax.f32 %v6485_v15, 0.0 }
 0xf18   :  { %v6510_v1 = vmax.f32 %v6480_v41, 0.0 }
 0xf19   :  { %v14245_v34 = vpop.f32.mrf.mxu1 }
 0xf1a   :  { %14268 = vmatprep.mubr.msk.f32.mxu0 %vm6531_vm6, %v6510_v1  ;;  %v6495_v62 = vadd.f32 %v14245_v34, %v13281_v8  ;;  %v6959_v34 = vld [vmem:[#allocation5 + $0x38] sm:$0xff] }
 0xf1b   :  { %v6489_v23 = vpop.f32.mrf.mxu1  ;;  %14269 = vmatmul.mubr.msk.f32.gmra.mxu0 %vm6531_vm6, %v6511_v12  ;;  %14297 = vmatprep.subr.mxu0 %v6959_v34 }
 0xf1c   :  { %v6490_v22 = vadd.f32 %v13281_v8, %v6489_v23  ;;  %v6513_v56 = vmax.f32 %v6495_v62, 0.0  ;;  %v13306_v62 = vld [vmem:[%s17886_s5 + $0x38] sm:$0xff]  ;;  %14298 = vmatpush3.msra.mxu0 %v6959_v34  ;;  %v16674_v34 = vld [vmem:[%s17884_s3 + $0x1] ss:$0 sm:$0xff] }
 0xf1d   :  { %v14248_v25 = vpop.f32.mrf.mxu1  ;;  %v6958_v23 = vld [vmem:[#allocation5 + $0x30] sm:$0xff]  ;;  %14277 = vmatprep.subr.mxu1 %v13306_v62 }
 0xf1e   :  { %v6512_v27 = vmax.f32 %v6490_v22, 0.0  ;;  %v6505_v36 = vadd.f32 %v14248_v25, %v13281_v8  ;;  %v13305_v22 = vld [vmem:[%s17886_s5 + $0x30] sm:$0xff]  ;;  %14299 = vmatprep.subr.mxu0 %v6958_v23  ;;  %14278 = vmatpush3.msra.mxu1 %v13306_v62 }
 0xf1f   :  { %v6499_v40 = vpop.f32.mrf.mxu1  ;;  %v6957_v25 = vld [vmem:[#allocation5 + $0x28] sm:$0xff]  ;;  %14300 = vmatpush3.msra.mxu0 %v6958_v23  ;;  %14279 = vmatprep.subr.mxu1 %v13305_v22 }
 0xf20   :  { %v6500_v48 = vadd.f32 %v13281_v8, %v6499_v40  ;;  %14271 = vmatprep.mubr.msk.f32.mxu0 %vm6531_vm6, %v6512_v27  ;;  %v6515_v45 = vmax.f32 %v6505_v36, 0.0  ;;  %v13304_v27 = vld [vmem:[%s17886_s5 + $0x28] sm:$0xff]  ;;  %14301 = vmatprep.subr.mxu0 %v6957_v25  ;;  %v13303_v36 = vld [vmem:[%s17886_s5 + $0x20] sm:$0xff] }
 0xf21   :  { %14272 = vmatmul.mubr.msk.f32.gmra.mxu0 %vm6531_vm6, %v6513_v56  ;;  %v6956_v56 = vld [vmem:[#allocation5 + $0x20] sm:$0xff]  ;;  %14280 = vmatpush3.msra.mxu1 %v13305_v22 }
 0xf22   :  { %v6514_v18 = vmax.f32 %v6500_v48, 0.0  ;;  %14302 = vmatpush3.msra.mxu0 %v6957_v25  ;;  %14281 = vmatprep.subr.mxu1 %v13304_v27  ;;  %v16681_v25 = vld [vmem:[%s17885_s4 + $0x1] ss:$0 sm:$0xff] }
 0xf23   :  { %14303 = vmatprep.subr.mxu0 %v6956_v56  ;;  %14282 = vmatpush3.msra.mxu1 %v13304_v27 }
 0xf24   :  { %14274 = vmatprep.mubr.msk.f32.mxu0 %vm6531_vm6, %v6514_v18  ;;  %14304 = vmatpush3.msra.mxu0 %v6956_v56 }
 0xf25   :  { %14275 = vmatmul.mubr.msk.f32.gmra.mxu0 %vm6531_vm6, %v6515_v45  ;;  %14283 = vmatprep.subr.mxu1 %v13303_v36 }
 0xf26   :  { %14284 = vmatpush3.msra.mxu1 %v13303_v36  ;;  %14337 = vmatprep.subr.mxu0 %v17902_v60 }
 0xf27   :  { %14317 = vmatprep.subr.mxu1 %v17902_v60 }
 0xfa3   :  { %v14267_v4 = vpop.f32.mrf.mxu0 }
 0xfa4   :  { %v6628_v10 = vadd.f32 %v14267_v4, %v13290_v20 }
 0xfa5   :  { %v6622_v17 = vpop.f32.mrf.mxu0 }
 0xfa6   :  { %v16570_v13 = vadd.f32 %v6628_v10, %v16408_v39  ;;  %v6623_v53 = vadd.f32 %v13290_v20, %v6622_v17 }
 0xfa8   :  { %v16573_v28 = vadd.f32 %v6623_v53, %v16413_v19  ;;  %v6676_v54 = vsel %vm181_vm0, %v16570_v13, 0.0 }
 0xfa9   :  { %6677 = vadd.xlane.f32.xlu1 %v6676_v54 }
 0xfaa   :  { %17915 = vst [vmem:[#allocation15_spill] sm:$0xff] %v16573_v28  ;;  %v6673_v6 = vsel %vm181_vm0, %v16573_v28, 0.0 }
 0xfab   :  { %6674 = vadd.xlane.f32.xlu0 %v6673_v6 }
 0xfdb   :  { %v14270_v38 = vpop.f32.mrf.mxu0 }
 0xfdc   :  { %v6638_v43 = vadd.f32 %v14270_v38, %v13290_v20 }
 0xfdd   :  { %v6632_v44 = vpop.f32.mrf.mxu0 }
 0xfde   :  { %v16580_v32 = vadd.f32 %v6638_v43, %v16427_v7  ;;  %v6633_v39 = vadd.f32 %v13290_v20, %v6632_v44 }
 0xfe0   :  { %17916 = vst [vmem:[#allocation16_spill] sm:$0xff] %v16580_v32  ;;  %v16583_v57 = vadd.f32 %v6633_v39, %v16422_v30  ;;  %v6682_v19 = vsel %vm181_vm0, %v16580_v32, 0.0 }
 0xfe1   :  { %v14273_v52 = vpop.f32.mrf.mxu0  ;;  %6683 = vadd.xlane.f32.xlu1 %v6682_v19 }
 0xfe2   :  { %17917 = vst [vmem:[#allocation17_spill] sm:$0xff] %v16583_v57  ;;  %v6648_v61 = vadd.f32 %v14273_v52, %v13290_v20  ;;  %v6679_v46 = vsel %vm181_vm0, %v16583_v57, 0.0 }
 0xfe3   :  { %v6642_v51 = vpop.f32.mrf.mxu0  ;;  %6680 = vadd.xlane.f32.xlu0 %v6679_v46 }
 0xfe4   :  { %v16590_v16 = vadd.f32 %v6648_v61, %v16434_v37  ;;  %v6643_v7 = vadd.f32 %v13290_v20, %v6642_v51 }
 0xfe5   :  { %v14276_v11 = vpop.f32.mrf.mxu0 }
 0xfe6   :  { %17918 = vst [vmem:[#allocation18_spill] sm:$0xff] %v16590_v16  ;;  %v16593_v31 = vadd.f32 %v6643_v7, %v16441_v21  ;;  %v6658_v30 = vadd.f32 %v14276_v11, %v13290_v20  ;;  %v6688_v55 = vsel %vm181_vm0, %v16590_v16, 0.0 }
 0xfe7   :  { %6689 = vadd.xlane.f32.xlu1 %v6688_v55  ;;  %v6652_v8 = vpop.f32.mrf.mxu0 }
 0xfe8   :  { %17919 = vst [vmem:[#allocation19_spill] sm:$0xff] %v16593_v31  ;;  %v16598_v50 = vadd.f32 %v6658_v30, %v16448_v29  ;;  %v6653_v9 = vadd.f32 %v13290_v20, %v6652_v8  ;;  %v6685_v33 = vsel %vm181_vm0, %v16593_v31, 0.0 }
 0xfe9   :  { %6686 = vadd.xlane.f32.xlu0 %v6685_v33 }
 0xfea   :  { %17920 = vst [vmem:[#allocation20_spill] sm:$0xff] %v16598_v50  ;;  %v16603_v37 = vadd.f32 %v6653_v9, %v16455_v24  ;;  %v6694_v21 = vsel %vm181_vm0, %v16598_v50, 0.0 }
 0xfeb   :  { %6695 = vadd.xlane.f32.xlu1 %v6694_v21 }
 0xfec   :  { %17921 = vst [vmem:[#allocation21_spill] sm:$0xff] %v16603_v37  ;;  %v6691_v14 = vsel %vm181_vm0, %v16603_v37, 0.0 }
 0xfed   :  { %6692 = vadd.xlane.f32.xlu0 %v6691_v14 }
0x1032   :  { %v6678_v35 = vpop.xlane.xlu1 %6677 }
0x1033   :  { %v6698_v0 = vmul.f32 0.03125, %v6678_v35 }
0x1034   :  { %v6675_v29 = vpop.xlane.xlu0 %6674 }
0x1035   :  { %v16610_v58 = vsub.f32 %v16570_v13, %v6698_v0  ;;  %v6697_v15 = vmul.f32 0.03125, %v6675_v29 }
0x1037   :  { %v16613_v49 = vsub.f32 %v16573_v28, %v6697_v15  ;;  %v6714_v24 = vmul.f32 %v16610_v58, %v16610_v58 }
0x1039   :  { %v6724_v41 = vsel %vm181_vm0, %v6714_v24, 0.0  ;;  %v6713_v1 = vmul.f32 %v16613_v49, %v16613_v49 }
0x103a   :  { %6725 = vadd.xlane.f32.xlu1 %v6724_v41 }
0x103b   :  { %v6721_v12 = vsel %vm181_vm0, %v6713_v1, 0.0 }
0x103c   :  { %6722 = vadd.xlane.f32.xlu0 %v6721_v12 }
0x106a   :  { %v6684_v40 = vpop.xlane.xlu1 %6683 }
0x106b   :  { %v6700_v48 = vmul.f32 0.03125, %v6684_v40 }
0x106c   :  { %v6681_v18 = vpop.xlane.xlu0 %6680 }
0x106d   :  { %v16636_v45 = vsub.f32 %v16580_v32, %v6700_v48  ;;  %v6699_v20 = vmul.f32 0.03125, %v6681_v18  ;;  %v15061_v18 = vld [vmem:[%s17914_s2 + $0x8] sm:$0xff] }
0x106f   :  { %v16639_v4 = vsub.f32 %v16583_v57, %v6699_v20  ;;  %v6716_v10 = vmul.f32 %v16636_v45, %v16636_v45 }
0x1070   :  { %v6690_v17 = vpop.xlane.xlu1 %6689 }
0x1071   :  { %v6702_v53 = vmul.f32 0.03125, %v6690_v17  ;;  %v6730_v54 = vsel %vm181_vm0, %v6716_v10, 0.0  ;;  %v6715_v6 = vmul.f32 %v16639_v4, %v16639_v4 }
0x1072   :  { %v6687_v38 = vpop.xlane.xlu0 %6686  ;;  %6731 = vadd.xlane.f32.xlu1 %v6730_v54 }
0x1073   :  { %v16647_v43 = vsub.f32 %v16590_v16, %v6702_v53  ;;  %v6701_v44 = vmul.f32 0.03125, %v6687_v38  ;;  %v6727_v39 = vsel %vm181_vm0, %v6715_v6, 0.0 }
0x1074   :  { %v6696_v19 = vpop.xlane.xlu1 %6695  ;;  %6728 = vadd.xlane.f32.xlu0 %v6727_v39 }
0x1075   :  { %v16651_v52 = vsub.f32 %v16593_v31, %v6701_v44  ;;  %v6704_v61 = vmul.f32 0.03125, %v6696_v19  ;;  %v6718_v46 = vmul.f32 %v16647_v43, %v16647_v43 }
0x1076   :  { %v6693_v51 = vpop.xlane.xlu0 %6692 }
0x1077   :  { %v16656_v7 = vsub.f32 %v16598_v50, %v6704_v61  ;;  %v6703_v11 = vmul.f32 0.03125, %v6693_v51  ;;  %v6736_v30 = vsel %vm181_vm0, %v6718_v46, 0.0  ;;  %v6717_v55 = vmul.f32 %v16651_v52, %v16651_v52 }
0x1078   :  { %6737 = vadd.xlane.f32.xlu1 %v6736_v30 }
0x1079   :  { %v16662_v8 = vsub.f32 %v16603_v37, %v6703_v11  ;;  %v6733_v9 = vsel %vm181_vm0, %v6717_v55, 0.0  ;;  %v6720_v33 = vmul.f32 %v16656_v7, %v16656_v7 }
0x107a   :  { %6734 = vadd.xlane.f32.xlu0 %v6733_v9 }
0x107b   :  { %v6742_v21 = vsel %vm181_vm0, %v6720_v33, 0.0  ;;  %v6719_v14 = vmul.f32 %v16662_v8, %v16662_v8 }
0x107c   :  { %6743 = vadd.xlane.f32.xlu1 %v6742_v21 }
0x107d   :  { %v6739_v35 = vsel %vm181_vm0, %v6719_v14, 0.0 }
0x107e   :  { %6740 = vadd.xlane.f32.xlu0 %v6739_v35 }
0x10c3   :  { %v6726_v0 = vpop.xlane.xlu1 %6725 }
0x10c4   :  { %v6746_v29 = vmul.f32 0.03125, %v6726_v0 }
0x10c5   :  { %v6723_v15 = vpop.xlane.xlu0 %6722 }
0x10c6   :  { %v6754_v24 = vadd.f32 1e-05, %v6746_v29  ;;  %v6745_v41 = vmul.f32 0.03125, %v6723_v15 }
0x10c8   :  { %14892 = vrsqrt.f32 %v6754_v24  ;;  %v6753_v1 = vadd.f32 1e-05, %v6745_v41 }
0x10ca   :  { %14894 = vrsqrt.f32 %v6753_v1 }
0x10d5   :  { %v14893_v12 = vpop.eup %14892 }
0x10d6   :  { %v6770_v62 = vmul.f32 %v14893_v12, %v16610_v58  ;;  %v15060_v58 = vld [vmem:[%s17914_s2] sm:$0xff] }
0x10d7   :  { %v14895_v23 = vpop.eup %14894 }
0x10d8   :  { %v6784_v22 = vmul.f32 %v16674_v34, %v6770_v62  ;;  %v6769_v27 = vmul.f32 %v14895_v23, %v16613_v49 }
0x10da   :  { %v6783_v56 = vmul.f32 %v16674_v34, %v6769_v27  ;;  %v6798_v36 = vadd.f32 %v16681_v25, %v6784_v22 }
0x10dc   :  { %v6797_v40 = vadd.f32 %v16681_v25, %v6783_v56  ;;  %v6806_v49 = vadd.f32 %v15061_v18, %v6798_v36  ;;  %v15063_v56 = vld [vmem:[%s17914_s2 + $0x18] sm:$0xff] }
0x10de   :  { %14305 = vmatprep.mubr.msk.f32.mxu0 %vm181_vm0, %v6797_v40  ;;  %v6805_v48 = vadd.f32 %v15060_v58, %v6797_v40 }
0x10df   :  { %14306 = vmatmul.mubr.msk.f32.vlgmr.msra.gmra.mxu0 %vm181_vm0, %v6798_v36 }
0x10e0   :  { %14285 = vmatprep.mubr.msk.f32.mxu1 %vm181_vm0, %v6805_v48 }
0x10e1   :  { %14286 = vmatmul.mubr.msk.f32.vlgmr.msra.gmra.mxu1 %vm181_vm0, %v6806_v49 }
0x10fb   :  { %v6732_v20 = vpop.xlane.xlu1 %6731 }
0x10fc   :  { %v6748_v10 = vmul.f32 0.03125, %v6732_v20  ;;  %v15064_v20 = vld [vmem:[%s17914_s2 + $0x20] sm:$0xff] }
0x10fd   :  { %v6729_v17 = vpop.xlane.xlu0 %6728 }
0x10fe   :  { %v6756_v53 = vadd.f32 1e-05, %v6748_v10  ;;  %v6747_v54 = vmul.f32 0.03125, %v6729_v17  ;;  %v15065_v17 = vld [vmem:[%s17914_s2 + $0x28] sm:$0xff] }
0x1100   :  { %14896 = vrsqrt.f32 %v6756_v53  ;;  %v6755_v6 = vadd.f32 1e-05, %v6747_v54 }
0x1101   :  { %v6738_v38 = vpop.xlane.xlu1 %6737 }
0x1102   :  { %14898 = vrsqrt.f32 %v6755_v6  ;;  %v6750_v44 = vmul.f32 0.03125, %v6738_v38  ;;  %v15067_v38 = vld [vmem:[%s17914_s2 + $0x38] sm:$0xff] }
0x1103   :  { %v6735_v39 = vpop.xlane.xlu0 %6734 }
0x1104   :  { %v6758_v19 = vadd.f32 1e-05, %v6750_v44  ;;  %v6749_v61 = vmul.f32 0.03125, %v6735_v39 }
0x1105   :  { %v6744_v46 = vpop.xlane.xlu1 %6743 }
0x1106   :  { %14900 = vrsqrt.f32 %v6758_v19  ;;  %v6757_v51 = vadd.f32 1e-05, %v6749_v61  ;;  %v6752_v11 = vmul.f32 0.03125, %v6744_v46 }
0x1107   :  { %v6741_v30 = vpop.xlane.xlu0 %6740 }
0x1108   :  { %14902 = vrsqrt.f32 %v6757_v51  ;;  %v6760_v55 = vadd.f32 1e-05, %v6752_v11  ;;  %v6751_v9 = vmul.f32 0.03125, %v6741_v30 }
0x110a   :  { %14904 = vrsqrt.f32 %v6760_v55  ;;  %v6759_v33 = vadd.f32 1e-05, %v6751_v9 }
0x110c   :  { %14906 = vrsqrt.f32 %v6759_v33 }
0x110d   :  { %v14897_v21 = vpop.eup %14896 }
0x110e   :  { %v6772_v14 = vmul.f32 %v14897_v21, %v16636_v45  ;;  %v15062_v45 = vld [vmem:[%s17914_s2 + $0x10] sm:$0xff] }
0x110f   :  { %v14899_v35 = vpop.eup %14898 }
0x1110   :  { %v6771_v0 = vmul.f32 %v14899_v35, %v16639_v4  ;;  %v6786_v29 = vmul.f32 %v16674_v34, %v6772_v14 }
0x1112   :  { %v6785_v15 = vmul.f32 %v16674_v34, %v6771_v0  ;;  %v6800_v41 = vadd.f32 %v16681_v25, %v6786_v29 }
0x1113   :  { %v14901_v24 = vpop.eup %14900 }
0x1114   :  { %v6799_v1 = vadd.f32 %v16681_v25, %v6785_v15  ;;  %v6774_v12 = vmul.f32 %v14901_v24, %v16647_v43  ;;  %v6808_v43 = vadd.f32 %v15063_v56, %v6800_v41 }
0x1115   :  { %v14903_v62 = vpop.eup %14902 }
0x1116   :  { %14308 = vmatprep.mubr.msk.f32.mxu0 %vm181_vm0, %v6799_v1  ;;  %v6807_v23 = vadd.f32 %v15062_v45, %v6799_v1  ;;  %v6773_v4 = vmul.f32 %v14903_v62, %v16651_v52  ;;  %v6788_v22 = vmul.f32 %v16674_v34, %v6774_v12 }
0x1117   :  { %v14905_v27 = vpop.eup %14904  ;;  %14309 = vmatmul.mubr.msk.f32.gmra.mxu0 %vm181_vm0, %v6800_v41 }
0x1118   :  { %14288 = vmatprep.mubr.msk.f32.mxu1 %vm181_vm0, %v6807_v23  ;;  %v6787_v36 = vmul.f32 %v16674_v34, %v6773_v4  ;;  %v6776_v40 = vmul.f32 %v14905_v27, %v16656_v7  ;;  %v6802_v52 = vadd.f32 %v16681_v25, %v6788_v22  ;;  %v16820_v27 = vld [vmem:[%s17889_s8 + $0x1] ss:$0 sm:$0xff] }
0x1119   :  { %v14907_v58 = vpop.eup %14906  ;;  %14289 = vmatmul.mubr.msk.f32.gmra.mxu1 %vm181_vm0, %v6808_v43 }
0x111a   :  { %v6801_v48 = vadd.f32 %v16681_v25, %v6787_v36  ;;  %v6775_v18 = vmul.f32 %v14907_v58, %v16662_v8  ;;  %v6790_v49 = vmul.f32 %v16674_v34, %v6776_v40  ;;  %v6810_v53 = vadd.f32 %v15065_v17, %v6802_v52 }
0x111c   :  { %14311 = vmatprep.mubr.msk.f32.mxu0 %vm181_vm0, %v6801_v48  ;;  %v6809_v10 = vadd.f32 %v15064_v20, %v6801_v48  ;;  %v6789_v7 = vmul.f32 %v16674_v34, %v6775_v18  ;;  %v6804_v8 = vadd.f32 %v16681_v25, %v6790_v49  ;;  %v15066_v34 = vld [vmem:[%s17914_s2 + $0x30] sm:$0xff] }
0x111d   :  { %14312 = vmatmul.mubr.msk.f32.gmra.mxu0 %vm181_vm0, %v6802_v52 }
0x111e   :  { %14291 = vmatprep.mubr.msk.f32.mxu1 %vm181_vm0, %v6809_v10  ;;  %v6803_v54 = vadd.f32 %v16681_v25, %v6789_v7  ;;  %v6812_v44 = vadd.f32 %v15067_v38, %v6804_v8  ;;  %v13308_v25 = vld [vmem:[%s17887_s6 + $0x1] ss:$0 sm:$0xff] }
0x111f   :  { %14292 = vmatmul.mubr.msk.f32.gmra.mxu1 %vm181_vm0, %v6810_v53 }
0x1120   :  { %14314 = vmatprep.mubr.msk.f32.mxu0 %vm181_vm0, %v6803_v54  ;;  %v6811_v6 = vadd.f32 %v15066_v34, %v6803_v54 }
0x1121   :  { %14315 = vmatmul.mubr.msk.f32.gmra.mxu0 %vm181_vm0, %v6804_v8 }
0x1122   :  { %14294 = vmatprep.mubr.msk.f32.mxu1 %vm181_vm0, %v6811_v6  ;;  %14339 = vmatprep.mubr.msk.f32.mxu0 %vm15183_vm1, %v17902_v60 }
0x1123   :  { %14295 = vmatmul.mubr.msk.f32.gmra.mxu1 %vm181_vm0, %v6812_v44 }
0x1124   :  { %14319 = vmatprep.mubr.msk.f32.mxu1 %vm15183_vm1, %v17902_v60 }
0x119f   :  { %v14307_v62 = vpop.f32.mrf.mxu0 }
0x11a0   :  { %v16835_v36 = vadd.f32 %v14307_v62, %v16820_v27 }
0x11a1   :  { %v14287_v39 = vpop.f32.mrf.mxu1  ;;  %v7058_v4 = vpop.f32.mrf.mxu0 }
0x11a2   :  { %v16752_v19 = vadd.f32 %v14287_v39, %v13308_v25  ;;  %v16826_v43 = vadd.f32 %v16820_v27, %v7058_v4 }
0x11a3   :  { %v6916_v61 = vpop.f32.mrf.mxu1 }
0x11a4   :  { %v16754_v46 = vadd.f32 %v13308_v25, %v6916_v61  ;;  %7175 = vrot.lane.b32.xlu1 %v16752_v19, %s15184_s9 }
0x11a6   :  { %7098 = vrot.lane.b32.xlu0 %v16754_v46, %s15184_s9 }
0x11d7   :  { %v16857_v53 = vpop.f32.mrf.mxu0 }
0x11d9   :  { %v14290_v51 = vpop.f32.mrf.mxu1  ;;  %v16859_v8 = vpop.f32.mrf.mxu0 }
0x11da   :  { %v16764_v9 = vadd.f32 %v14290_v51, %v13308_v25 }
0x11db   :  { %v6926_v11 = vpop.f32.mrf.mxu1 }
0x11dc   :  { %v16760_v30 = vadd.f32 %v13308_v25, %v6926_v11 }
0x11dd   :  { %v16861_v54 = vpop.f32.mrf.mxu0 }
0x11de   :  { %7252 = vrot.lane.b32.xlu1 %v16760_v30, %s15184_s9 }
0x11df   :  { %v14293_v55 = vpop.f32.mrf.mxu1  ;;  %v16863_v34 = vpop.f32.mrf.mxu0 }
0x11e0   :  { %v16770_v35 = vadd.f32 %v14293_v55, %v13308_v25 }
0x11e1   :  { %v6936_v33 = vpop.f32.mrf.mxu1  ;;  %v16865_v6 = vpop.f32.mrf.mxu0 }
0x11e2   :  { %v16766_v21 = vadd.f32 %v13308_v25, %v6936_v33  ;;  %7329 = vrot.lane.b32.xlu1 %v16764_v9, %s15184_s9 }
0x11e3   :  { %v14296_v14 = vpop.f32.mrf.mxu1  ;;  %v16868_v61 = vpop.f32.mrf.mxu0 }
0x11e4   :  { %7406 = vrot.lane.b32.xlu0 %v16766_v21, %s15184_s9  ;;  %v16778_v15 = vadd.f32 %v14296_v14, %v13308_v25 }
0x11e5   :  { %v6946_v0 = vpop.f32.mrf.mxu1 }
0x11e6   :  { %v16774_v29 = vadd.f32 %v13308_v25, %v6946_v0  ;;  %7483 = vrot.lane.b32.xlu1 %v16770_v35, %s15184_s9 }
0x11e8   :  { %7560 = vrot.lane.b32.xlu0 %v16774_v29, %s15184_s9 }
0x11ea   :  { %7637 = vrot.lane.b32.xlu1 %v16778_v15, %s15184_s9 }
0x1216   :  { %v7176_v41 = vpop.permute.xlu1 %7175 }
0x1218   :  { %v7099_v24 = vpop.permute.xlu0 %7098 }
0x1219   :  { %14318 = vmatpush3.xpose.msk.msra.mxu1 %vm606_vm2, %v7099_v24 }
0x121a   :  { %14322 = vmatprep.subr.mxu1 %v17902_v60 }
0x121c   :  { %14320 = vmatmul.mubr.msk.f32.vlgmr.msra.gmra.mxu1 %vm606_vm2, %v16754_v46 }
0x121d   :  { %14323 = vmatpush3.xpose.msk.msra.mxu1 %vm606_vm2, %v7176_v41  ;;  %14324 = vmatprep.mubr.msk.f32.mxu1 %vm15183_vm1, %v17902_v60 }
0x121e   :  { %14327 = vmatprep.subr.mxu1 %v17902_v60 }
0x1220   :  { %14325 = vmatmul.mubr.msk.f32.vlgmr.msra.gmra.mxu1 %vm606_vm2, %v16752_v19 }
0x1221   :  { %14329 = vmatprep.mubr.msk.f32.mxu1 %vm15183_vm1, %v17902_v60 }
0x1250   :  { %v7253_v1 = vpop.permute.xlu1 %7252 }
0x1251   :  { %14328 = vmatpush3.xpose.msk.msra.mxu1 %vm606_vm2, %v7253_v1 }
0x1252   :  { %14332 = vmatprep.subr.mxu1 %v17902_v60 }
0x1254   :  { %v7330_v12 = vpop.permute.xlu1 %7329  ;;  %14330 = vmatmul.mubr.msk.f32.vlgmr.msra.gmra.mxu1 %vm606_vm2, %v16760_v30 }
0x1255   :  { %14333 = vmatpush3.xpose.msk.msra.mxu1 %vm606_vm2, %v7330_v12  ;;  %14334 = vmatprep.mubr.msk.f32.mxu1 %vm15183_vm1, %v17902_v60 }
0x1256   :  { %v7407_v45 = vpop.permute.xlu0 %7406  ;;  %14342 = vmatprep.subr.mxu1 %v17902_v60 }
0x1257   :  { %14338 = vmatpush3.xpose.msk.msra.mxu0 %vm606_vm2, %v7407_v45 }
0x1258   :  { %v7484_v23 = vpop.permute.xlu1 %7483  ;;  %14335 = vmatmul.mubr.msk.f32.vlgmr.msra.gmra.mxu1 %vm606_vm2, %v16764_v9  ;;  %14347 = vmatprep.subr.mxu0 %v17902_v60 }
0x1259   :  { %14343 = vmatpush3.xpose.msk.msra.mxu1 %vm606_vm2, %v7484_v23  ;;  %14344 = vmatprep.mubr.msk.f32.mxu1 %vm15183_vm1, %v17902_v60 }
0x125a   :  { %14340 = vmatmul.mubr.msk.f32.vlgmr.msra.gmra.mxu0 %vm606_vm2, %v16766_v21  ;;  %v7561_v22 = vpop.permute.xlu0 %7560  ;;  %14352 = vmatprep.subr.mxu1 %v17902_v60 }
0x125b   :  { %14348 = vmatpush3.xpose.msk.msra.mxu0 %vm606_vm2, %v7561_v22  ;;  %14349 = vmatprep.mubr.msk.f32.mxu0 %vm15183_vm1, %v17902_v60 }
0x125c   :  { %v7638_v56 = vpop.permute.xlu1 %7637  ;;  %14345 = vmatmul.mubr.msk.f32.vlgmr.msra.gmra.mxu1 %vm606_vm2, %v16770_v35  ;;  %14357 = vmatprep.subr.mxu0 %v17902_v60 }
0x125d   :  { %14353 = vmatpush3.xpose.msk.msra.mxu1 %vm606_vm2, %v7638_v56  ;;  %14354 = vmatprep.mubr.msk.f32.mxu1 %vm15183_vm1, %v17902_v60 }
0x125e   :  { %14350 = vmatmul.mubr.msk.f32.vlgmr.msra.gmra.mxu0 %vm606_vm2, %v16774_v29  ;;  %14362 = vmatprep.subr.mxu1 %v17902_v60 }
0x125f   :  { %14358 = vmatpush3.msra.mxu0 %v16826_v43  ;;  %14359 = vmatprep.mubr.msk.f32.mxu0 %vm15183_vm1, %v17902_v60 }
0x1260   :  { %14355 = vmatmul.mubr.msk.f32.vlgmr.msra.gmra.mxu1 %vm606_vm2, %v16778_v15  ;;  %14367 = vmatprep.subr.mxu0 %v17902_v60 }
0x1261   :  { %14363 = vmatpush3.msra.mxu1 %v16835_v36  ;;  %14364 = vmatprep.mubr.msk.f32.mxu1 %vm15183_vm1, %v17902_v60 }
0x1262   :  { %14372 = vmatprep.subr.mxu1 %v17902_v60 }
0x12dc   :  { %v7170_v40 = vpop.f32.mrf.mxu1 }
0x12dd   :  { %v7713_v58 = vmul.f32 0.35355338, %v7170_v40 }
0x12de   :  { %v14321_v52 = vpop.f32.mrf.mxu1 }
0x12df   :  { %v7721_v48 = vadd.f32 %v7713_v58, %v15570_v5 }
0x12e0   :  { %v7247_v18 = vpop.f32.mrf.mxu1 }
0x12e1   :  { %v7714_v49 = vmul.f32 0.35355338, %v7247_v18  ;;  %v7729_v20 = vsel %vm606_vm2, %v7721_v48, -inf }
0x12e2   :  { %7730 = vmax.xlane.f32.xlu0 %v7729_v20  ;;  %v14326_v10 = vpop.f32.mrf.mxu1 }
0x12e3   :  { %v7722_v7 = vadd.f32 %v7714_v49, %v15568_v2 }
0x12e5   :  { %v7732_v17 = vsel %vm606_vm2, %v7722_v7, -inf }
0x12e6   :  { %7733 = vmax.xlane.f32.xlu1 %v7732_v17 }
0x12f7   :  { %8481 = vrot.lane.b32.xlu1 %v16752_v19, %s15186_s1 }
0x12fb   :  { %8401 = vrot.lane.b32.xlu1 %v16754_v46, %s15187_s20 }
0x12ff   :  { %8479 = vrot.lane.b32.xlu1 %v16752_v19, %s15187_s20 }
0x1314   :  { %v7324_v38 = vpop.f32.mrf.mxu1 }
0x1315   :  { %v7715_v44 = vmul.f32 0.35355338, %v7324_v38 }
0x1316   :  { %v14331_v25 = vpop.f32.mrf.mxu1 }
0x1317   :  { %v7723_v39 = vadd.f32 %v7715_v44, %v15584_v42 }
0x1318   :  { %v7401_v51 = vpop.f32.mrf.mxu1 }
0x1319   :  { %v7716_v11 = vmul.f32 0.35355338, %v7401_v51  ;;  %v7735_v55 = vsel %vm606_vm2, %v7723_v39, -inf }
0x131a   :  { %v7478_v33 = vpop.f32.mrf.mxu0  ;;  %7736 = vmax.xlane.f32.xlu0 %v7735_v55  ;;  %v14336_v14 = vpop.f32.mrf.mxu1 }
0x131b   :  { %v7724_v0 = vadd.f32 %v7716_v11, %v15582_v26  ;;  %v7717_v24 = vmul.f32 0.35355338, %v7478_v33 }
0x131c   :  { %v14341_v41 = vpop.f32.mrf.mxu0  ;;  %v7555_v1 = vpop.f32.mrf.mxu1 }
0x131d   :  { %v7725_v12 = vadd.f32 %v7717_v24, %v15591_v59  ;;  %v7718_v62 = vmul.f32 0.35355338, %v7555_v1  ;;  %v7738_v45 = vsel %vm606_vm2, %v7724_v0, -inf }
0x131e   :  { %v7632_v23 = vpop.f32.mrf.mxu0  ;;  %7739 = vmax.xlane.f32.xlu0 %v7738_v45  ;;  %v14346_v4 = vpop.f32.mrf.mxu1 }
0x131f   :  { %v16875_v22 = vadd.f32 %v7718_v62, %v15587_v47  ;;  %v7719_v56 = vmul.f32 0.35355338, %v7632_v23  ;;  %v7741_v49 = vsel %vm606_vm2, %v7725_v12, -inf }
0x1320   :  { %v14351_v40 = vpop.f32.mrf.mxu0  ;;  %v7709_v58 = vpop.f32.mrf.mxu1 }
0x1321   :  { %v7727_v52 = vadd.f32 %v7719_v56, %v15597_v3  ;;  %v7720_v18 = vmul.f32 0.35355338, %v7709_v58  ;;  %v7744_v20 = vsel %vm606_vm2, %v16875_v22, -inf }
0x1322   :  { %v14356_v10 = vpop.f32.mrf.mxu1  ;;  %7742 = vmax.xlane.f32.xlu0 %v7741_v49 }
0x1323   :  { %v16882_v17 = vadd.f32 %v7720_v18, %v15594_v63  ;;  %7745 = vmax.xlane.f32.xlu1 %v7744_v20  ;;  %v7747_v38 = vsel %vm606_vm2, %v7727_v52, -inf }
0x1325   :  { %v7750_v44 = vsel %vm606_vm2, %v16882_v17, -inf }
0x1326   :  { %7748 = vmax.xlane.f32.xlu0 %v7747_v38 }
0x1327   :  { %7751 = vmax.xlane.f32.xlu1 %v7750_v44 }
0x1338   :  { %8637 = vrot.lane.b32.xlu1 %v16764_v9, %s15186_s1 }
0x133c   :  { %8403 = vrot.lane.b32.xlu0 %v16754_v46, %s15186_s1 }
0x1340   :  { %8559 = vrot.lane.b32.xlu0 %v16760_v30, %s15186_s1 }
0x136b   :  { %v7731_v25 = vpop.xlane.xlu0 %7730 }
0x136c   :  { %v7753_v51 = vsub.f32 %v7721_v48, %v7731_v25 }
0x136e   :  { %v7761_v11 = vmul.f32 1.442695, %v7753_v51 }
0x136f   :  { %v7734_v55 = vpop.xlane.xlu1 %7733 }
0x1370   :  { %14908 = vpow2.f32 %v7761_v11  ;;  %v7754_v33 = vsub.f32 %v7722_v7, %v7734_v55 }
0x1372   :  { %v7763_v14 = vmul.f32 1.442695, %v7754_v33 }
0x1373   :  { %v16917_v11 = vpop.permute.xlu1 %8481 }
0x1374   :  { %14910 = vpow2.f32 %v7763_v14 }
0x1377   :  { %v16919_v55 = vpop.permute.xlu1 %8401 }
0x137b   :  { %v16925_v33 = vpop.permute.xlu1 %8479 }
0x137d   :  { %v16893_v24 = vpop.eup %14908 }
0x137e   :  { %v7777_v41 = vsel %vm606_vm2, %v16893_v24, 0.0 }
0x137f   :  { %7778 = vadd.xlane.f32.xlu0 %v7777_v41 }
0x1381   :  { %v16897_v1 = vpop.eup %14910 }
0x1382   :  { %v7780_v62 = vsel %vm606_vm2, %v16897_v1, 0.0 }
0x1383   :  { %7781 = vadd.xlane.f32.xlu1 %v7780_v62 }
0x13a3   :  { %v7737_v45 = vpop.xlane.xlu0 %7736 }
0x13a4   :  { %v7755_v48 = vsub.f32 %v7723_v39, %v7737_v45 }
0x13a6   :  { %v7765_v23 = vmul.f32 1.442695, %v7755_v48 }
0x13a7   :  { %v7740_v4 = vpop.xlane.xlu0 %7739 }
0x13a8   :  { %14912 = vpow2.f32 %v7765_v23  ;;  %v7756_v7 = vsub.f32 %v7724_v0, %v7740_v4 }
0x13aa   :  { %v7767_v56 = vmul.f32 1.442695, %v7756_v7 }
0x13ab   :  { %v7743_v40 = vpop.xlane.xlu0 %7742 }
0x13ac   :  { %14914 = vpow2.f32 %v7767_v56  ;;  %v7757_v58 = vsub.f32 %v7725_v12, %v7743_v40  ;;  %v7746_v14 = vpop.xlane.xlu1 %7745 }
0x13ad   :  { %v7758_v41 = vsub.f32 %v16875_v22, %v7746_v14 }
0x13ae   :  { %v7769_v18 = vmul.f32 1.442695, %v7757_v58 }
0x13af   :  { %v7749_v49 = vpop.xlane.xlu0 %7748  ;;  %v7771_v45 = vmul.f32 1.442695, %v7758_v41 }
0x13b0   :  { %14916 = vpow2.f32 %v7769_v18  ;;  %v7759_v20 = vsub.f32 %v7727_v52, %v7749_v49  ;;  %v7752_v62 = vpop.xlane.xlu1 %7751 }
0x13b1   :  { %v7760_v48 = vsub.f32 %v16882_v17, %v7752_v62  ;;  %v16978_v62 = vadd.f32 %v16820_v27, %v16863_v34 }
0x13b2   :  { %v7773_v10 = vmul.f32 1.442695, %v7759_v20 }
0x13b3   :  { %v7775_v23 = vmul.f32 1.442695, %v7760_v48  ;;  %v8404_v56 = vpop.permute.xlu0 %8403 }
0x13b4   :  { %14918 = vpow2.f32 %v7773_v10  ;;  %v16947_v58 = vpop.permute.xlu1 %8637 }
0x13b5   :  { %v16901_v38 = vpop.eup %14912  ;;  %14920 = vpow2.f32 %v7771_v45 }
0x13b6   :  { %v7783_v44 = vsel %vm606_vm2, %v16901_v38, 0.0  ;;  %14922 = vpow2.f32 %v7775_v23  ;;  %v16988_v23 = vadd.f32 %v16861_v54, %v16820_v27 }
0x13b7   :  { %7784 = vadd.xlane.f32.xlu0 %v7783_v44  ;;  %v8560_v40 = vpop.permute.xlu0 %8559  ;;  %v16958_v44 = vadd.f32 %v16820_v27, %v16859_v8 }
0x13b9   :  { %v16905_v39 = vpop.eup %14914 }
0x13ba   :  { %v7786_v0 = vsel %vm606_vm2, %v16905_v39, 0.0 }
0x13bb   :  { %7787 = vadd.xlane.f32.xlu1 %v7786_v0 }
0x13bd   :  { %v16909_v25 = vpop.eup %14916 }
0x13be   :  { %v7789_v12 = vsel %vm606_vm2, %v16909_v25, 0.0 }
0x13bf   :  { %7790 = vadd.xlane.f32.xlu0 %v7789_v12 }
0x13c1   :  { %v16913_v52 = vpop.eup %14918 }
0x13c2   :  { %v7795_v51 = vsel %vm606_vm2, %v16913_v52, 0.0  ;;  %v16939_v22 = vpop.eup %14920 }
0x13c3   :  { %7796 = vadd.xlane.f32.xlu0 %v7795_v51  ;;  %v7792_v4 = vsel %vm606_vm2, %v16939_v22, 0.0  ;;  %v16943_v7 = vpop.eup %14922  ;;  %v16968_v51 = vadd.f32 %v16857_v53, %v16820_v27 }
0x13c4   :  { %v7798_v17 = vsel %vm606_vm2, %v16943_v7, 0.0 }
0x13cc   :  { %8635 = vrot.lane.b32.xlu1 %v16764_v9, %s15187_s20 }
0x13d0   :  { %8793 = vrot.lane.b32.xlu1 %v16770_v35, %s15186_s1 }
0x13d9   :  { %8557 = vrot.lane.b32.xlu0 %v16760_v30, %s15187_s20 }
0x13dd   :  { %8715 = vrot.lane.b32.xlu0 %v16766_v21, %s15186_s1 }
0x13e1   :  { %8713 = vrot.lane.b32.xlu0 %v16766_v21, %s15187_s20 }
0x13e5   :  { %8871 = vrot.lane.b32.xlu0 %v16774_v29, %s15186_s1 }
0x13e9   :  { %8869 = vrot.lane.b32.xlu0 %v16774_v29, %s15187_s20 }
0x13f4   :  { %7793 = vadd.xlane.f32.xlu1 %v7792_v4 }
0x13f8   :  { %7799 = vadd.xlane.f32.xlu1 %v7798_v17 }
0x1408   :  { %v7779_v18 = vpop.xlane.xlu0 %7778 }
0x1409   :  { %14924 = vrcp.f32 %v7779_v18  ;;  %8791 = vrot.lane.b32.xlu1 %v16770_v35, %s15187_s20 }
0x140c   :  { %v7782_v49 = vpop.xlane.xlu1 %7781 }
0x140d   :  { %14926 = vrcp.f32 %v7782_v49  ;;  %8949 = vrot.lane.b32.xlu1 %v16778_v15, %s15186_s1 }
0x1411   :  { %8947 = vrot.lane.b32.xlu1 %v16778_v15, %s15187_s20 }
0x1416   :  { %v14925_v20 = vpop.eup %14924 }
0x1417   :  { %v7809_v10 = vmul.f32 %v14925_v20, %v16893_v24 }
0x1419   :  { %14360 = vmatmul.mubr.msk.f32.vlgmr.msra.gmra.mxu0 %vm606_vm2, %v7809_v10 }
0x141a   :  { %v14927_v0 = vpop.eup %14926  ;;  %14368 = vmatpush3.msra.mxu0 %v16958_v44  ;;  %14369 = vmatprep.mubr.msk.f32.mxu0 %vm15183_vm1, %v17902_v60 }
0x141b   :  { %v7810_v12 = vmul.f32 %v14927_v0, %v16897_v1  ;;  %14377 = vmatprep.subr.mxu0 %v17902_v60  ;;  %v17033_v0 = vadd.f32 %v16865_v6, %v16820_v27 }
0x141d   :  { %14365 = vmatmul.mubr.msk.f32.vlgmr.msra.gmra.mxu1 %vm606_vm2, %v7810_v12 }
0x141e   :  { %14373 = vmatpush3.msra.mxu1 %v16968_v51  ;;  %14374 = vmatprep.mubr.msk.f32.mxu1 %vm15183_vm1, %v17902_v60 }
0x141f   :  { %14382 = vmatprep.subr.mxu1 %v17902_v60 }
0x1440   :  { %v7785_v8 = vpop.xlane.xlu0 %7784 }
0x1441   :  { %14928 = vrcp.f32 %v7785_v8 }
0x1444   :  { %v7788_v24 = vpop.xlane.xlu1 %7787 }
0x1445   :  { %14930 = vrcp.f32 %v7788_v24 }
0x1448   :  { %v7791_v1 = vpop.xlane.xlu0 %7790 }
0x1449   :  { %14932 = vrcp.f32 %v7791_v1 }
0x144c   :  { %v7797_v14 = vpop.xlane.xlu0 %7796 }
0x144d   :  { %14934 = vrcp.f32 %v7797_v14 }
0x144e   :  { %v14929_v41 = vpop.eup %14928 }
0x144f   :  { %v7811_v53 = vmul.f32 %v14929_v41, %v16901_v38 }
0x1450   :  { %v8558_v38 = vpop.permute.xlu0 %8557 }
0x1451   :  { %14370 = vmatmul.mubr.msk.f32.vlgmr.msra.gmra.mxu0 %vm606_vm2, %v7811_v53 }
0x1452   :  { %v14931_v45 = vpop.eup %14930  ;;  %14378 = vmatpush3.msra.mxu0 %v16978_v62  ;;  %14379 = vmatprep.mubr.msk.f32.mxu0 %vm15183_vm1, %v17902_v60 }
0x1453   :  { %v7812_v48 = vmul.f32 %v14931_v45, %v16905_v39  ;;  %14387 = vmatprep.subr.mxu0 %v17902_v60  ;;  %v16998_v39 = vadd.f32 %v16820_v27, %v16868_v61 }
0x1454   :  { %v8716_v17 = vpop.permute.xlu0 %8715 }
0x1455   :  { %14375 = vmatmul.mubr.msk.f32.vlgmr.msra.gmra.mxu1 %vm606_vm2, %v7812_v48 }
0x1456   :  { %v14933_v34 = vpop.eup %14932  ;;  %14383 = vmatpush3.msra.mxu1 %v16988_v23  ;;  %14384 = vmatprep.mubr.msk.f32.mxu1 %vm15183_vm1, %v17902_v60 }
0x1457   :  { %v7813_v4 = vmul.f32 %v14933_v34, %v16909_v25  ;;  %14392 = vmatprep.subr.mxu1 %v17902_v60 }
0x1458   :  { %v8714_v61 = vpop.permute.xlu0 %8713 }
0x1459   :  { %14380 = vmatmul.mubr.msk.f32.vlgmr.msra.gmra.mxu0 %vm606_vm2, %v7813_v4 }
0x145a   :  { %v14935_v54 = vpop.eup %14934  ;;  %14388 = vmatpush3.msra.mxu0 %v16998_v39  ;;  %14389 = vmatprep.mubr.msk.f32.mxu0 %vm15183_vm1, %v17902_v60 }
0x145b   :  { %14397 = vmatprep.subr.mxu0 %v17902_v60  ;;  %v7815_v18 = vmul.f32 %v14935_v54, %v16913_v52 }
0x145c   :  { %v8872_v25 = vpop.permute.xlu0 %8871 }
0x145d   :  { %14390 = vmatmul.mubr.msk.f32.vlgmr.msra.gmra.mxu0 %vm606_vm2, %v7815_v18 }
0x145e   :  { %14398 = vmatpush3.xpose.msk.msra.mxu0 %vm606_vm2, %v8404_v56  ;;  %14399 = vmatprep.mubr.msk.f32.mxu0 %vm15183_vm1, %v17902_v60 }
0x145f   :  { %14407 = vmatprep.subr.mxu0 %v17902_v60 }
0x1460   :  { %v8870_v52 = vpop.permute.xlu0 %8869 }
0x1461   :  { %14400 = vmatmul.mubr.msk.f32.vlgmr.msra.gmra.mxu0 %vm606_vm2, %v16919_v55  ;;  %v8636_v55 = vpop.permute.xlu1 %8635 }
0x1462   :  { %14408 = vmatpush3.xpose.msk.msra.mxu0 %vm606_vm2, %v8560_v40  ;;  %14409 = vmatprep.mubr.msk.f32.mxu0 %vm15183_vm1, %v17902_v60 }
0x1463   :  { %14417 = vmatprep.subr.mxu0 %v17902_v60 }
0x1465   :  { %14410 = vmatmul.mubr.msk.f32.vlgmr.msra.gmra.mxu0 %vm606_vm2, %v8558_v38  ;;  %v8794_v56 = vpop.permute.xlu1 %8793 }
0x1466   :  { %14418 = vmatpush3.xpose.msk.msra.mxu0 %vm606_vm2, %v8716_v17  ;;  %14419 = vmatprep.mubr.msk.f32.mxu0 %vm15183_vm1, %v17902_v60 }
0x1467   :  { %14427 = vmatprep.subr.mxu0 %v17902_v60 }
0x1469   :  { %14420 = vmatmul.mubr.msk.f32.vlgmr.msra.gmra.mxu0 %vm606_vm2, %v8714_v61 }
0x146a   :  { %14428 = vmatpush3.xpose.msk.msra.mxu0 %vm606_vm2, %v8872_v25  ;;  %14429 = vmatprep.mubr.msk.f32.mxu0 %vm15183_vm1, %v17902_v60 }
0x146b   :  { %14437 = vmatprep.subr.mxu0 %v17902_v60 }
0x146d   :  { %14430 = vmatmul.mubr.msk.f32.vlgmr.msra.gmra.mxu0 %vm606_vm2, %v8870_v52 }
0x146e   :  { %14439 = vmatprep.mubr.msk.f32.mxu0 %vm15183_vm1, %v17902_v60 }
0x147d   :  { %v7794_v40 = vpop.xlane.xlu1 %7793 }
0x147e   :  { %14936 = vrcp.f32 %v7794_v40 }
0x1481   :  { %v7800_v49 = vpop.xlane.xlu1 %7799 }
0x1482   :  { %14938 = vrcp.f32 %v7800_v49 }
0x1485   :  { %v8792_v27 = vpop.permute.xlu1 %8791 }
0x1489   :  { %v8950_v6 = vpop.permute.xlu1 %8949 }
0x148b   :  { %v14937_v20 = vpop.eup %14936 }
0x148c   :  { %v7814_v10 = vmul.f32 %v14937_v20, %v16939_v22 }
0x148e   :  { %14385 = vmatmul.mubr.msk.f32.vlgmr.msra.gmra.mxu1 %vm606_vm2, %v7814_v10 }
0x148f   :  { %v14939_v12 = vpop.eup %14938  ;;  %14393 = vmatpush3.msra.mxu1 %v17033_v0  ;;  %14394 = vmatprep.mubr.msk.f32.mxu1 %vm15183_vm1, %v17902_v60 }
0x1490   :  { %14402 = vmatprep.subr.mxu1 %v17902_v60  ;;  %v7816_v8 = vmul.f32 %v14939_v12, %v16943_v7 }
0x1492   :  { %14395 = vmatmul.mubr.msk.f32.vlgmr.msra.gmra.mxu1 %vm606_vm2, %v7816_v8 }
0x1493   :  { %14403 = vmatpush3.xpose.msk.msra.mxu1 %vm606_vm2, %v16917_v11  ;;  %14404 = vmatprep.mubr.msk.f32.mxu1 %vm15183_vm1, %v17902_v60  ;;  %v8948_v11 = vpop.permute.xlu1 %8947 }
0x1494   :  { %14412 = vmatprep.subr.mxu1 %v17902_v60 }
0x1496   :  { %14405 = vmatmul.mubr.msk.f32.vlgmr.msra.gmra.mxu1 %vm606_vm2, %v16925_v33 }
0x1497   :  { %14413 = vmatpush3.xpose.msk.msra.mxu1 %vm606_vm2, %v16947_v58  ;;  %14414 = vmatprep.mubr.msk.f32.mxu1 %vm15183_vm1, %v17902_v60 }
0x1498   :  { %14422 = vmatprep.subr.mxu1 %v17902_v60 }
0x149a   :  { %14415 = vmatmul.mubr.msk.f32.vlgmr.msra.gmra.mxu1 %vm606_vm2, %v8636_v55 }
0x149b   :  { %14423 = vmatpush3.xpose.msk.msra.mxu1 %vm606_vm2, %v8794_v56  ;;  %14424 = vmatprep.mubr.msk.f32.mxu1 %vm15183_vm1, %v17902_v60 }
0x149c   :  { %14432 = vmatprep.subr.mxu1 %v17902_v60 }
0x149e   :  { %14425 = vmatmul.mubr.msk.f32.vlgmr.msra.gmra.mxu1 %vm606_vm2, %v8792_v27 }
0x149f   :  { %14433 = vmatpush3.xpose.msk.msra.mxu1 %vm606_vm2, %v8950_v6  ;;  %14434 = vmatprep.mubr.msk.f32.mxu1 %vm15183_vm1, %v17902_v60 }
0x14a0   :  { %14442 = vmatprep.subr.mxu1 %v17902_v60 }
0x14a2   :  { %14435 = vmatmul.mubr.msk.f32.vlgmr.msra.gmra.mxu1 %vm606_vm2, %v8948_v11 }
0x14a3   :  { %14444 = vmatprep.mubr.msk.f32.mxu1 %vm15183_vm1, %v17902_v60 }
0x14d9   :  { %v17067_v33 = vpop.f32.mrf.mxu0 }
0x14db   :  { %v14361_v22 = vpop.f32.mrf.mxu0 }
0x14dd   :  { %v17069_v7 = vpop.f32.mrf.mxu1 }
0x14df   :  { %v14366_v58 = vpop.f32.mrf.mxu1 }
0x1511   :  { %v17071_v24 = vpop.f32.mrf.mxu0 }
0x1513   :  { %v14371_v1 = vpop.f32.mrf.mxu0 }
0x1515   :  { %v17073_v14 = vpop.f32.mrf.mxu1 }
0x1517   :  { %v14376_v41 = vpop.f32.mrf.mxu1 }
0x1519   :  { %v17075_v53 = vpop.f32.mrf.mxu0 }
0x151b   :  { %v14381_v45 = vpop.f32.mrf.mxu0 }
0x151d   :  { %v17077_v48 = vpop.f32.mrf.mxu0 }
0x151f   :  { %v14391_v38 = vpop.f32.mrf.mxu0 }
0x1521   :  { %v8475_v34 = vpop.f32.mrf.mxu0 }
0x1522   :  { %v9025_v4 = vmul.f32 0.35355338, %v8475_v34 }
0x1523   :  { %v14401_v54 = vpop.f32.mrf.mxu0 }
0x1524   :  { %v17080_v17 = vadd.f32 %v9025_v4, %v15570_v5 }
0x1525   :  { %v8631_v18 = vpop.f32.mrf.mxu0 }
0x1526   :  { %v9027_v61 = vmul.f32 0.35355338, %v8631_v18  ;;  %v9041_v25 = vsel %vm606_vm2, %v17080_v17, -inf }
0x1527   :  { %9042 = vmax.xlane.f32.xlu0 %v9041_v25  ;;  %v14411_v52 = vpop.f32.mrf.mxu0 }
0x1528   :  { %v9035_v55 = vadd.f32 %v9027_v61, %v15584_v42 }
0x1529   :  { %v8787_v56 = vpop.f32.mrf.mxu0 }
0x152a   :  { %v9047_v40 = vsel %vm606_vm2, %v9035_v55, -inf  ;;  %v9029_v45 = vmul.f32 0.35355338, %v8787_v56 }
0x152b   :  { %9048 = vmax.xlane.f32.xlu0 %v9047_v40  ;;  %v14421_v49 = vpop.f32.mrf.mxu0 }
0x152c   :  { %v9037_v61 = vadd.f32 %v9029_v45, %v15591_v59 }
0x152d   :  { %v8943_v20 = vpop.f32.mrf.mxu0 }
0x152e   :  { %v9031_v25 = vmul.f32 0.35355338, %v8943_v20 }
0x152f   :  { %v14431_v10 = vpop.f32.mrf.mxu0 }
0x1530   :  { %v9039_v56 = vadd.f32 %v9031_v25, %v15597_v3 }
0x154e   :  { %v17086_v12 = vpop.f32.mrf.mxu1 }
0x1550   :  { %v14386_v8 = vpop.f32.mrf.mxu1 }
0x1552   :  { %v17088_v27 = vpop.f32.mrf.mxu1 }
0x1554   :  { %v14396_v6 = vpop.f32.mrf.mxu1 }
0x1556   :  { %v8553_v11 = vpop.f32.mrf.mxu1 }
0x1557   :  { %v9026_v22 = vmul.f32 0.35355338, %v8553_v11  ;;  %v9053_v11 = vsel %vm606_vm2, %v9037_v61, -inf }
0x1558   :  { %v14406_v58 = vpop.f32.mrf.mxu1 }
0x1559   :  { %v9034_v1 = vadd.f32 %v9026_v22, %v15568_v2  ;;  %v9059_v58 = vsel %vm606_vm2, %v9039_v56, -inf }
0x155a   :  { %v8709_v41 = vpop.f32.mrf.mxu1 }
0x155b   :  { %v9028_v38 = vmul.f32 0.35355338, %v8709_v41  ;;  %v9044_v34 = vsel %vm606_vm2, %v9034_v1, -inf }
0x155c   :  { %9045 = vmax.xlane.f32.xlu1 %v9044_v34  ;;  %v14416_v4 = vpop.f32.mrf.mxu1 }
0x155d   :  { %v9036_v54 = vadd.f32 %v9028_v38, %v15582_v26 }
0x155e   :  { %v8865_v18 = vpop.f32.mrf.mxu1 }
0x155f   :  { %v9030_v52 = vmul.f32 0.35355338, %v8865_v18  ;;  %v9050_v40 = vsel %vm606_vm2, %v9036_v54, -inf }
0x1560   :  { %v14426_v49 = vpop.f32.mrf.mxu1  ;;  %9051 = vmax.xlane.f32.xlu0 %v9050_v40 }
0x1561   :  { %v9038_v10 = vadd.f32 %v9030_v52, %v15587_v47 }
0x1562   :  { %v9021_v8 = vpop.f32.mrf.mxu1 }
0x1563   :  { %v9056_v6 = vsel %vm606_vm2, %v9038_v10, -inf  ;;  %v9032_v20 = vmul.f32 0.35355338, %v9021_v8 }
0x1564   :  { %9057 = vmax.xlane.f32.xlu1 %v9056_v6  ;;  %v14436_v22 = vpop.f32.mrf.mxu1  ;;  %9054 = vmax.xlane.f32.xlu0 %v9053_v11 }
0x1565   :  { %v17127_v41 = vadd.f32 %v9032_v20, %v15594_v63 }
0x1567   :  { %v9062_v38 = vsel %vm606_vm2, %v17127_v41, -inf }
0x1568   :  { %9060 = vmax.xlane.f32.xlu0 %v9059_v58 }
0x1575   :  { %9207 = vrot.lane.b32.xlu1 %v16835_v36, %s15187_s20 }
0x1579   :  { %9284 = vrot.lane.b32.xlu1 %v16958_v44, %s15187_s20 }
0x157d   :  { %9361 = vrot.lane.b32.xlu1 %v16968_v51, %s15187_s20 }
0x157e   :  { %9130 = vrot.lane.b32.xlu0 %v16826_v43, %s15187_s20 }
0x1581   :  { %9515 = vrot.lane.b32.xlu1 %v16988_v23, %s15187_s20 }
0x1582   :  { %9438 = vrot.lane.b32.xlu0 %v16978_v62, %s15187_s20 }
0x1585   :  { %9669 = vrot.lane.b32.xlu1 %v17033_v0, %s15187_s20 }
0x1586   :  { %9592 = vrot.lane.b32.xlu0 %v16998_v39, %s15187_s20 }
0x1589   :  { %9825 = vrot.lane.b32.xlu1 %v16752_v19, %s15188_s21 }
0x158a   :  { %9747 = vrot.lane.b32.xlu0 %v16754_v46, %s15188_s21 }
0x158d   :  { %9823 = vrot.lane.b32.xlu1 %v16752_v19, %s15189_s13 }
0x158e   :  { %9745 = vrot.lane.b32.xlu0 %v16754_v46, %s15189_s13 }
0x1592   :  { %9903 = vrot.lane.b32.xlu0 %v16760_v30, %s15188_s21 }
0x15b0   :  { %v9043_v45 = vpop.xlane.xlu0 %9042 }
0x15b1   :  { %v9065_v34 = vsub.f32 %v17080_v17, %v9043_v45  ;;  %9063 = vmax.xlane.f32.xlu1 %v9062_v38 }
0x15b3   :  { %v9073_v4 = vmul.f32 1.442695, %v9065_v34 }
0x15b4   :  { %v9049_v18 = vpop.xlane.xlu0 %9048 }
0x15b5   :  { %14940 = vpow2.f32 %v9073_v4  ;;  %v9067_v25 = vsub.f32 %v9035_v55, %v9049_v18 }
0x15b7   :  { %v9077_v52 = vmul.f32 1.442695, %v9067_v25 }
0x15b9   :  { %14942 = vpow2.f32 %v9077_v52 }
0x15c2   :  { %v17132_v40 = vpop.eup %14940  ;;  %9981 = vrot.lane.b32.xlu1 %v16764_v9, %s15188_s21 }
0x15c3   :  { %v9089_v49 = vsel %vm606_vm2, %v17132_v40, 0.0 }
0x15c4   :  { %9090 = vadd.xlane.f32.xlu0 %v9089_v49 }
0x15c6   :  { %v17138_v8 = vpop.eup %14942 }
0x15c7   :  { %v9095_v17 = vsel %vm606_vm2, %v17138_v8, 0.0 }
0x15c8   :  { %9096 = vadd.xlane.f32.xlu0 %v9095_v17  ;;  %v17922_v17 = vmov 0.0  }
0x15e5   :  { %v9046_v6 = vpop.xlane.xlu1 %9045 }
0x15e6   :  { %v9066_v11 = vsub.f32 %v9034_v1, %v9046_v6 }
0x15e8   :  { %v9075_v55 = vmul.f32 1.442695, %v9066_v11 }
0x15e9   :  { %v9052_v22 = vpop.xlane.xlu0 %9051 }
0x15ea   :  { %14944 = vpow2.f32 %v9075_v55  ;;  %v9068_v58 = vsub.f32 %v9036_v54, %v9052_v22 }
0x15ec   :  { %v9079_v20 = vmul.f32 1.442695, %v9068_v58 }
0x15ed   :  { %v9058_v45 = vpop.xlane.xlu1 %9057  ;;  %v9055_v38 = vpop.xlane.xlu0 %9054 }
0x15ee   :  { %14946 = vpow2.f32 %v9079_v20  ;;  %v9070_v34 = vsub.f32 %v9038_v10, %v9058_v45  ;;  %v9069_v4 = vsub.f32 %v9037_v61, %v9055_v38 }
0x15f0   :  { %v9083_v18 = vmul.f32 1.442695, %v9070_v34  ;;  %v9081_v25 = vmul.f32 1.442695, %v9069_v4 }
0x15f1   :  { %v9208_v52 = vpop.permute.xlu1 %9207  ;;  %v9061_v49 = vpop.xlane.xlu0 %9060 }
0x15f2   :  { %14948 = vpow2.f32 %v9083_v18  ;;  %v9071_v60 = vsub.f32 %v9039_v56, %v9061_v49  ;;  %14443 = vmatpush3.msra.mxu1 %v9208_v52 }
0x15f3   :  { %14950 = vpow2.f32 %v9081_v25  ;;  %14452 = vmatprep.subr.mxu1 %v17922_v17 }
0x15f4   :  { %v9085_v1 = vmul.f32 1.442695, %v9071_v60 }
0x15f5   :  { %v9131_v6 = vpop.permute.xlu0 %9130  ;;  %v9285_v45 = vpop.permute.xlu1 %9284 }
0x15f6   :  { %14952 = vpow2.f32 %v9085_v1  ;;  %14438 = vmatpush3.msra.mxu0 %v9131_v6 }
0x15f7   :  { %v17143_v54 = vpop.eup %14944  ;;  %14447 = vmatprep.subr.mxu0 %v17922_v17 }
0x15f8   :  { %v9092_v61 = vsel %vm606_vm2, %v17143_v54, 0.0 }
0x15f9   :  { %9093 = vadd.xlane.f32.xlu1 %v9092_v61  ;;  %v9362_v38 = vpop.permute.xlu1 %9361  ;;  %v9439_v25 = vpop.permute.xlu0 %9438 }
0x15fb   :  { %v17148_v10 = vpop.eup %14946 }
0x15fc   :  { %v9098_v56 = vsel %vm606_vm2, %v17148_v10, 0.0 }
0x15fd   :  { %9099 = vadd.xlane.f32.xlu1 %v9098_v56  ;;  %v9516_v34 = vpop.permute.xlu1 %9515  ;;  %v9593_v49 = vpop.permute.xlu0 %9592 }
0x15ff   :  { %v17152_v11 = vpop.eup %14948 }
0x1600   :  { %v17154_v60 = vpop.eup %14950  ;;  %v9104_v55 = vsel %vm606_vm2, %v17152_v11, 0.0 }
0x1601   :  { %9105 = vadd.xlane.f32.xlu1 %v9104_v55  ;;  %v9101_v22 = vsel %vm606_vm2, %v17154_v60, 0.0  ;;  %v17176_v4 = vpop.permute.xlu1 %9669  ;;  %v17185_v61 = vpop.permute.xlu0 %9747 }
0x1602   :  { %9102 = vadd.xlane.f32.xlu0 %v9101_v22 }
0x1603   :  { %v17160_v58 = vpop.eup %14952 }
0x1604   :  { %v9107_v20 = vsel %vm606_vm2, %v17160_v58, 0.0 }
0x1605   :  { %v17180_v18 = vpop.permute.xlu1 %9825  ;;  %v17187_v55 = vpop.permute.xlu0 %9745 }
0x1606   :  { %9108 = vadd.xlane.f32.xlu0 %v9107_v20 }
0x1609   :  { %v17182_v52 = vpop.permute.xlu1 %9823  ;;  %v17189_v22 = vpop.permute.xlu0 %9903 }
0x1612   :  { %9979 = vrot.lane.b32.xlu1 %v16764_v9, %s15189_s13 }
0x1616   :  { %10137 = vrot.lane.b32.xlu1 %v16770_v35, %s15188_s21 }
0x161c   :  { %9901 = vrot.lane.b32.xlu0 %v16760_v30, %s15189_s13 }
0x1620   :  { %10059 = vrot.lane.b32.xlu0 %v16766_v21, %s15188_s21 }
0x1624   :  { %10057 = vrot.lane.b32.xlu0 %v16766_v21, %s15189_s13 }
0x1628   :  { %10215 = vrot.lane.b32.xlu0 %v16774_v29, %s15188_s21 }
0x162c   :  { %10213 = vrot.lane.b32.xlu0 %v16774_v29, %s15189_s13 }
0x163a   :  { %v9064_v1 = vpop.xlane.xlu1 %9063 }
0x163b   :  { %v9072_v6 = vsub.f32 %v17127_v41, %v9064_v1 }
0x163d   :  { %v9087_v56 = vmul.f32 1.442695, %v9072_v6 }
0x163f   :  { %14954 = vpow2.f32 %v9087_v56 }
0x164c   :  { %v17191_v20 = vpop.eup %14954 }
0x164d   :  { %v9091_v37 = vpop.xlane.xlu0 %9090  ;;  %v9110_v50 = vsel %vm606_vm2, %v17191_v20, 0.0 }
0x164e   :  { %14956 = vrcp.f32 %v9091_v37  ;;  %9111 = vadd.xlane.f32.xlu1 %v9110_v50 }
0x1651   :  { %v9097_v31 = vpop.xlane.xlu0 %9096 }
0x1652   :  { %14958 = vrcp.f32 %v9097_v31 }
0x165b   :  { %v14957_v16 = vpop.eup %14956 }
0x165c   :  { %v9121_v41 = vmul.f32 %v14957_v16, %v17132_v40  ;;  %v17211_v16 = vpop.permute.xlu1 %9981 }
0x165e   :  { %14440 = vmatmul.mubr.msk.f32.vlgmr.msra.gmra.mxu0 %vm606_vm2, %v9121_v41 }
0x165f   :  { %v14959_v1 = vpop.eup %14958  ;;  %14448 = vmatpush3.msra.mxu0 %v9285_v45  ;;  %10135 = vrot.lane.b32.xlu1 %v16770_v35, %s15189_s13 }
0x1660   :  { %v9123_v6 = vmul.f32 %v14959_v1, %v17138_v8  ;;  %14449 = vmatprep.mubr.msk.f32.mxu0 %vm15183_vm1, %v17922_v17  ;;  %14457 = vmatprep.subr.mxu0 %v17922_v17 }
0x1662   :  { %14450 = vmatmul.mubr.msk.f32.vlgmr.msra.gmra.mxu0 %vm606_vm2, %v9123_v6 }
0x1663   :  { %14458 = vmatpush3.msra.mxu0 %v9439_v25  ;;  %10293 = vrot.lane.b32.xlu1 %v16778_v15, %s15188_s21 }
0x1664   :  { %14459 = vmatprep.mubr.msk.f32.mxu0 %vm15183_vm1, %v17922_v17  ;;  %14467 = vmatprep.subr.mxu0 %v17922_v17 }
0x1667   :  { %10291 = vrot.lane.b32.xlu1 %v16778_v15, %s15189_s13 }
0x1682   :  { %v9094_v31 = vpop.xlane.xlu1 %9093 }
0x1683   :  { %14960 = vrcp.f32 %v9094_v31 }
0x1686   :  { %v9100_v50 = vpop.xlane.xlu1 %9099 }
0x1687   :  { %14962 = vrcp.f32 %v9100_v50 }
0x168a   :  { %v9106_v37 = vpop.xlane.xlu1 %9105 }
0x168b   :  { %14964 = vrcp.f32 %v9106_v37  ;;  %v9103_v40 = vpop.xlane.xlu0 %9102 }
0x168c   :  { %14966 = vrcp.f32 %v9103_v40 }
0x168f   :  { %v9109_v8 = vpop.xlane.xlu0 %9108 }
0x1690   :  { %v14961_v45 = vpop.eup %14960  ;;  %14968 = vrcp.f32 %v9109_v8 }
0x1691   :  { %v9122_v25 = vmul.f32 %v14961_v45, %v17143_v54 }
0x1693   :  { %14445 = vmatmul.mubr.msk.f32.vlgmr.msra.gmra.mxu1 %vm606_vm2, %v9122_v25  ;;  %v9902_v1 = vpop.permute.xlu0 %9901 }
0x1694   :  { %v14963_v56 = vpop.eup %14962  ;;  %14453 = vmatpush3.msra.mxu1 %v9362_v38  ;;  %14454 = vmatprep.mubr.msk.f32.mxu1 %vm15183_vm1, %v17922_v17 }
0x1695   :  { %v9124_v41 = vmul.f32 %v14963_v56, %v17148_v10  ;;  %14462 = vmatprep.subr.mxu1 %v17922_v17 }
0x1697   :  { %14455 = vmatmul.mubr.msk.f32.vlgmr.msra.gmra.mxu1 %vm606_vm2, %v9124_v41  ;;  %v10060_v50 = vpop.permute.xlu0 %10059 }
0x1698   :  { %v14965_v6 = vpop.eup %14964  ;;  %14463 = vmatpush3.msra.mxu1 %v9516_v34  ;;  %14464 = vmatprep.mubr.msk.f32.mxu1 %vm15183_vm1, %v17922_v17 }
0x1699   :  { %v14967_v54 = vpop.eup %14966  ;;  %v9126_v31 = vmul.f32 %v14965_v6, %v17152_v11  ;;  %14472 = vmatprep.subr.mxu1 %v17922_v17 }
0x169a   :  { %v9125_v38 = vmul.f32 %v14967_v54, %v17154_v60 }
0x169b   :  { %14465 = vmatmul.mubr.msk.f32.vlgmr.msra.gmra.mxu1 %vm606_vm2, %v9126_v31  ;;  %v10058_v11 = vpop.permute.xlu0 %10057 }
0x169c   :  { %14460 = vmatmul.mubr.msk.f32.vlgmr.msra.gmra.mxu0 %vm606_vm2, %v9125_v38  ;;  %14473 = vmatpush3.msra.mxu1 %v17176_v4  ;;  %v9980_v4 = vpop.permute.xlu1 %9979 }
0x169d   :  { %v14969_v10 = vpop.eup %14968  ;;  %14468 = vmatpush3.msra.mxu0 %v9593_v49  ;;  %14469 = vmatprep.mubr.msk.f32.mxu0 %vm15183_vm1, %v17922_v17 }
0x169e   :  { %v9127_v34 = vmul.f32 %v14969_v10, %v17160_v58  ;;  %14477 = vmatprep.subr.mxu0 %v17922_v17  ;;  %14474 = vmatprep.mubr.msk.f32.mxu1 %vm15183_vm1, %v17922_v17 }
0x169f   :  { %14482 = vmatprep.subr.mxu1 %v17922_v17  ;;  %v10216_v60 = vpop.permute.xlu0 %10215 }
0x16a0   :  { %14470 = vmatmul.mubr.msk.f32.vlgmr.msra.gmra.mxu0 %vm606_vm2, %v9127_v34  ;;  %v10138_v49 = vpop.permute.xlu1 %10137 }
0x16a1   :  { %14478 = vmatpush3.xpose.msk.msra.mxu0 %vm606_vm2, %v17185_v61  ;;  %14479 = vmatprep.mubr.msk.f32.mxu0 %vm15183_vm1, %v17922_v17 }
0x16a2   :  { %14487 = vmatprep.subr.mxu0 %v17922_v17 }
0x16a3   :  { %v10214_v58 = vpop.permute.xlu0 %10213 }
0x16a4   :  { %14480 = vmatmul.mubr.msk.f32.vlgmr.msra.gmra.mxu0 %vm606_vm2, %v17187_v55 }
0x16a5   :  { %14488 = vmatpush3.xpose.msk.msra.mxu0 %vm606_vm2, %v17189_v22  ;;  %14489 = vmatprep.mubr.msk.f32.mxu0 %vm15183_vm1, %v17922_v17 }
0x16a6   :  { %14497 = vmatprep.subr.mxu0 %v17922_v17 }
0x16a8   :  { %14490 = vmatmul.mubr.msk.f32.vlgmr.msra.gmra.mxu0 %vm606_vm2, %v9902_v1 }
0x16a9   :  { %14498 = vmatpush3.xpose.msk.msra.mxu0 %vm606_vm2, %v10060_v50  ;;  %14499 = vmatprep.mubr.msk.f32.mxu0 %vm15183_vm1, %v17922_v17 }
0x16aa   :  { %14507 = vmatprep.subr.mxu0 %v17922_v17 }
0x16ac   :  { %14500 = vmatmul.mubr.msk.f32.vlgmr.msra.gmra.mxu0 %vm606_vm2, %v10058_v11 }
0x16ad   :  { %14508 = vmatpush3.xpose.msk.msra.mxu0 %vm606_vm2, %v10216_v60  ;;  %14509 = vmatprep.mubr.msk.f32.mxu0 %vm15183_vm1, %v17922_v17 }
0x16ae   :  { %14517 = vmatprep.subr.mxu0 %v17922_v17 }
0x16b0   :  { %14510 = vmatmul.mubr.msk.f32.vlgmr.msra.gmra.mxu0 %vm606_vm2, %v10214_v58 }
0x16b1   :  { %14519 = vmatprep.mubr.msk.f32.mxu0 %vm15183_vm1, %v17922_v17 }
0x16d7   :  { %v9112_v61 = vpop.xlane.xlu1 %9111 }
0x16d8   :  { %14970 = vrcp.f32 %v9112_v61 }
0x16db   :  { %v10136_v37 = vpop.permute.xlu1 %10135 }
0x16e5   :  { %v14971_v55 = vpop.eup %14970 }
0x16e6   :  { %v9128_v22 = vmul.f32 %v14971_v55, %v17191_v20 }
0x16e8   :  { %14475 = vmatmul.mubr.msk.f32.vlgmr.msra.gmra.mxu1 %vm606_vm2, %v9128_v22 }
0x16e9   :  { %14483 = vmatpush3.xpose.msk.msra.mxu1 %vm606_vm2, %v17180_v18  ;;  %14484 = vmatprep.mubr.msk.f32.mxu1 %vm15183_vm1, %v17922_v17  ;;  %v10294_v18 = vpop.permute.xlu1 %10293 }
0x16ea   :  { %14492 = vmatprep.subr.mxu1 %v17922_v17 }
0x16ec   :  { %14485 = vmatmul.mubr.msk.f32.vlgmr.msra.gmra.mxu1 %vm606_vm2, %v17182_v52 }
0x16ed   :  { %14493 = vmatpush3.xpose.msk.msra.mxu1 %vm606_vm2, %v17211_v16  ;;  %14494 = vmatprep.mubr.msk.f32.mxu1 %vm15183_vm1, %v17922_v17  ;;  %v10292_v52 = vpop.permute.xlu1 %10291 }
0x16ee   :  { %14502 = vmatprep.subr.mxu1 %v17922_v17 }
0x16f0   :  { %14495 = vmatmul.mubr.msk.f32.vlgmr.msra.gmra.mxu1 %vm606_vm2, %v9980_v4 }
0x16f1   :  { %14503 = vmatpush3.xpose.msk.msra.mxu1 %vm606_vm2, %v10138_v49  ;;  %14504 = vmatprep.mubr.msk.f32.mxu1 %vm15183_vm1, %v17922_v17 }
0x16f2   :  { %14512 = vmatprep.subr.mxu1 %v17922_v17 }
0x16f4   :  { %14505 = vmatmul.mubr.msk.f32.vlgmr.msra.gmra.mxu1 %vm606_vm2, %v10136_v37 }
0x16f5   :  { %14513 = vmatpush3.xpose.msk.msra.mxu1 %vm606_vm2, %v10294_v18  ;;  %14514 = vmatprep.mubr.msk.f32.mxu1 %vm15183_vm1, %v17922_v17 }
0x16f6   :  { %14522 = vmatprep.subr.mxu1 %v17922_v17 }
0x16f8   :  { %14515 = vmatmul.mubr.msk.f32.vlgmr.msra.gmra.mxu1 %vm606_vm2, %v10292_v52 }
0x16f9   :  { %14524 = vmatprep.mubr.msk.f32.mxu1 %vm15183_vm1, %v17922_v17 }
0x171e   :  { %v17288_v20 = vpop.f32.mrf.mxu0 }
0x1720   :  { %v14441_v16 = vpop.f32.mrf.mxu0 }
0x1722   :  { %v17290_v40 = vpop.f32.mrf.mxu0 }
0x1724   :  { %v14451_v8 = vpop.f32.mrf.mxu0 }
0x1753   :  { %v17292_v45 = vpop.f32.mrf.mxu1 }
0x1755   :  { %v14446_v25 = vpop.f32.mrf.mxu1 }
0x1757   :  { %v17294_v56 = vpop.f32.mrf.mxu1 }
0x1759   :  { %v14456_v41 = vpop.f32.mrf.mxu1 }
0x175b   :  { %v17296_v1 = vpop.f32.mrf.mxu1 }
0x175c   :  { %v17298_v6 = vpop.f32.mrf.mxu0 }
0x175d   :  { %v14466_v54 = vpop.f32.mrf.mxu1 }
0x175e   :  { %v14461_v31 = vpop.f32.mrf.mxu0 }
0x1760   :  { %v17300_v38 = vpop.f32.mrf.mxu0 }
0x1762   :  { %v14471_v10 = vpop.f32.mrf.mxu0 }
0x1764   :  { %v9819_v50 = vpop.f32.mrf.mxu0 }
0x1765   :  { %v10369_v34 = vmul.f32 0.35355338, %v9819_v50 }
0x1766   :  { %v14481_v11 = vpop.f32.mrf.mxu0 }
0x1767   :  { %v10377_v60 = vadd.f32 %v10369_v34, %v15570_v5 }
0x1768   :  { %v9975_v58 = vpop.f32.mrf.mxu0 }
0x1769   :  { %v10371_v4 = vmul.f32 0.35355338, %v9975_v58  ;;  %v10385_v49 = vsel %vm606_vm2, %v10377_v60, -inf }
0x176a   :  { %10386 = vmax.xlane.f32.xlu0 %v10385_v49  ;;  %v14491_v61 = vpop.f32.mrf.mxu0 }
0x176b   :  { %v10379_v55 = vadd.f32 %v10371_v4, %v15584_v42 }
0x176c   :  { %v10131_v22 = vpop.f32.mrf.mxu0 }
0x176d   :  { %v10391_v37 = vsel %vm606_vm2, %v10379_v55, -inf  ;;  %v10373_v34 = vmul.f32 0.35355338, %v10131_v22 }
0x176e   :  { %10392 = vmax.xlane.f32.xlu0 %v10391_v37  ;;  %v14501_v18 = vpop.f32.mrf.mxu0 }
0x176f   :  { %v10381_v37 = vadd.f32 %v10373_v34, %v15591_v59 }
0x1770   :  { %v10287_v52 = vpop.f32.mrf.mxu0 }
0x1771   :  { %v10375_v18 = vmul.f32 0.35355338, %v10287_v52 }
0x1772   :  { %v14511_v16 = vpop.f32.mrf.mxu0 }
0x1773   :  { %v10383_v22 = vadd.f32 %v10375_v18, %v15597_v3 }
0x1775   :  { %v10403_v34 = vsel %vm606_vm2, %v10383_v22, -inf }
0x17a8   :  { %v17306_v8 = vpop.f32.mrf.mxu1 }
0x17aa   :  { %v14476_v25 = vpop.f32.mrf.mxu1 }
0x17ac   :  { %v9897_v41 = vpop.f32.mrf.mxu1 }
0x17ad   :  { %v10370_v54 = vmul.f32 0.35355338, %v9897_v41 }
0x17ae   :  { %v14486_v31 = vpop.f32.mrf.mxu1 }
0x17af   :  { %v10378_v10 = vadd.f32 %v10370_v54, %v15568_v2 }
0x17b0   :  { %v10053_v50 = vpop.f32.mrf.mxu1 }
0x17b1   :  { %v10372_v11 = vmul.f32 0.35355338, %v10053_v50  ;;  %v10388_v58 = vsel %vm606_vm2, %v10378_v10, -inf }
0x17b2   :  { %10389 = vmax.xlane.f32.xlu1 %v10388_v58  ;;  %v14496_v4 = vpop.f32.mrf.mxu1  ;;  %v10397_v58 = vsel %vm606_vm2, %v10381_v37, -inf }
0x17b3   :  { %v10380_v49 = vadd.f32 %v10372_v11, %v15582_v26 }
0x17b4   :  { %v10209_v61 = vpop.f32.mrf.mxu1 }
0x17b5   :  { %v10374_v16 = vmul.f32 0.35355338, %v10209_v61  ;;  %v10394_v25 = vsel %vm606_vm2, %v10380_v49, -inf }
0x17b6   :  { %v14506_v41 = vpop.f32.mrf.mxu1  ;;  %10395 = vmax.xlane.f32.xlu0 %v10394_v25 }
0x17b7   :  { %v10382_v54 = vadd.f32 %v10374_v16, %v15587_v47 }
0x17b8   :  { %v10365_v31 = vpop.f32.mrf.mxu1 }
0x17b9   :  { %v10400_v50 = vsel %vm606_vm2, %v10382_v54, -inf  ;;  %v10376_v41 = vmul.f32 0.35355338, %v10365_v31 }
0x17ba   :  { %10401 = vmax.xlane.f32.xlu1 %v10400_v50  ;;  %v14516_v11 = vpop.f32.mrf.mxu1  ;;  %10398 = vmax.xlane.f32.xlu0 %v10397_v58 }
0x17bb   :  { %v17345_v50 = vadd.f32 %v10376_v41, %v15594_v63 }
0x17be   :  { %10404 = vmax.xlane.f32.xlu0 %v10403_v34 }
0x17cb   :  { %10549 = vrot.lane.b32.xlu1 %v16835_v36, %s15189_s13 }
0x17cf   :  { %10625 = vrot.lane.b32.xlu1 %v16958_v44, %s15189_s13 }
0x17d3   :  { %10701 = vrot.lane.b32.xlu1 %v16968_v51, %s15189_s13 }
0x17d4   :  { %10473 = vrot.lane.b32.xlu0 %v16826_v43, %s15189_s13 }
0x17d7   :  { %10853 = vrot.lane.b32.xlu1 %v16988_v23, %s15189_s13 }
0x17d8   :  { %10777 = vrot.lane.b32.xlu0 %v16978_v62, %s15189_s13 }
0x17db   :  { %11005 = vrot.lane.b32.xlu1 %v17033_v0, %s15189_s13 }
0x17dc   :  { %10929 = vrot.lane.b32.xlu0 %v16998_v39, %s15189_s13 }
0x17df   :  { %11161 = vrot.lane.b32.xlu1 %v16752_v19, %s15190_s22 }
0x17e0   :  { %11083 = vrot.lane.b32.xlu0 %v16754_v46, %s15190_s22 }
0x17e3   :  { %11159 = vrot.lane.b32.xlu1 %v16752_v19, %s15191_s23  ;;  %v10406_v19 = vsel %vm606_vm2, %v17345_v50, -inf }
0x17e4   :  { %11081 = vrot.lane.b32.xlu0 %v16754_v46, %s15191_s23 }
0x17e8   :  { %11239 = vrot.lane.b32.xlu0 %v16760_v30, %s15190_s22 }
0x17f3   :  { %v10387_v52 = vpop.xlane.xlu0 %10386 }
0x17f4   :  { %v10409_v4 = vsub.f32 %v10377_v60, %v10387_v52 }
0x17f6   :  { %v10417_v61 = vmul.f32 1.442695, %v10409_v4 }
0x17f7   :  { %v10393_v18 = vpop.xlane.xlu0 %10392 }
0x17f8   :  { %14972 = vpow2.f32 %v10417_v61  ;;  %v10411_v16 = vsub.f32 %v10379_v55, %v10393_v18 }
0x17fa   :  { %v10421_v25 = vmul.f32 1.442695, %v10411_v16 }
0x17fc   :  { %14974 = vpow2.f32 %v10421_v25 }
0x1805   :  { %v17347_v58 = vpop.eup %14972 }
0x1806   :  { %v10433_v46 = vsel %vm606_vm2, %v17347_v58, 0.0 }
0x1807   :  { %10407 = vmax.xlane.f32.xlu1 %v10406_v19  ;;  %10434 = vadd.xlane.f32.xlu0 %v10433_v46 }
0x1809   :  { %v17353_v60 = vpop.eup %14974 }
0x180a   :  { %v10439_v55 = vsel %vm606_vm2, %v17353_v60, 0.0 }
0x180b   :  { %10440 = vadd.xlane.f32.xlu0 %v10439_v55 }
0x1818   :  { %11317 = vrot.lane.b32.xlu1 %v16764_v9, %s15190_s22 }
0x183b   :  { %v10390_v31 = vpop.xlane.xlu1 %10389 }
0x183c   :  { %v10410_v11 = vsub.f32 %v10378_v10, %v10390_v31 }
0x183e   :  { %v10419_v34 = vmul.f32 1.442695, %v10410_v11 }
0x183f   :  { %v10396_v52 = vpop.xlane.xlu0 %10395 }
0x1840   :  { %14976 = vpow2.f32 %v10419_v34  ;;  %v10412_v4 = vsub.f32 %v10380_v49, %v10396_v52 }
0x1842   :  { %v10423_v61 = vmul.f32 1.442695, %v10412_v4 }
0x1843   :  { %v10402_v18 = vpop.xlane.xlu1 %10401  ;;  %v10399_v16 = vpop.xlane.xlu0 %10398 }
0x1844   :  { %14978 = vpow2.f32 %v10423_v61  ;;  %v10414_v25 = vsub.f32 %v10382_v54, %v10402_v18  ;;  %v10413_v41 = vsub.f32 %v10381_v37, %v10399_v16 }
0x1846   :  { %v10427_v19 = vmul.f32 1.442695, %v10414_v25  ;;  %v10425_v46 = vmul.f32 1.442695, %v10413_v41 }
0x1847   :  { %v10550_v57 = vpop.permute.xlu1 %10549  ;;  %v10405_v32 = vpop.xlane.xlu0 %10404 }
0x1848   :  { %14980 = vpow2.f32 %v10427_v19  ;;  %v10415_v55 = vsub.f32 %v10383_v22, %v10405_v32  ;;  %14523 = vmatpush3.msra.mxu1 %v10550_v57 }
0x1849   :  { %14982 = vpow2.f32 %v10425_v46  ;;  %14532 = vmatprep.subr.mxu1 %v17922_v17 }
0x184a   :  { %v10429_v10 = vmul.f32 1.442695, %v10415_v55 }
0x184b   :  { %v10474_v31 = vpop.permute.xlu0 %10473  ;;  %v10626_v61 = vpop.permute.xlu1 %10625 }
0x184c   :  { %14984 = vpow2.f32 %v10429_v10  ;;  %14518 = vmatpush3.msra.mxu0 %v10474_v31 }
0x184d   :  { %v17360_v49 = vpop.eup %14976  ;;  %14527 = vmatprep.subr.mxu0 %v17922_v17 }
0x184e   :  { %v10436_v37 = vsel %vm606_vm2, %v17360_v49, 0.0 }
0x184f   :  { %10437 = vadd.xlane.f32.xlu1 %v10436_v37  ;;  %v10702_v18 = vpop.permute.xlu1 %10701  ;;  %v10778_v16 = vpop.permute.xlu0 %10777 }
0x1851   :  { %v17365_v54 = vpop.eup %14978 }
0x1852   :  { %v10442_v32 = vsel %vm606_vm2, %v17365_v54, 0.0 }
0x1853   :  { %10443 = vadd.xlane.f32.xlu1 %v10442_v32  ;;  %v10854_v25 = vpop.permute.xlu1 %10853  ;;  %v17389_v41 = vpop.permute.xlu0 %10929 }
0x1855   :  { %v17369_v57 = vpop.eup %14980 }
0x1856   :  { %v17371_v22 = vpop.eup %14982  ;;  %v10448_v11 = vsel %vm606_vm2, %v17369_v57, 0.0 }
0x1857   :  { %10449 = vadd.xlane.f32.xlu1 %v10448_v11  ;;  %v10445_v34 = vsel %vm606_vm2, %v17371_v22, 0.0  ;;  %v17397_v19 = vpop.permute.xlu0 %11083 }
0x1858   :  { %10446 = vadd.xlane.f32.xlu0 %v10445_v34 }
0x1859   :  { %v17377_v52 = vpop.eup %14984 }
0x185a   :  { %v10451_v4 = vsel %vm606_vm2, %v17377_v52, 0.0 }
0x185b   :  { %v17403_v46 = vpop.permute.xlu0 %11081 }
0x185c   :  { %10452 = vadd.xlane.f32.xlu0 %v10451_v4 }
0x185f   :  { %v17407_v10 = vpop.permute.xlu0 %11239 }
0x1868   :  { %11315 = vrot.lane.b32.xlu1 %v16764_v9, %s15191_s23  ;;  %v17395_v9 = vpop.permute.xlu1 %11005 }
0x186c   :  { %11473 = vrot.lane.b32.xlu1 %v16770_v35, %s15190_s22 }
0x1872   :  { %11237 = vrot.lane.b32.xlu0 %v16760_v30, %s15191_s23  ;;  %v17401_v30 = vpop.permute.xlu1 %11161 }
0x1876   :  { %11395 = vrot.lane.b32.xlu0 %v16766_v21, %s15190_s22  ;;  %v17405_v55 = vpop.permute.xlu1 %11159 }
0x187a   :  { %11393 = vrot.lane.b32.xlu0 %v16766_v21, %s15191_s23 }
0x187e   :  { %11551 = vrot.lane.b32.xlu0 %v16774_v29, %s15190_s22 }
0x1882   :  { %11549 = vrot.lane.b32.xlu0 %v16774_v29, %s15191_s23 }
0x1890   :  { %v10408_v31 = vpop.xlane.xlu1 %10407  ;;  %v10435_v21 = vpop.xlane.xlu0 %10434 }
0x1891   :  { %v10416_v37 = vsub.f32 %v17345_v50, %v10408_v31  ;;  %14986 = vrcp.f32 %v10435_v21 }
0x1893   :  { %v10431_v32 = vmul.f32 1.442695, %v10416_v37 }
0x1894   :  { %v10441_v11 = vpop.xlane.xlu0 %10440 }
0x1895   :  { %14988 = vpow2.f32 %v10431_v32 }
0x1896   :  { %14990 = vrcp.f32 %v10441_v11 }
0x189e   :  { %v14987_v34 = vpop.eup %14986 }
0x189f   :  { %v10465_v29 = vmul.f32 %v14987_v34, %v17347_v58  ;;  %v17430_v58 = vpop.permute.xlu1 %11317 }
0x18a1   :  { %14520 = vmatmul.mubr.msk.f32.vlgmr.msra.gmra.mxu0 %vm606_vm2, %v10465_v29 }
0x18a2   :  { %v17412_v4 = vpop.eup %14988  ;;  %14528 = vmatpush3.msra.mxu0 %v10626_v61  ;;  %14529 = vmatprep.mubr.msk.f32.mxu0 %vm15183_vm1, %v17922_v17 }
0x18a3   :  { %v14991_v28 = vpop.eup %14990  ;;  %v10454_v50 = vsel %vm606_vm2, %v17412_v4, 0.0  ;;  %14537 = vmatprep.subr.mxu0 %v17922_v17 }
0x18a4   :  { %v10467_v31 = vmul.f32 %v14991_v28, %v17353_v60  ;;  %10455 = vadd.xlane.f32.xlu1 %v10454_v50 }
0x18a6   :  { %14530 = vmatmul.mubr.msk.f32.vlgmr.msra.gmra.mxu0 %vm606_vm2, %v10467_v31 }
0x18a7   :  { %14538 = vmatpush3.msra.mxu0 %v10778_v16  ;;  %14539 = vmatprep.mubr.msk.f32.mxu0 %vm15183_vm1, %v17922_v17 }
0x18a8   :  { %14547 = vmatprep.subr.mxu0 %v17922_v17 }
0x18b5   :  { %11471 = vrot.lane.b32.xlu1 %v16770_v35, %s15191_s23 }
0x18b9   :  { %11629 = vrot.lane.b32.xlu1 %v16778_v15, %s15190_s22 }
0x18bd   :  { %11627 = vrot.lane.b32.xlu1 %v16778_v15, %s15191_s23 }
0x18d8   :  { %v10438_v28 = vpop.xlane.xlu1 %10437 }
0x18d9   :  { %14992 = vrcp.f32 %v10438_v28 }
0x18dc   :  { %v10444_v60 = vpop.xlane.xlu1 %10443 }
0x18dd   :  { %14994 = vrcp.f32 %v10444_v60 }
0x18e0   :  { %v10450_v61 = vpop.xlane.xlu1 %10449 }
0x18e1   :  { %14996 = vrcp.f32 %v10450_v61  ;;  %v10447_v16 = vpop.xlane.xlu0 %10446 }
0x18e2   :  { %14998 = vrcp.f32 %v10447_v16 }
0x18e5   :  { %v10453_v21 = vpop.xlane.xlu0 %10452 }
0x18e6   :  { %v14993_v37 = vpop.eup %14992  ;;  %15000 = vrcp.f32 %v10453_v21 }
0x18e7   :  { %v10466_v35 = vmul.f32 %v14993_v37, %v17360_v49 }
0x18e9   :  { %14525 = vmatmul.mubr.msk.f32.vlgmr.msra.gmra.mxu1 %vm606_vm2, %v10466_v35  ;;  %v11238_v11 = vpop.permute.xlu0 %11237 }
0x18ea   :  { %v14995_v32 = vpop.eup %14994  ;;  %14533 = vmatpush3.msra.mxu1 %v10702_v18  ;;  %14534 = vmatprep.mubr.msk.f32.mxu1 %vm15183_vm1, %v17922_v17 }
0x18eb   :  { %v10468_v15 = vmul.f32 %v14995_v32, %v17365_v54  ;;  %14542 = vmatprep.subr.mxu1 %v17922_v17 }
0x18ed   :  { %14535 = vmatmul.mubr.msk.f32.vlgmr.msra.gmra.mxu1 %vm606_vm2, %v10468_v15  ;;  %v11396_v50 = vpop.permute.xlu0 %11395 }
0x18ee   :  { %v14997_v34 = vpop.eup %14996  ;;  %14543 = vmatpush3.msra.mxu1 %v10854_v25  ;;  %14544 = vmatprep.mubr.msk.f32.mxu1 %vm15183_vm1, %v17922_v17 }
0x18ef   :  { %v14999_v49 = vpop.eup %14998  ;;  %v10470_v29 = vmul.f32 %v14997_v34, %v17369_v57  ;;  %14552 = vmatprep.subr.mxu1 %v17922_v17 }
0x18f0   :  { %v10469_v18 = vmul.f32 %v14999_v49, %v17371_v22 }
0x18f1   :  { %14545 = vmatmul.mubr.msk.f32.vlgmr.msra.gmra.mxu1 %vm606_vm2, %v10470_v29  ;;  %v11394_v57 = vpop.permute.xlu0 %11393 }
0x18f2   :  { %14540 = vmatmul.mubr.msk.f32.vlgmr.msra.gmra.mxu0 %vm606_vm2, %v10469_v18  ;;  %14553 = vmatpush3.msra.mxu1 %v17395_v9 }
0x18f3   :  { %v15001_v54 = vpop.eup %15000  ;;  %14548 = vmatpush3.msra.mxu0 %v17389_v41  ;;  %14549 = vmatprep.mubr.msk.f32.mxu0 %vm15183_vm1, %v17922_v17  ;;  %v11316_v41 = vpop.permute.xlu1 %11315 }
0x18f4   :  { %v10471_v25 = vmul.f32 %v15001_v54, %v17377_v52  ;;  %14557 = vmatprep.subr.mxu0 %v17922_v17  ;;  %14554 = vmatprep.mubr.msk.f32.mxu1 %vm15183_vm1, %v17922_v17 }
0x18f5   :  { %14562 = vmatprep.subr.mxu1 %v17922_v17  ;;  %v11552_v22 = vpop.permute.xlu0 %11551 }
0x18f6   :  { %14550 = vmatmul.mubr.msk.f32.vlgmr.msra.gmra.mxu0 %vm606_vm2, %v10471_v25 }
0x18f7   :  { %14558 = vmatpush3.xpose.msk.msra.mxu0 %vm606_vm2, %v17397_v19  ;;  %14559 = vmatprep.mubr.msk.f32.mxu0 %vm15183_vm1, %v17922_v17  ;;  %v11474_v9 = vpop.permute.xlu1 %11473 }
0x18f8   :  { %14567 = vmatprep.subr.mxu0 %v17922_v17 }
0x18f9   :  { %v11550_v52 = vpop.permute.xlu0 %11549 }
0x18fa   :  { %14560 = vmatmul.mubr.msk.f32.vlgmr.msra.gmra.mxu0 %vm606_vm2, %v17403_v46 }
0x18fb   :  { %14568 = vmatpush3.xpose.msk.msra.mxu0 %vm606_vm2, %v17407_v10  ;;  %14569 = vmatprep.mubr.msk.f32.mxu0 %vm15183_vm1, %v17922_v17 }
0x18fc   :  { %14577 = vmatprep.subr.mxu0 %v17922_v17 }
0x18fe   :  { %14570 = vmatmul.mubr.msk.f32.vlgmr.msra.gmra.mxu0 %vm606_vm2, %v11238_v11 }
0x18ff   :  { %14578 = vmatpush3.xpose.msk.msra.mxu0 %vm606_vm2, %v11396_v50  ;;  %14579 = vmatprep.mubr.msk.f32.mxu0 %vm15183_vm1, %v17922_v17 }
0x1900   :  { %14587 = vmatprep.subr.mxu0 %v17922_v17 }
0x1902   :  { %14580 = vmatmul.mubr.msk.f32.vlgmr.msra.gmra.mxu0 %vm606_vm2, %v11394_v57 }
0x1903   :  { %14588 = vmatpush3.xpose.msk.msra.mxu0 %vm606_vm2, %v11552_v22  ;;  %14589 = vmatprep.mubr.msk.f32.mxu0 %vm15183_vm1, %v17922_v17 }
0x1904   :  { %14597 = vmatprep.subr.mxu0 %v17922_v17 }
0x1906   :  { %14590 = vmatmul.mubr.msk.f32.vlgmr.msra.gmra.mxu0 %vm606_vm2, %v11550_v52 }
0x1907   :  { %14599 = vmatprep.mubr.msk.f32.mxu0 %vm15183_vm1, %v17922_v17 }
0x192d   :  { %v10456_v19 = vpop.xlane.xlu1 %10455 }
0x192e   :  { %15002 = vrcp.f32 %v10456_v19 }
0x1931   :  { %v11472_v31 = vpop.permute.xlu1 %11471 }
0x193b   :  { %v15003_v46 = vpop.eup %15002 }
0x193c   :  { %v10472_v10 = vmul.f32 %v15003_v46, %v17412_v4 }
0x193e   :  { %14555 = vmatmul.mubr.msk.f32.vlgmr.msra.gmra.mxu1 %vm606_vm2, %v10472_v10 }
0x193f   :  { %14563 = vmatpush3.xpose.msk.msra.mxu1 %vm606_vm2, %v17401_v30  ;;  %14564 = vmatprep.mubr.msk.f32.mxu1 %vm15183_vm1, %v17922_v17  ;;  %v11630_v30 = vpop.permute.xlu1 %11629 }
0x1940   :  { %14572 = vmatprep.subr.mxu1 %v17922_v17 }
0x1942   :  { %14565 = vmatmul.mubr.msk.f32.vlgmr.msra.gmra.mxu1 %vm606_vm2, %v17405_v55 }
0x1943   :  { %14573 = vmatpush3.xpose.msk.msra.mxu1 %vm606_vm2, %v17430_v58  ;;  %14574 = vmatprep.mubr.msk.f32.mxu1 %vm15183_vm1, %v17922_v17  ;;  %v11628_v55 = vpop.permute.xlu1 %11627 }
0x1944   :  { %14582 = vmatprep.subr.mxu1 %v17922_v17 }
0x1946   :  { %14575 = vmatmul.mubr.msk.f32.vlgmr.msra.gmra.mxu1 %vm606_vm2, %v11316_v41 }
0x1947   :  { %14583 = vmatpush3.xpose.msk.msra.mxu1 %vm606_vm2, %v11474_v9  ;;  %14584 = vmatprep.mubr.msk.f32.mxu1 %vm15183_vm1, %v17922_v17 }
0x1948   :  { %14592 = vmatprep.subr.mxu1 %v17922_v17 }
0x194a   :  { %14585 = vmatmul.mubr.msk.f32.vlgmr.msra.gmra.mxu1 %vm606_vm2, %v11472_v31 }
0x194b   :  { %14593 = vmatpush3.xpose.msk.msra.mxu1 %vm606_vm2, %v11630_v30  ;;  %14594 = vmatprep.mubr.msk.f32.mxu1 %vm15183_vm1, %v17922_v17 }
0x194c   :  { %14602 = vmatprep.subr.mxu1 %v17922_v17 }
0x194e   :  { %14595 = vmatmul.mubr.msk.f32.vlgmr.msra.gmra.mxu1 %vm606_vm2, %v11628_v55 }
0x194f   :  { %14604 = vmatprep.mubr.msk.f32.mxu1 %vm15183_vm1, %v17922_v17 }
0x1961   :  { %v17508_v4 = vpop.f32.mrf.mxu0 }
0x1963   :  { %v14521_v58 = vpop.f32.mrf.mxu0 }
0x1966   :  { %v17510_v28 = vpop.f32.mrf.mxu0 }
0x1968   :  { %v14531_v60 = vpop.f32.mrf.mxu0 }
0x19a9   :  { %v17512_v61 = vpop.f32.mrf.mxu1 }
0x19ab   :  { %v14526_v16 = vpop.f32.mrf.mxu1 }
0x19ad   :  { %v17514_v21 = vpop.f32.mrf.mxu1 }
0x19af   :  { %v14536_v37 = vpop.f32.mrf.mxu1 }
0x19b1   :  { %v17516_v35 = vpop.f32.mrf.mxu1 }
0x19b2   :  { %v17518_v32 = vpop.f32.mrf.mxu0 }
0x19b3   :  { %v14546_v15 = vpop.f32.mrf.mxu1 }
0x19b4   :  { %v14541_v11 = vpop.f32.mrf.mxu0 }
0x19b6   :  { %v17520_v34 = vpop.f32.mrf.mxu0 }
0x19b8   :  { %v14551_v49 = vpop.f32.mrf.mxu0 }
0x19ba   :  { %v11155_v29 = vpop.f32.mrf.mxu0 }
0x19bb   :  { %v11705_v18 = vmul.f32 0.35355338, %v11155_v29 }
0x19bc   :  { %v14561_v54 = vpop.f32.mrf.mxu0 }
0x19bd   :  { %v11713_v50 = vadd.f32 %v11705_v18, %v15570_v5 }
0x19be   :  { %v11311_v25 = vpop.f32.mrf.mxu0 }
0x19bf   :  { %v11707_v57 = vmul.f32 0.35355338, %v11311_v25  ;;  %v11721_v22 = vsel %vm606_vm2, %v11713_v50, -inf }
0x19c0   :  { %11722 = vmax.xlane.f32.xlu0 %v11721_v22  ;;  %v14571_v52 = vpop.f32.mrf.mxu0 }
0x19c1   :  { %v11715_v41 = vadd.f32 %v11707_v57, %v15584_v42 }
0x19c2   :  { %v11467_v9 = vpop.f32.mrf.mxu0 }
0x19c3   :  { %v11727_v19 = vsel %vm606_vm2, %v11715_v41, -inf  ;;  %v11709_v15 = vmul.f32 0.35355338, %v11467_v9 }
0x19c4   :  { %11728 = vmax.xlane.f32.xlu0 %v11727_v19  ;;  %v14581_v46 = vpop.f32.mrf.mxu0 }
0x19c5   :  { %v11717_v54 = vadd.f32 %v11709_v15, %v15591_v59 }
0x19c6   :  { %v11623_v10 = vpop.f32.mrf.mxu0 }
0x19c7   :  { %v11711_v25 = vmul.f32 0.35355338, %v11623_v10 }
0x19c8   :  { %v14591_v31 = vpop.f32.mrf.mxu0 }
0x19c9   :  { %v11719_v9 = vadd.f32 %v11711_v25, %v15597_v3 }
0x19fe   :  { %v17526_v30 = vpop.f32.mrf.mxu1 }
0x1a00   :  { %v14556_v55 = vpop.f32.mrf.mxu1 }
0x1a01   :  { %v11733_v55 = vsel %vm606_vm2, %v11717_v54, -inf }
0x1a02   :  { %v11233_v58 = vpop.f32.mrf.mxu1 }
0x1a03   :  { %v11706_v5 = vmul.f32 0.35355338, %v11233_v58  ;;  %v11739_v58 = vsel %vm606_vm2, %v11719_v9, -inf }
0x1a04   :  { %v14566_v60 = vpop.f32.mrf.mxu1 }
0x1a05   :  { %v11714_v16 = vadd.f32 %v11706_v5, %v15568_v2 }
0x1a06   :  { %v11389_v37 = vpop.f32.mrf.mxu1 }
0x1a07   :  { %v11708_v11 = vmul.f32 0.35355338, %v11389_v37  ;;  %v11724_v42 = vsel %vm606_vm2, %v11714_v16, -inf }
0x1a08   :  { %11725 = vmax.xlane.f32.xlu1 %v11724_v42  ;;  %v14576_v49 = vpop.f32.mrf.mxu1 }
0x1a09   :  { %v11716_v29 = vadd.f32 %v11708_v11, %v15582_v26 }
0x1a0a   :  { %v11545_v18 = vpop.f32.mrf.mxu1 }
0x1a0b   :  { %v11710_v57 = vmul.f32 0.35355338, %v11545_v18  ;;  %v11730_v22 = vsel %vm606_vm2, %v11716_v29, -inf }
0x1a0c   :  { %v14586_v52 = vpop.f32.mrf.mxu1  ;;  %11731 = vmax.xlane.f32.xlu0 %v11730_v22 }
0x1a0d   :  { %v11718_v2 = vadd.f32 %v11710_v57, %v15587_v47 }
0x1a0e   :  { %v11701_v19 = vpop.f32.mrf.mxu1 }
0x1a0f   :  { %v11712_v46 = vmul.f32 0.35355338, %v11701_v19  ;;  %v11736_v31 = vsel %vm606_vm2, %v11718_v2, -inf }
0x1a10   :  { %11737 = vmax.xlane.f32.xlu1 %v11736_v31  ;;  %v14596_v26 = vpop.f32.mrf.mxu1  ;;  %11734 = vmax.xlane.f32.xlu0 %v11733_v55 }
0x1a11   :  { %v11720_v59 = vadd.f32 %v11712_v46, %v15594_v63 }
0x1a13   :  { %v11742_v10 = vsel %vm606_vm2, %v11720_v59, -inf }
0x1a14   :  { %11743 = vmax.xlane.f32.xlu1 %v11742_v10  ;;  %11740 = vmax.xlane.f32.xlu0 %v11739_v58 }
0x1a25   :  { %11885 = vrot.lane.b32.xlu1 %v16835_v36, %s15191_s23 }
0x1a29   :  { %11961 = vrot.lane.b32.xlu1 %v16958_v44, %s15191_s23 }
0x1a2a   :  { %11809 = vrot.lane.b32.xlu0 %v16826_v43, %s15191_s23 }
0x1a2d   :  { %12037 = vrot.lane.b32.xlu1 %v16968_v51, %s15191_s23 }
0x1a2e   :  { %12113 = vrot.lane.b32.xlu0 %v16978_v62, %s15191_s23 }
0x1a31   :  { %12189 = vrot.lane.b32.xlu1 %v16988_v23, %s15191_s23 }
0x1a49   :  { %v11723_v47 = vpop.xlane.xlu0 %11722 }
0x1a4a   :  { %v11745_v63 = vsub.f32 %v11713_v50, %v11723_v47 }
0x1a4c   :  { %v11753_v3 = vmul.f32 1.442695, %v11745_v63 }
0x1a4d   :  { %v11729_v5 = vpop.xlane.xlu0 %11728 }
0x1a4e   :  { %15004 = vpow2.f32 %v11753_v3  ;;  %v11747_v36 = vsub.f32 %v11715_v41, %v11729_v5 }
0x1a50   :  { %v11757_v60 = vmul.f32 1.442695, %v11747_v36 }
0x1a52   :  { %15006 = vpow2.f32 %v11757_v60 }
0x1a5b   :  { %v17552_v44 = vpop.eup %15004 }
0x1a5c   :  { %v11769_v43 = vsel %vm606_vm2, %v17552_v44, 0.0 }
0x1a5d   :  { %11770 = vadd.xlane.f32.xlu0 %v11769_v43 }
0x1a5f   :  { %v17556_v51 = vpop.eup %15006 }
0x1a60   :  { %v11775_v62 = vsel %vm606_vm2, %v17556_v51, 0.0 }
0x1a61   :  { %11776 = vadd.xlane.f32.xlu0 %v11775_v62 }
0x1a91   :  { %v11726_v23 = vpop.xlane.xlu1 %11725 }
0x1a92   :  { %v11746_v50 = vsub.f32 %v11714_v16, %v11726_v23 }
0x1a94   :  { %v11755_v37 = vmul.f32 1.442695, %v11746_v50 }
0x1a95   :  { %v11732_v15 = vpop.xlane.xlu0 %11731 }
0x1a96   :  { %15008 = vpow2.f32 %v11755_v37  ;;  %v11748_v41 = vsub.f32 %v11716_v29, %v11732_v15 }
0x1a98   :  { %v11759_v11 = vmul.f32 1.442695, %v11748_v41 }
0x1a99   :  { %v11738_v42 = vpop.xlane.xlu1 %11737  ;;  %v11735_v49 = vpop.xlane.xlu0 %11734 }
0x1a9a   :  { %15010 = vpow2.f32 %v11759_v11  ;;  %v11750_v18 = vsub.f32 %v11718_v2, %v11738_v42  ;;  %v11749_v25 = vsub.f32 %v11717_v54, %v11735_v49 }
0x1a9c   :  { %v11763_v57 = vmul.f32 1.442695, %v11750_v18  ;;  %v11761_v22 = vmul.f32 1.442695, %v11749_v25 }
0x1a9d   :  { %v11744_v52 = vpop.xlane.xlu1 %11743  ;;  %v11741_v19 = vpop.xlane.xlu0 %11740 }
0x1a9e   :  { %15012 = vpow2.f32 %v11763_v57  ;;  %v11752_v46 = vsub.f32 %v11720_v59, %v11744_v52  ;;  %v11751_v31 = vsub.f32 %v11719_v9, %v11741_v19 }
0x1a9f   :  { %15014 = vpow2.f32 %v11761_v22 }
0x1aa0   :  { %v11767_v55 = vmul.f32 1.442695, %v11752_v46  ;;  %v11765_v16 = vmul.f32 1.442695, %v11751_v31 }
0x1aa1   :  { %v11886_v26 = vpop.permute.xlu1 %11885  ;;  %v11810_v10 = vpop.permute.xlu0 %11809 }
0x1aa2   :  { %15016 = vpow2.f32 %v11767_v55  ;;  %14598 = vmatpush3.msra.mxu0 %v11810_v10  ;;  %14603 = vmatpush3.msra.mxu1 %v11886_v26  ;;  %v12540_v26 = vld [vmem:[#allocation7 + $0x30] sm:$0xff]  ;;  %v12539_v10 = vld [vmem:[#allocation7 + $0x28] sm:$0xff] }
0x1aa3   :  { %v17560_v29 = vpop.eup %15008  ;;  %15018 = vpow2.f32 %v11765_v16  ;;  %14607 = vmatprep.subr.mxu0 %v17922_v17  ;;  %14612 = vmatprep.subr.mxu1 %v17922_v17 }
0x1aa4   :  { %v11772_v54 = vsel %vm606_vm2, %v17560_v29, 0.0 }
0x1aa5   :  { %11773 = vadd.xlane.f32.xlu1 %v11772_v54 }
0x1aa7   :  { %v17566_v2 = vpop.eup %15010 }
0x1aa8   :  { %v11778_v9 = vsel %vm606_vm2, %v17566_v2, 0.0 }
0x1aa9   :  { %11779 = vadd.xlane.f32.xlu1 %v11778_v9 }
0x1aab   :  { %v17570_v59 = vpop.eup %15012 }
0x1aac   :  { %v17572_v58 = vpop.eup %15014  ;;  %v11784_v47 = vsel %vm606_vm2, %v17570_v59, 0.0 }
0x1aad   :  { %11785 = vadd.xlane.f32.xlu1 %v11784_v47  ;;  %v11781_v63 = vsel %vm606_vm2, %v17572_v58, 0.0 }
0x1aae   :  { %11782 = vadd.xlane.f32.xlu0 %v11781_v63 }
0x1aaf   :  { %v17578_v3 = vpop.eup %15016 }
0x1ab0   :  { %v17580_v5 = vpop.eup %15018  ;;  %v11790_v36 = vsel %vm606_vm2, %v17578_v3, 0.0 }
0x1ab1   :  { %11791 = vadd.xlane.f32.xlu1 %v11790_v36  ;;  %v11787_v60 = vsel %vm606_vm2, %v17580_v5, 0.0 }
0x1ab2   :  { %11788 = vadd.xlane.f32.xlu0 %v11787_v60 }
0x1ac2   :  { %12341 = vrot.lane.b32.xlu1 %v17033_v0, %s15191_s23 }
0x1ac6   :  { %12427 = vrot.lane.b32.xlu1 %v17292_v45, %s15178_s28 }
0x1ac8   :  { %12265 = vrot.lane.b32.xlu0 %v16998_v39, %s15191_s23  ;;  %v12114_v39 = vpop.permute.xlu0 %12113 }
0x1aca   :  { %12459 = vrot.lane.b32.xlu1 %v17512_v61, %s15192_s7 }
0x1acc   :  { %12425 = vrot.lane.b32.xlu0 %v17288_v20, %s15178_s28 }
0x1ace   :  { %12431 = vrot.lane.b32.xlu1 %v17294_v56, %s15178_s28  ;;  %v11962_v56 = vpop.permute.xlu1 %11961 }
0x1ad0   :  { %12457 = vrot.lane.b32.xlu0 %v17508_v4, %s15192_s7 }
0x1ad2   :  { %12463 = vrot.lane.b32.xlu1 %v17514_v21, %s15192_s7 }
0x1ad4   :  { %12429 = vrot.lane.b32.xlu0 %v17290_v40, %s15178_s28 }
0x1ad6   :  { %12435 = vrot.lane.b32.xlu1 %v17296_v1, %s15178_s28 }
0x1ad8   :  { %12461 = vrot.lane.b32.xlu0 %v17510_v28, %s15192_s7 }
0x1ada   :  { %12467 = vrot.lane.b32.xlu1 %v17516_v35, %s15192_s7 }
0x1adc   :  { %12433 = vrot.lane.b32.xlu0 %v17298_v6, %s15178_s28 }
0x1ade   :  { %12439 = vrot.lane.b32.xlu1 %v17306_v8, %s15178_s28 }
0x1ae0   :  { %12465 = vrot.lane.b32.xlu0 %v17518_v32, %s15192_s7 }
0x1ae2   :  { %12471 = vrot.lane.b32.xlu1 %v17526_v30, %s15192_s7 }
0x1ae4   :  { %12437 = vrot.lane.b32.xlu0 %v17300_v38, %s15178_s28  ;;  %v12038_v38 = vpop.permute.xlu1 %12037 }
0x1ae6   :  { %v11771_v0 = vpop.xlane.xlu0 %11770 }
0x1ae7   :  { %15020 = vrcp.f32 %v11771_v0 }
0x1ae8   :  { %12469 = vrot.lane.b32.xlu0 %v17520_v34, %s15192_s7  ;;  %v12190_v8 = vpop.permute.xlu1 %12189 }
0x1aea   :  { %v11777_v20 = vpop.xlane.xlu0 %11776 }
0x1aeb   :  { %15022 = vrcp.f32 %v11777_v20 }
0x1af4   :  { %v15021_v40 = vpop.eup %15020 }
0x1af5   :  { %v11801_v45 = vmul.f32 %v15021_v40, %v17552_v44 }
0x1af7   :  { %14600 = vmatmul.mubr.msk.f32.vlgmr.msra.gmra.mxu0 %vm606_vm2, %v11801_v45 }
0x1af8   :  { %v15023_v1 = vpop.eup %15022  ;;  %14608 = vmatpush3.msra.mxu0 %v11962_v56  ;;  %14609 = vmatprep.mubr.msk.f32.mxu0 %vm15183_vm1, %v17922_v17 }
0x1af9   :  { %v11803_v6 = vmul.f32 %v15023_v1, %v17556_v51  ;;  %14617 = vmatprep.subr.mxu0 %v17922_v17 }
0x1afb   :  { %14610 = vmatmul.mubr.msk.f32.vlgmr.msra.gmra.mxu0 %vm606_vm2, %v11803_v6 }
0x1afc   :  { %14618 = vmatpush3.msra.mxu0 %v12114_v39  ;;  %14619 = vmatprep.mubr.msk.f32.mxu0 %vm15183_vm1, %v17922_v17 }
0x1afd   :  { %14627 = vmatprep.subr.mxu0 %v17922_v17 }
0x1b2e   :  { %v11774_v4 = vpop.xlane.xlu1 %11773 }
0x1b2f   :  { %15024 = vrcp.f32 %v11774_v4 }
0x1b32   :  { %v11780_v28 = vpop.xlane.xlu1 %11779 }
0x1b33   :  { %15026 = vrcp.f32 %v11780_v28 }
0x1b36   :  { %v11786_v61 = vpop.xlane.xlu1 %11785 }
0x1b37   :  { %15028 = vrcp.f32 %v11786_v61  ;;  %v11783_v21 = vpop.xlane.xlu0 %11782 }
0x1b38   :  { %15030 = vrcp.f32 %v11783_v21 }
0x1b3a   :  { %v11792_v35 = vpop.xlane.xlu1 %11791 }
0x1b3b   :  { %15032 = vrcp.f32 %v11792_v35  ;;  %v11789_v32 = vpop.xlane.xlu0 %11788 }
0x1b3c   :  { %v15025_v34 = vpop.eup %15024  ;;  %15034 = vrcp.f32 %v11789_v32 }
0x1b3d   :  { %v11802_v30 = vmul.f32 %v15025_v34, %v17560_v29 }
0x1b3e   :  { %v12342_v41 = vpop.permute.xlu1 %12341 }
0x1b3f   :  { %v12266_v44 = vpop.permute.xlu0 %12265  ;;  %14605 = vmatmul.mubr.msk.f32.vlgmr.msra.gmra.mxu1 %vm606_vm2, %v11802_v30 }
0x1b40   :  { %v15027_v43 = vpop.eup %15026  ;;  %14613 = vmatpush3.msra.mxu1 %v12038_v38  ;;  %14614 = vmatprep.mubr.msk.f32.mxu1 %vm15183_vm1, %v17922_v17 }
0x1b41   :  { %v11804_v51 = vmul.f32 %v15027_v43, %v17566_v2  ;;  %14622 = vmatprep.subr.mxu1 %v17922_v17  ;;  %v12538_v2 = vld [vmem:[#allocation7 + $0x20] sm:$0xff] }
0x1b43   :  { %v17638_v62 = vpop.permute.xlu0 %12425  ;;  %14615 = vmatmul.mubr.msk.f32.vlgmr.msra.gmra.mxu1 %vm606_vm2, %v11804_v51 }
0x1b44   :  { %v15029_v23 = vpop.eup %15028  ;;  %14623 = vmatpush3.msra.mxu1 %v12190_v8  ;;  %14624 = vmatprep.mubr.msk.f32.mxu1 %vm15183_vm1, %v17922_v17  ;;  %v12513_v56 = vsel %vm606_vm2, %v17067_v33, %v17638_v62  ;;  %v12428_v8 = vpop.permute.xlu1 %12427 }
0x1b45   :  { %v15031_v50 = vpop.eup %15030  ;;  %v11806_v37 = vmul.f32 %v15029_v23, %v17570_v59  ;;  %14632 = vmatprep.subr.mxu1 %v17922_v17  ;;  %v12514_v30 = vsel %vm606_vm2, %v17069_v7, %v12428_v8  ;;  %v17928_v8 = vld [vmem:[#allocation20_spill] sm:$0xff] }
0x1b46   :  { %v11805_v15 = vmul.f32 %v15031_v50, %v17572_v58 }
0x1b47   :  { %v12458_v11 = vpop.permute.xlu0 %12457  ;;  %14625 = vmatmul.mubr.msk.f32.vlgmr.msra.gmra.mxu1 %vm606_vm2, %v11806_v37 }
0x1b48   :  { %v15033_v42 = vpop.eup %15032  ;;  %14620 = vmatmul.mubr.msk.f32.vlgmr.msra.gmra.mxu0 %vm606_vm2, %v11805_v15  ;;  %14633 = vmatpush3.msra.mxu1 %v12342_v41  ;;  %v12521_v1 = vsel %vm6068_vm4, %v12513_v56, %v12458_v11  ;;  %v12460_v4 = vpop.permute.xlu1 %12459 }
0x1b49   :  { %v15035_v49 = vpop.eup %15034  ;;  %v11808_v18 = vmul.f32 %v15033_v42, %v17578_v3  ;;  %14628 = vmatpush3.msra.mxu0 %v12266_v44  ;;  %14634 = vmatprep.mubr.msk.f32.mxu1 %vm15183_vm1, %v17922_v17  ;;  %v12522_v33 = vsel %vm6068_vm4, %v12514_v30, %v12460_v4 }
0x1b4a   :  { %v11807_v25 = vmul.f32 %v15035_v49, %v17580_v5  ;;  %14629 = vmatprep.mubr.msk.f32.mxu0 %vm15183_vm1, %v17922_v17  ;;  %v12541_v17 = vld [vmem:[#allocation7 + $0x38] sm:$0xff] }
0x1b4b   :  { %v12430_v57 = vpop.permute.xlu0 %12429  ;;  %14635 = vmatmul.mubr.msk.f32.vlgmr.msra.gmra.mxu1 %vm606_vm2, %v11808_v18  ;;  %14637 = vmatprep.subr.mxu0 %v12541_v17 }
0x1b4c   :  { %14630 = vmatmul.mubr.msk.f32.vlgmr.msra.gmra.mxu0 %vm606_vm2, %v11807_v25  ;;  %v12515_v22 = vsel %vm606_vm2, %v17071_v24, %v12430_v57  ;;  %v12432_v28 = vpop.permute.xlu1 %12431 }
0x1b4d   :  { %14638 = vmatpush3.msra.mxu0 %v12541_v17  ;;  %v12516_v23 = vsel %vm606_vm2, %v17073_v14, %v12432_v28 }
0x1b4e   :  { %14639 = vmatprep.subr.mxu0 %v12540_v26 }
0x1b4f   :  { %v12462_v52 = vpop.permute.xlu0 %12461  ;;  %14640 = vmatpush3.msra.mxu0 %v12540_v26 }
0x1b50   :  { %v12523_v19 = vsel %vm6068_vm4, %v12515_v22, %v12462_v52  ;;  %14641 = vmatprep.subr.mxu0 %v12539_v10  ;;  %v12464_v61 = vpop.permute.xlu1 %12463 }
0x1b51   :  { %14642 = vmatpush3.msra.mxu0 %v12539_v10  ;;  %v12524_v50 = vsel %vm6068_vm4, %v12516_v23, %v12464_v61  ;;  %v17923_v10 = vld [vmem:[#allocation15_spill] sm:$0xff]  ;;  %v17929_v61 = vld [vmem:[#allocation21_spill] sm:$0xff] }
0x1b52   :  { %14643 = vmatprep.subr.mxu0 %v12538_v2 }
0x1b53   :  { %v12434_v46 = vpop.permute.xlu0 %12433  ;;  %14644 = vmatpush3.msra.mxu0 %v12538_v2  ;;  %v17924_v2 = vld [vmem:[#allocation16_spill] sm:$0xff] }
0x1b54   :  { %v12517_v31 = vsel %vm606_vm2, %v17075_v53, %v12434_v46  ;;  %v12436_v21 = vpop.permute.xlu1 %12435 }
0x1b55   :  { %v12518_v15 = vsel %vm606_vm2, %v17086_v12, %v12436_v21 }
0x1b57   :  { %v12466_v55 = vpop.permute.xlu0 %12465 }
0x1b58   :  { %v17662_v16 = vsel %vm6068_vm4, %v12517_v31, %v12466_v55  ;;  %v12468_v35 = vpop.permute.xlu1 %12467 }
0x1b59   :  { %v12526_v41 = vsel %vm6068_vm4, %v12518_v15, %v12468_v35 }
0x1b5b   :  { %v12438_v40 = vpop.permute.xlu0 %12437 }
0x1b5c   :  { %v12440_v32 = vpop.permute.xlu1 %12439  ;;  %v12519_v25 = vsel %vm606_vm2, %v17077_v48, %v12438_v40  ;;  %v13424_v48 = vld [vmem:[%s17891_s10 + $0x1] ss:$0 sm:$0xff]  ;;  %v17927_v40 = vld [vmem:[#allocation19_spill] sm:$0xff] }
0x1b5d   :  { %v12520_v18 = vsel %vm606_vm2, %v17088_v27, %v12440_v32 }
0x1b5f   :  { %v12470_v45 = vpop.permute.xlu0 %12469 }
0x1b60   :  { %v12472_v34 = vpop.permute.xlu1 %12471  ;;  %v12527_v22 = vsel %vm6068_vm4, %v12519_v25, %v12470_v45 }
0x1b61   :  { %v12528_v57 = vsel %vm6068_vm4, %v12520_v18, %v12472_v34 }
0x1bb7   :  { %v11881_v24 = vpop.f32.mrf.mxu0 }
0x1bb8   :  { %12489 = vrot.lane.b32.xlu0 %v11881_v24, %s15193_s24 }
0x1bb9   :  { %v14601_v29 = vpop.f32.mrf.mxu0 }
0x1bbb   :  { %v12033_v54 = vpop.f32.mrf.mxu0 }
0x1bbc   :  { %12493 = vrot.lane.b32.xlu0 %v12033_v54, %s15193_s24 }
0x1bbd   :  { %v14611_v53 = vpop.f32.mrf.mxu0 }
0x1bff   :  { %v11957_v9 = vpop.f32.mrf.mxu1 }
0x1c00   :  { %12491 = vrot.lane.b32.xlu1 %v11957_v9, %s15193_s24 }
0x1c01   :  { %v14606_v59 = vpop.f32.mrf.mxu1 }
0x1c03   :  { %v12109_v58 = vpop.f32.mrf.mxu1 }
0x1c04   :  { %12495 = vrot.lane.b32.xlu1 %v12109_v58, %s15193_s24 }
0x1c05   :  { %v14616_v47 = vpop.f32.mrf.mxu1 }
0x1c06   :  { %v17925_v47 = vld [vmem:[#allocation17_spill] sm:$0xff] }
0x1c07   :  { %v12261_v63 = vpop.f32.mrf.mxu1 }
0x1c08   :  { %v12185_v3 = vpop.f32.mrf.mxu0  ;;  %12499 = vrot.lane.b32.xlu1 %v12261_v63, %s15193_s24 }
0x1c09   :  { %12497 = vrot.lane.b32.xlu0 %v12185_v3, %s15193_s24  ;;  %v14626_v5 = vpop.f32.mrf.mxu1 }
0x1c0a   :  { %v14621_v36 = vpop.f32.mrf.mxu0 }
0x1c0b   :  { %v12413_v60 = vpop.f32.mrf.mxu1 }
0x1c0c   :  { %v12337_v39 = vpop.f32.mrf.mxu0  ;;  %12503 = vrot.lane.b32.xlu1 %v12413_v60, %s15193_s24  ;;  %v17926_v60 = vld [vmem:[#allocation18_spill] sm:$0xff] }
0x1c0d   :  { %12501 = vrot.lane.b32.xlu0 %v12337_v39, %s15193_s24  ;;  %v14636_v0 = vpop.f32.mrf.mxu1 }
0x1c0e   :  { %v14631_v20 = vpop.f32.mrf.mxu0 }
0x1c2a   :  { %v12490_v6 = vpop.permute.xlu0 %12489 }
0x1c2b   :  { %v12529_v38 = vsel %vm6077_vm5, %v12521_v1, %v12490_v6 }
0x1c2c   :  { %14645 = vmatprep.mubr.msk.f32.mxu0 %vm181_vm0, %v12529_v38 }
0x1c2e   :  { %v12494_v44 = vpop.permute.xlu0 %12493 }
0x1c2f   :  { %v12531_v62 = vsel %vm6077_vm5, %v12523_v19, %v12494_v44 }
0x1c72   :  { %v12492_v43 = vpop.permute.xlu1 %12491 }
0x1c73   :  { %v12530_v51 = vsel %vm6077_vm5, %v12522_v33, %v12492_v43 }
0x1c74   :  { %14646 = vmatmul.mubr.msk.f32.vlgmr.msra.gmra.mxu0 %vm181_vm0, %v12530_v51 }
0x1c75   :  { %14648 = vmatprep.mubr.msk.f32.mxu0 %vm181_vm0, %v12531_v62 }
0x1c76   :  { %v12496_v37 = vpop.permute.xlu1 %12495 }
0x1c77   :  { %v12532_v7 = vsel %vm6077_vm5, %v12524_v50, %v12496_v37 }
0x1c78   :  { %14649 = vmatmul.mubr.msk.f32.gmra.mxu0 %vm181_vm0, %v12532_v7 }
0x1c7a   :  { %v12500_v11 = vpop.permute.xlu1 %12499 }
0x1c7b   :  { %v12534_v42 = vsel %vm6077_vm5, %v12526_v41, %v12500_v11  ;;  %v12498_v49 = vpop.permute.xlu0 %12497 }
0x1c7c   :  { %v12533_v14 = vsel %vm6077_vm5, %v17662_v16, %v12498_v49 }
0x1c7d   :  { %14651 = vmatprep.mubr.msk.f32.mxu0 %vm181_vm0, %v12533_v14 }
0x1c7e   :  { %14652 = vmatmul.mubr.msk.f32.gmra.mxu0 %vm181_vm0, %v12534_v42  ;;  %v12504_v12 = vpop.permute.xlu1 %12503 }
0x1c7f   :  { %v12536_v52 = vsel %vm6077_vm5, %v12528_v57, %v12504_v12  ;;  %v12502_v19 = vpop.permute.xlu0 %12501 }
0x1c80   :  { %v12535_v46 = vsel %vm6077_vm5, %v12527_v22, %v12502_v19 }
0x1c81   :  { %14654 = vmatprep.mubr.msk.f32.mxu0 %vm181_vm0, %v12535_v46 }
0x1c82   :  { %14655 = vmatmul.mubr.msk.f32.gmra.mxu0 %vm181_vm0, %v12536_v52 }
0x1d34   :  { %v14647_v27 = vpop.f32.mrf.mxu0 }
0x1d35   :  { %v12646_v31 = vadd.f32 %v14647_v27, %v13424_v48 }
0x1d36   :  { %v12640_v55 = vpop.f32.mrf.mxu0 }
0x1d37   :  { %v17712_v16 = vadd.f32 %v12646_v31, %v16570_v13  ;;  %v12641_v17 = vadd.f32 %v13424_v48, %v12640_v55 }
0x1d38   :  { %v14650_v26 = vpop.f32.mrf.mxu0 }
0x1d39   :  { %v17715_v24 = vadd.f32 %v12641_v17, %v17923_v10  ;;  %v12656_v29 = vadd.f32 %v14650_v26, %v13424_v48  ;;  %v12694_v54 = vsel %vm181_vm0, %v17712_v16, 0.0 }
0x1d3a   :  { %12695 = vadd.xlane.f32.xlu1 %v12694_v54  ;;  %v12650_v53 = vpop.f32.mrf.mxu0 }
0x1d3b   :  { %v17720_v9 = vadd.f32 %v12656_v29, %v17924_v2  ;;  %v12651_v59 = vadd.f32 %v13424_v48, %v12650_v53  ;;  %v12691_v58 = vsel %vm181_vm0, %v17715_v24, 0.0 }
0x1d3c   :  { %12692 = vadd.xlane.f32.xlu0 %v12691_v58 }
0x1d3d   :  { %v17725_v63 = vadd.f32 %v12651_v59, %v17925_v47  ;;  %v12700_v5 = vsel %vm181_vm0, %v17720_v9, 0.0 }
0x1d3e   :  { %v14653_v13 = vpop.f32.mrf.mxu0 }
0x1d3f   :  { %v12666_v3 = vadd.f32 %v14653_v13, %v13424_v48  ;;  %v12697_v6 = vsel %vm181_vm0, %v17725_v63, 0.0 }
0x1d40   :  { %v12660_v36 = vpop.f32.mrf.mxu0  ;;  %12701 = vadd.xlane.f32.xlu0 %v12700_v5  ;;  %v12827_v5 = vld [vmem:[#allocation8 + $0x38] sm:$0xff] }
0x1d41   :  { %v17730_v39 = vadd.f32 %v12666_v3, %v17926_v60  ;;  %v12661_v0 = vadd.f32 %v13424_v48, %v12660_v36  ;;  %14657 = vmatprep.subr.mxu1 %v12827_v5  ;;  %v12826_v36 = vld [vmem:[#allocation8 + $0x30] sm:$0xff]  ;;  %v12825_v60 = vld [vmem:[#allocation8 + $0x28] sm:$0xff] }
0x1d42   :  { %v14656_v20 = vpop.f32.mrf.mxu0  ;;  %14658 = vmatpush3.msra.mxu1 %v12827_v5 }
0x1d43   :  { %v17733_v45 = vadd.f32 %v12661_v0, %v17927_v40  ;;  %v12676_v56 = vadd.f32 %v14656_v20, %v13424_v48  ;;  %v12706_v1 = vsel %vm181_vm0, %v17730_v39, 0.0  ;;  %14659 = vmatprep.subr.mxu1 %v12826_v36  ;;  %v12824_v0 = vld [vmem:[#allocation8 + $0x20] sm:$0xff]  ;;  %v13454_v20 = vld [vmem:[%s17896_s15 + $0x78] sm:$0xff]  ;;  %v13453_v40 = vld [vmem:[%s17896_s15 + $0x70] sm:$0xff] }
0x1d44   :  { %12707 = vadd.xlane.f32.xlu1 %v12706_v1  ;;  %v12670_v38 = vpop.f32.mrf.mxu0  ;;  %12698 = vadd.xlane.f32.xlu0 %v12697_v6  ;;  %v13451_v1 = vld [vmem:[%s17896_s15 + $0x60] sm:$0xff] }
0x1d45   :  { %v17740_v4 = vadd.f32 %v12676_v56, %v17928_v8  ;;  %v12671_v28 = vadd.f32 %v13424_v48, %v12670_v38  ;;  %v12703_v32 = vsel %vm181_vm0, %v17733_v45, 0.0  ;;  %14660 = vmatpush3.msra.mxu1 %v12826_v36  ;;  %14677 = vmatprep.subr.mxu0 %v13454_v20  ;;  %v13452_v56 = vld [vmem:[%s17896_s15 + $0x68] sm:$0xff] }
0x1d46   :  { %14661 = vmatprep.subr.mxu1 %v12825_v60  ;;  %14678 = vmatpush3.msra.mxu0 %v13454_v20 }
0x1d47   :  { %v17743_v21 = vadd.f32 %v12671_v28, %v17929_v61  ;;  %v12712_v35 = vsel %vm181_vm0, %v17740_v4, 0.0  ;;  %14662 = vmatpush3.msra.mxu1 %v12825_v60  ;;  %14679 = vmatprep.subr.mxu0 %v13453_v40 }
0x1d48   :  { %12713 = vadd.xlane.f32.xlu1 %v12712_v35  ;;  %12704 = vadd.xlane.f32.xlu0 %v12703_v32 }
0x1d49   :  { %v12709_v34 = vsel %vm181_vm0, %v17743_v21, 0.0  ;;  %14663 = vmatprep.subr.mxu1 %v12824_v0  ;;  %14680 = vmatpush3.msra.mxu0 %v13453_v40 }
0x1d4a   :  { %14664 = vmatpush3.msra.mxu1 %v12824_v0  ;;  %14681 = vmatprep.subr.mxu0 %v13452_v56 }
0x1d4b   :  { %14682 = vmatpush3.msra.mxu0 %v13452_v56 }
0x1d4c   :  { %12710 = vadd.xlane.f32.xlu0 %v12709_v34  ;;  %14683 = vmatprep.subr.mxu0 %v13451_v1 }
0x1d4d   :  { %14684 = vmatpush3.msra.mxu0 %v13451_v1 }
0x1dc3   :  { %v12696_v30 = vpop.xlane.xlu1 %12695 }
0x1dc4   :  { %v12716_v44 = vmul.f32 0.03125, %v12696_v30 }
0x1dc5   :  { %v12693_v33 = vpop.xlane.xlu0 %12692 }
0x1dc6   :  { %v17752_v43 = vsub.f32 %v17712_v16, %v12716_v44  ;;  %v12715_v51 = vmul.f32 0.03125, %v12693_v33 }
0x1dc8   :  { %v17755_v62 = vsub.f32 %v17715_v24, %v12715_v51  ;;  %v12732_v23 = vmul.f32 %v17752_v43, %v17752_v43 }
0x1dc9   :  { %v12702_v50 = vpop.xlane.xlu0 %12701 }
0x1dca   :  { %v12718_v37 = vmul.f32 0.03125, %v12702_v50  ;;  %v12742_v7 = vsel %vm181_vm0, %v12732_v23, 0.0  ;;  %v12731_v15 = vmul.f32 %v17755_v62, %v17755_v62 }
0x1dcb   :  { %12743 = vadd.xlane.f32.xlu1 %v12742_v7 }
0x1dcc   :  { %v17763_v41 = vsub.f32 %v17720_v9, %v12718_v37  ;;  %v12739_v11 = vsel %vm181_vm0, %v12731_v15, 0.0 }
0x1dcd   :  { %v12708_v42 = vpop.xlane.xlu1 %12707  ;;  %12740 = vadd.xlane.f32.xlu0 %v12739_v11  ;;  %v12699_v49 = vpop.xlane.xlu0 %12698 }
0x1dce   :  { %v12720_v14 = vmul.f32 0.03125, %v12708_v42  ;;  %v12717_v18 = vmul.f32 0.03125, %v12699_v49  ;;  %v12734_v25 = vmul.f32 %v17763_v41, %v17763_v41 }
0x1dd0   :  { %v17769_v57 = vsub.f32 %v17730_v39, %v12720_v14  ;;  %v17772_v12 = vsub.f32 %v17725_v63, %v12717_v18  ;;  %v12748_v22 = vsel %vm181_vm0, %v12734_v25, 0.0 }
0x1dd1   :  { %v12714_v52 = vpop.xlane.xlu1 %12713  ;;  %12749 = vadd.xlane.f32.xlu1 %v12748_v22  ;;  %v12705_v19 = vpop.xlane.xlu0 %12704  ;;  %v13435_v22 = vld [vmem:[%s17892_s11 + $0x1] ss:$0 sm:$0xff] }
0x1dd2   :  { %v12722_v46 = vmul.f32 0.03125, %v12714_v52  ;;  %v12719_v48 = vmul.f32 0.03125, %v12705_v19  ;;  %v12736_v27 = vmul.f32 %v17769_v57, %v17769_v57  ;;  %v12733_v31 = vmul.f32 %v17772_v12, %v17772_v12 }
0x1dd4   :  { %v17780_v55 = vsub.f32 %v17740_v4, %v12722_v46  ;;  %v17783_v17 = vsub.f32 %v17733_v45, %v12719_v48  ;;  %v12754_v26 = vsel %vm181_vm0, %v12736_v27, 0.0  ;;  %v12745_v10 = vsel %vm181_vm0, %v12733_v31, 0.0 }
0x1dd5   :  { %12755 = vadd.xlane.f32.xlu1 %v12754_v26  ;;  %12746 = vadd.xlane.f32.xlu0 %v12745_v10  ;;  %v12711_v29 = vpop.xlane.xlu0 %12710  ;;  %v13436_v26 = vld [vmem:[%s17893_s12 + $0x1] ss:$0 sm:$0xff] }
0x1dd6   :  { %v12721_v54 = vmul.f32 0.03125, %v12711_v29  ;;  %v12738_v53 = vmul.f32 %v17780_v55, %v17780_v55  ;;  %v12735_v2 = vmul.f32 %v17783_v17, %v17783_v17 }
0x1dd8   :  { %v17792_v59 = vsub.f32 %v17743_v21, %v12721_v54  ;;  %v12760_v58 = vsel %vm181_vm0, %v12738_v53, 0.0  ;;  %v12751_v13 = vsel %vm181_vm0, %v12735_v2, 0.0 }
0x1dd9   :  { %12761 = vadd.xlane.f32.xlu1 %v12760_v58  ;;  %12752 = vadd.xlane.f32.xlu0 %v12751_v13 }
0x1dda   :  { %v12737_v47 = vmul.f32 %v17792_v59, %v17792_v59 }
0x1ddc   :  { %v12757_v3 = vsel %vm181_vm0, %v12737_v47, 0.0 }
0x1ddd   :  { %12758 = vadd.xlane.f32.xlu0 %v12757_v3 }
0x1e54   :  { %v12744_v6 = vpop.xlane.xlu1 %12743 }
0x1e55   :  { %v12764_v38 = vmul.f32 0.03125, %v12744_v6 }
0x1e56   :  { %v12741_v8 = vpop.xlane.xlu0 %12740 }
0x1e57   :  { %v12772_v28 = vadd.f32 1e-05, %v12764_v38  ;;  %v12763_v61 = vmul.f32 0.03125, %v12741_v8 }
0x1e59   :  { %15036 = vrsqrt.f32 %v12772_v28  ;;  %v12771_v35 = vadd.f32 1e-05, %v12763_v61  ;;  %v13450_v28 = vld [vmem:[%s17896_s15 + $0x58] sm:$0xff]  ;;  %v13448_v61 = vld [vmem:[%s17896_s15 + $0x48] sm:$0xff] }
0x1e5a   :  { %v12750_v32 = vpop.xlane.xlu1 %12749  ;;  %14685 = vmatprep.subr.mxu0 %v13450_v28 }
0x1e5b   :  { %15038 = vrsqrt.f32 %v12771_v35  ;;  %v12766_v34 = vmul.f32 0.03125, %v12750_v32  ;;  %14686 = vmatpush3.msra.mxu0 %v13450_v28  ;;  %v13447_v35 = vld [vmem:[%s17896_s15 + $0x40] sm:$0xff] }
0x1e5c   :  { %v13438_v32 = vld [vmem:[%s17895_s14 + $0x1] ss:$0 sm:$0xff] }
0x1e5d   :  { %v12774_v30 = vadd.f32 1e-05, %v12766_v34 }
0x1e5e   :  { %v12756_v44 = vpop.xlane.xlu1 %12755  ;;  %v12747_v33 = vpop.xlane.xlu0 %12746 }
0x1e5f   :  { %15040 = vrsqrt.f32 %v12774_v30  ;;  %v12768_v51 = vmul.f32 0.03125, %v12756_v44  ;;  %v12765_v23 = vmul.f32 0.03125, %v12747_v33 }
0x1e61   :  { %v12776_v50 = vadd.f32 1e-05, %v12768_v51  ;;  %v12773_v37 = vadd.f32 1e-05, %v12765_v23 }
0x1e62   :  { %v12762_v7 = vpop.xlane.xlu1 %12761  ;;  %v12753_v15 = vpop.xlane.xlu0 %12752 }
0x1e63   :  { %15042 = vrsqrt.f32 %v12776_v50  ;;  %v12770_v11 = vmul.f32 0.03125, %v12762_v7  ;;  %v12767_v42 = vmul.f32 0.03125, %v12753_v15 }
0x1e64   :  { %15044 = vrsqrt.f32 %v12773_v37 }
0x1e65   :  { %v12778_v49 = vadd.f32 1e-05, %v12770_v11  ;;  %v12775_v14 = vadd.f32 1e-05, %v12767_v42 }
0x1e66   :  { %v15037_v18 = vpop.eup %15036  ;;  %v12759_v25 = vpop.xlane.xlu0 %12758 }
0x1e67   :  { %v12788_v52 = vmul.f32 %v15037_v18, %v17752_v43  ;;  %15046 = vrsqrt.f32 %v12778_v49  ;;  %v12769_v19 = vmul.f32 0.03125, %v12759_v25 }
0x1e68   :  { %v15039_v46 = vpop.eup %15038  ;;  %15048 = vrsqrt.f32 %v12775_v14 }
0x1e69   :  { %v12777_v48 = vadd.f32 1e-05, %v12769_v19  ;;  %v12787_v27 = vmul.f32 %v15039_v46, %v17755_v62  ;;  %v12802_v31 = vmul.f32 %v13435_v22, %v12788_v52 }
0x1e6b   :  { %15050 = vrsqrt.f32 %v12777_v48  ;;  %v12801_v10 = vmul.f32 %v13435_v22, %v12787_v27  ;;  %v12816_v53 = vadd.f32 %v13436_v26, %v12802_v31 }
0x1e6c   :  { %v15041_v29 = vpop.eup %15040 }
0x1e6d   :  { %v12815_v54 = vadd.f32 %v13436_v26, %v12801_v10  ;;  %v12790_v2 = vmul.f32 %v15041_v29, %v17763_v41  ;;  %v13456_v10 = vld [vmem:[%s17897_s16 + $0x1] ss:$0 sm:$0xff]  ;;  %s15194_s16 = smov [#allocation10]  }
0x1e6e   :  { %s13140_s6 = sshll.u32 %s15194_s16, 4  ;;  %s13141_s6 = int_to_ptr.vmem [resolvable:$true] %s13140_s6 }
0x1e6f   :  { %14665 = vmatprep.mubr.msk.f32.mxu1 %vm181_vm0, %v12815_v54  ;;  %v12804_v47 = vmul.f32 %v13435_v22, %v12790_v2  ;;  %s15148_s2 = scalar_lea.vmem %s13141_s6, 1024  ;;  %p15153_p7 = scmp.lt.s32.totalorder %s13141_s6, %s13141_s6 }
0x1e70   :  { %v15043_v43 = vpop.eup %15042  ;;  %14666 = vmatmul.mubr.msk.f32.vlgmr.msra.gmra.mxu1 %vm181_vm0, %v12816_v53  ;;  %p15149_p6 = scmp.ne.s32.totalorder %s13141_s6, %s15148_s2  ;;  %p15154_p8 = scmp.lt.s32.totalorder %s15148_s2, %s15148_s2 }
0x1e71   :  { %v15045_v58 = vpop.eup %15044  ;;  %v12792_v13 = vmul.f32 %v15043_v43, %v17769_v57  ;;  %v12818_v41 = vadd.f32 %v13436_v26, %v12804_v47 }
0x1e72   :  { %v12789_v62 = vmul.f32 %v15045_v58, %v17772_v12  ;;  %p15155_p9 = por %p15154_p8, %p15153_p7 }
0x1e73   :  { %v12806_v40 = vmul.f32 %v13435_v22, %v12792_v13 }
0x1e74   :  { %v15047_v3 = vpop.eup %15046  ;;  %v12803_v5 = vmul.f32 %v13435_v22, %v12789_v62  ;;  %p15156_p10 = pnand %p15155_p9, %p15149_p6 }
0x1e75   :  { %v15049_v36 = vpop.eup %15048  ;;  %v12794_v20 = vmul.f32 %v15047_v3, %v17780_v55  ;;  %v12820_v6 = vadd.f32 %v13436_v26, %v12806_v40 }
0x1e76   :  { %v12817_v60 = vadd.f32 %v13436_v26, %v12803_v5  ;;  %v12791_v0 = vmul.f32 %v15049_v36, %v17783_v17 }
0x1e77   :  { %v12808_v8 = vmul.f32 %v13435_v22, %v12794_v20 }
0x1e78   :  { %v15051_v56 = vpop.eup %15050  ;;  %14668 = vmatprep.mubr.msk.f32.mxu1 %vm181_vm0, %v12817_v60  ;;  %v12805_v1 = vmul.f32 %v13435_v22, %v12791_v0 }
0x1e79   :  { %14669 = vmatmul.mubr.msk.f32.gmra.mxu1 %vm181_vm0, %v12818_v41  ;;  %v12793_v12 = vmul.f32 %v15051_v56, %v17792_v59  ;;  %v12822_v55 = vadd.f32 %v13436_v26, %v12808_v8  ;;  %v13449_v59 = vld [vmem:[%s17896_s15 + $0x50] sm:$0xff] }
0x1e7a   :  { %v12819_v57 = vadd.f32 %v13436_v26, %v12805_v1  ;;  %14687 = vmatprep.subr.mxu0 %v13449_v59 }
0x1e7b   :  { %v12807_v38 = vmul.f32 %v13435_v22, %v12793_v12  ;;  %14688 = vmatpush3.msra.mxu0 %v13449_v59 }
0x1e7c   :  { %14671 = vmatprep.mubr.msk.f32.mxu1 %vm181_vm0, %v12819_v57  ;;  %14689 = vmatprep.subr.mxu0 %v13448_v61 }
0x1e7d   :  { %14672 = vmatmul.mubr.msk.f32.gmra.mxu1 %vm181_vm0, %v12820_v6  ;;  %v12821_v17 = vadd.f32 %v13436_v26, %v12807_v38  ;;  %14690 = vmatpush3.msra.mxu0 %v13448_v61 }
0x1e7e   :  { %14691 = vmatprep.subr.mxu0 %v13447_v35 }
0x1e7f   :  { %14674 = vmatprep.mubr.msk.f32.mxu1 %vm181_vm0, %v12821_v17  ;;  %14692 = vmatpush3.msra.mxu0 %v13447_v35 }
0x1e81   :  { %14675 = vmatmul.mubr.msk.f32.gmra.mxu1 %vm181_vm0, %v12822_v55 }
0x1f30   :  { %v14667_v34 = vpop.f32.mrf.mxu1 }
0x1f31   :  { %v12932_v30 = vadd.f32 %v14667_v34, %v13438_v32 }
0x1f32   :  { %v12926_v44 = vpop.f32.mrf.mxu1 }
0x1f33   :  { %v12927_v33 = vadd.f32 %v13438_v32, %v12926_v44  ;;  %v12966_v23 = vmax.f32 %v12932_v30, 0.0 }
0x1f35   :  { %v12965_v51 = vmax.f32 %v12927_v33, 0.0 }
0x1f37   :  { %14693 = vmatprep.mubr.msk.f32.mxu0 %vm6531_vm6, %v12965_v51 }
0x1f38   :  { %14694 = vmatmul.mubr.msk.f32.vlgmr.msra.gmra.mxu0 %vm6531_vm6, %v12966_v23 }
0x1f39   :  { %v14670_v50 = vpop.f32.mrf.mxu1 }
0x1f3a   :  { %v12942_v37 = vadd.f32 %v14670_v50, %v13438_v32 }
0x1f3b   :  { %v12936_v7 = vpop.f32.mrf.mxu1 }
0x1f3c   :  { %v12937_v15 = vadd.f32 %v13438_v32, %v12936_v7  ;;  %v12968_v49 = vmax.f32 %v12942_v37, 0.0 }
0x1f3d   :  { %v14673_v11 = vpop.f32.mrf.mxu1 }
0x1f3e   :  { %v12967_v42 = vmax.f32 %v12937_v15, 0.0  ;;  %v12952_v14 = vadd.f32 %v14673_v11, %v13438_v32 }
0x1f3f   :  { %v12946_v18 = vpop.f32.mrf.mxu1 }
0x1f40   :  { %v12947_v25 = vadd.f32 %v13438_v32, %v12946_v18  ;;  %14696 = vmatprep.mubr.msk.f32.mxu0 %vm6531_vm6, %v12967_v42  ;;  %v12970_v19 = vmax.f32 %v12952_v14, 0.0 }
0x1f41   :  { %v14676_v22 = vpop.f32.mrf.mxu1  ;;  %14697 = vmatmul.mubr.msk.f32.gmra.mxu0 %vm6531_vm6, %v12968_v49 }
0x1f42   :  { %v12969_v52 = vmax.f32 %v12947_v25, 0.0  ;;  %v12962_v46 = vadd.f32 %v14676_v22, %v13438_v32 }
0x1f43   :  { %v12956_v48 = vpop.f32.mrf.mxu1 }
0x1f44   :  { %v12957_v27 = vadd.f32 %v13438_v32, %v12956_v48  ;;  %14699 = vmatprep.mubr.msk.f32.mxu0 %vm6531_vm6, %v12969_v52  ;;  %v12972_v26 = vmax.f32 %v12962_v46, 0.0 }
0x1f45   :  { %14700 = vmatmul.mubr.msk.f32.gmra.mxu0 %vm6531_vm6, %v12970_v19 }
0x1f46   :  { %v12971_v31 = vmax.f32 %v12957_v27, 0.0 }
0x1f48   :  { %14702 = vmatprep.mubr.msk.f32.mxu0 %vm6531_vm6, %v12971_v31 }
0x1f49   :  { %14703 = vmatmul.mubr.msk.f32.gmra.mxu0 %vm6531_vm6, %v12972_v26 }
0x1ff8   :  { %v14695_v29 = vpop.f32.mrf.mxu0 }
0x1ff9   :  { %v13086_v54 = vadd.f32 %v14695_v29, %v13456_v10 }
0x1ffa   :  { %v13080_v53 = vpop.f32.mrf.mxu0 }
0x1ffb   :  { %v13120_v2 = vadd.f32 %v13086_v54, %v17712_v16  ;;  %v13081_v43 = vadd.f32 %v13456_v10, %v13080_v53 }
0x1ffd   :  { %13128 = vst.msk [vmem:[#allocation10 + $0x8] sm:$0xff] %vm181_vm0, %v13120_v2  ;;  %v13119_v58 = vadd.f32 %v13081_v43, %v17715_v24 }
0x1fff   :  { %13127 = vst.msk [vmem:[#allocation10] sm:$0xff] %vm181_vm0, %v13119_v58 }
0x2001   :  { %v14698_v62 = vpop.f32.mrf.mxu0 }
0x2002   :  { %v13096_v13 = vadd.f32 %v14698_v62, %v13456_v10 }
0x2003   :  { %v13090_v47 = vpop.f32.mrf.mxu0 }
0x2004   :  { %v13122_v3 = vadd.f32 %v13096_v13, %v17720_v9  ;;  %v13091_v5 = vadd.f32 %v13456_v10, %v13090_v47 }
0x2005   :  { %v14701_v36 = vpop.f32.mrf.mxu0 }
0x2006   :  { %13130 = vst.msk [vmem:[#allocation10 + $0x18] sm:$0xff] %vm181_vm0, %v13122_v3  ;;  %v13121_v60 = vadd.f32 %v13091_v5, %v17725_v63  ;;  %v13106_v0 = vadd.f32 %v14701_v36, %v13456_v10 }
0x2007   :  { %v13100_v16 = vpop.f32.mrf.mxu0 }
0x2008   :  { %13129 = vst.msk [vmem:[#allocation10 + $0x10] sm:$0xff] %vm181_vm0, %v13121_v60  ;;  %v13124_v20 = vadd.f32 %v13106_v0, %v17730_v39  ;;  %v13101_v24 = vadd.f32 %v13456_v10, %v13100_v16 }
0x2009   :  { %v14704_v41 = vpop.f32.mrf.mxu0 }
0x200a   :  { %13132 = vst.msk [vmem:[#allocation10 + $0x28] sm:$0xff] %vm181_vm0, %v13124_v20  ;;  %v13123_v40 = vadd.f32 %v13101_v24, %v17733_v45  ;;  %v13116_v56 = vadd.f32 %v14704_v41, %v13456_v10 }
0x200b   :  { %v13110_v9 = vpop.f32.mrf.mxu0 }
0x200c   :  { %13131 = vst.msk [vmem:[#allocation10 + $0x20] sm:$0xff] %vm181_vm0, %v13123_v40  ;;  %v13126_v63 = vadd.f32 %v13116_v56, %v17740_v4  ;;  %v13111_v1 = vadd.f32 %v13456_v10, %v13110_v9 }
0x200e   :  { %13134 = vst.msk [vmem:[#allocation10 + $0x38] sm:$0xff] %vm181_vm0, %v13126_v63  ;;  %v13125_v12 = vadd.f32 %v13111_v1, %v17743_v21 }
0x2010   :  { %13133 = vst.msk [vmem:[#allocation10 + $0x30] sm:$0xff] %vm181_vm0, %v13125_v12 }
0x2011   :  { %15159 = shalt.err (!%p15156_p10)
}
0x2012   :  { %s17930_s8 = smov 128  }
0x2013   :  { %13146 = dma.vmem_to_hbm [thread:$0]  %s13141_s6, 1024, %s17898_s17, [#allocation4], %s17930_s8, %s17930_s8, %s15178_s28  }
0x2014   :  { %15174 = dma.done.wait [#allocation4], 1024  }
0x2015   :  { %15175 = vsyncadd [#allocation4], 4294966272 }
0x2016   :  { %13150 = vsyncpa [#allocation3], 1 }
0x2017   :  { %13151 = vsyncpa [#allocation6], 1 }
0x2018   :  { %13152 = vsyncpa [#allocation9], 1 }
0x2019   :  { %13153 = vsyncpa [#allocation4], 1 }

</bundles_post_ra>
